<compile_context>
chip_gen: v7x
topology: tpu7x:2x2x1
jax: 0.10.0
libtpu: 0.0.40
codegen_flags: <defaults>
</compile_context>

<pallas_src>
import functools

import jax
import jax.numpy as jnp
from jax import lax
from jax.experimental import pallas as pl
from jax.experimental.pallas import tpu as pltpu

# ----------------- scaled-down, shape-consistent configuration ----------------
OMIC_SIZES = [20, 24, 28, 32]      # num_pathways = 4   (orig [100..600])
HIDDEN     = 32                    # SNN hidden dim     (orig 256)
HISTO_IN   = 48                    # histology feat dim (orig 1024)
PATH_PROJ  = 32                    # path_proj_dim      (orig 256) == HIDDEN (needed for OT cdist)
NUM_PROTO  = 8                     # numOfproto         (orig 16)
NUM_CLASSES = 4
MULT = 1
DIM_HEAD = PATH_PROJ // 2          # 16
OT_REG, OT_TAU = 0.1, 0.5
OT_ITERS = 1000                    # POT numItermax default (upper bound)
OT_STOP_THR = 1e-6                 # POT stopThr
OT_CHUNK = 20                      # convergence checked every OT_CHUNK iterations
LN_EPS = 1e-5
NUM_PATHWAYS = len(OMIC_SIZES)
MAX_OMIC = max(OMIC_SIZES)         # 32
SEQ = NUM_PATHWAYS + NUM_PROTO     # 12 tokens into the coattention block
FF_DIM = DIM_HEAD * MULT           # 16
FI = OT_TAU / (OT_TAU + OT_REG)    # POT's fi = reg_m / (reg_m + reg)


# ------------------------------ small helpers ----------------------------------
def _elu(x):
    return jnp.where(x > 0.0, x, jnp.exp(jnp.minimum(x, 0.0)) - 1.0)


def _gelu(x):
    # TODO(synk): torch.nn.GELU default is exact (erf); tanh approximation used here.
    c = 0.7978845608028654  # sqrt(2/pi)
    return 0.5 * x * (1.0 + jnp.tanh(c * (x + 0.044715 * x * x * x)))


def _layernorm(x, g, b):
    mu = jnp.mean(x, axis=-1, keepdims=True)
    var = jnp.mean((x - mu) ** 2, axis=-1, keepdims=True)
    return (x - mu) * lax.rsqrt(var + LN_EPS) * g + b


def _block_diag(blocks):
    """Block-diagonal assembly from 2D blocks (works on host values and inside kernels)."""
    total_c = sum(blk.shape[1] for blk in blocks)
    strips, c_off = [], 0
    for blk in blocks:
        r, c = blk.shape
        pieces = []
        if c_off > 0:
            pieces.append(jnp.zeros((r, c_off), jnp.float32))
        pieces.append(blk.astype(jnp.float32))
        if total_c - c_off - c > 0:
            pieces.append(jnp.zeros((r, total_c - c_off - c), jnp.float32))
        strips.append(jnp.concatenate(pieces, axis=1) if len(pieces) > 1 else pieces[0])
        c_off += c
    return jnp.concatenate(strips, axis=0) if len(strips) > 1 else strips[0]


# ------------------------------- the fused kernel -------------------------------
def _fused_forward_kernel(
    xo_ref, xp_ref,                       # batched inputs for this grid block
    w1_ref, b1_ref, w2_ref, b2_ref,       # block-diagonal SNN weights
    pw_ref, pb_ref,                       # histology projection
    ln1g_ref, ln1b_ref, wqkv_ref,         # MMAttentionLayer (self mode)
    ln2g_ref, ln2b_ref, ffw_ref, ffb_ref, # FeedForward
    ln3g_ref, ln3b_ref,                   # final LayerNorm
    cls_ref,                              # classifier (no bias)
    out_ref,                              # (1, bb, NUM_CLASSES)
    *, bb,
):
    NP, P, H = NUM_PROTO, NUM_PATHWAYS, HIDDEN

    # ---------- per-pathway SNNs as 2 block-diagonal 128-wide matmuls -----------
    xo = xo_ref[0]                                            # (bb, P*MAX_OMIC)
    h = _elu(jnp.dot(xo, w1_ref[...], preferred_element_type=jnp.float32) + b1_ref[...])
    h = _elu(jnp.dot(h, w2_ref[...], preferred_element_type=jnp.float32) + b2_ref[...])
    # h: (bb, P*H), pathway-major along lanes

    # ---------- histology projection for all samples of this block at once ------
    xp = xp_ref[0]                                            # (bb*NP, HISTO_IN)
    h_path_all = (jnp.dot(xp, pw_ref[...], preferred_element_type=jnp.float32)
                  + pb_ref[...])                              # (bb*NP, PROJ)

    # ---------- OT setup: per-sample cost / Gibbs kernel -> one block-diag K ----
    h_path_list, h_omic_list, K_list = [], [], []
    for b in range(bb):
        h_path_b = h_path_all[b * NP:(b + 1) * NP, :]         # (NP, PROJ)
        h_omic_b = jnp.concatenate(
            [h[b:b + 1, p * H:(p + 1) * H] for p in range(P)], axis=0)  # (P, PROJ)
        # normalize_feature: subtract per-row min over the feature dim
        xpn = h_path_b - jnp.min(h_path_b, axis=-1, keepdims=True)
        xon = h_omic_b - jnp.min(h_omic_b, axis=-1, keepdims=True)
        xp2 = jnp.sum(xpn * xpn, axis=-1, keepdims=True)      # (NP, 1)
        xo2 = jnp.sum(xon * xon, axis=-1, keepdims=True)      # (P, 1)
        cross = jnp.dot(xpn, xon.T, preferred_element_type=jnp.float32)  # (NP, P)
        cost = jnp.maximum(xp2 + xo2.T - 2.0 * cross, 0.0)
        cost = cost / jnp.maximum(jnp.max(cost), 1e-30)       # guard cost.max()==0
        K_list.append(jnp.exp(-cost / OT_REG))                # (NP, P)
        h_path_list.append(h_path_b)
        h_omic_list.append(h_omic_b)

    # forward kernels, then reverse kernels (reverse problem's kernel is K^T)
    K_big = _block_diag(K_list + [k.T for k in K_list])       # (D, D)
    D = bb * (NP + P)

    # ---------- unbalanced Sinkhorn: ONE chain for all samples & directions -----
    AFI_F = (1.0 / NP) ** FI    # hoisted exp(fi*log(a)) constants
    AFI_R = (1.0 / P) ** FI
    BFI_F = (1.0 / P) ** FI
    BFI_R = (1.0 / NP) ** FI
    tiny = 1e-30
    ridx = lax.broadcasted_iota(jnp.int32, (D, 1), 0)
    cidx = lax.broadcasted_iota(jnp.int32, (1, D), 1)
    afi = jnp.where(ridx < bb * NP, jnp.float32(AFI_F), jnp.float32(AFI_R))
    bfi = jnp.where(cidx < bb * P, jnp.float32(BFI_F), jnp.float32(BFI_R))
    u0 = jnp.where(ridx < bb * NP, jnp.float32(1.0 / NP), jnp.float32(1.0 / P))
    v0 = jnp.where(cidx < bb * P, jnp.float32(1.0 / P), jnp.float32(1.0 / NP))

    def one_iter(u, v):
        # TODO(synk): A/B the MXU mat-vec form (jnp.dot / lax.dot_general on K_big)
        # against this VPU+XLU reduce form per generation; the reduce form is kept as
        # the known-good lowering.
        kv = jnp.sum(K_big * v, axis=1, keepdims=True)                    # (D, 1)
        u = afi * jnp.exp(-FI * jnp.log(jnp.maximum(kv, tiny)))
        ktu = jnp.sum(K_big * u, axis=0, keepdims=True)                   # (1, D)
        v = bfi * jnp.exp(-FI * jnp.log(jnp.maximum(ktu, tiny)))
        return u, v

    def rel_change(new, old):
        den = jnp.maximum(jnp.maximum(jnp.max(jnp.abs(new)), jnp.max(jnp.abs(old))), 1.0)
        return jnp.max(jnp.abs(new - old)) / den

    def chunk_cond(st):
        it, err = st[0], st[1]
        return jnp.logical_and(it < OT_ITERS, err >= OT_STOP_THR)

    def chunk_body(st):
        it, _, u, v = st
        u_prev, v_prev = u, v
        for _ in range(OT_CHUNK):                            # unrolled hot chain
            u, v = one_iter(u, v)
        err = jnp.maximum(rel_change(u, u_prev), rel_change(v, v_prev))
        return (it + OT_CHUNK, err, u, v)

    # TODO(synk): POT runs unbalanced Sinkhorn in float64 with a per-iteration stopThr
    # and a NaN-revert guard; here float32, eps-clamped logs, convergence checked every
    # OT_CHUNK iterations (capped near numItermax).
    _, _, u, v = lax.while_loop(
        chunk_cond, chunk_body,
        (jnp.int32(0), jnp.float32(2.0 * OT_STOP_THR), u0, v0))

    # ---------- per-sample flows, coattention, FF, LN, pooling, classifier ------
    logits_rows = []
    for b in range(bb):
        K_b = K_list[b]
        h_path_b = h_path_list[b]
        h_omic_b = h_omic_list[b]
        u_f = u[b * NP:(b + 1) * NP, :]                          # (NP, 1)
        u_r = u[bb * NP + b * P: bb * NP + (b + 1) * P, :]       # (P, 1)
        v_f = v[:, b * P:(b + 1) * P]                            # (1, P)
        v_r = v[:, bb * P + b * NP: bb * P + (b + 1) * NP]       # (1, NP)

        # forward flow (NP, P); torch's .transpose(2,1) folded into the contraction
        flow_fwd = u_f * K_b * v_f                               # (NP, P)
        h_path_coattn = lax.dot_general(
            flow_fwd, h_path_b, (((0,), (0,)), ((), ())),
            preferred_element_type=jnp.float32)                  # (P, PROJ)
        # reverse flow emitted already transposed: flow_rev.T = v_r^T * K * u_r^T
        flow_rev_t = v_r.T * K_b * u_r.T                         # (NP, P)
        h_omic_coattn = jnp.dot(flow_rev_t, h_omic_b,
                                preferred_element_type=jnp.float32)  # (NP, PROJ)

        tokens = jnp.concatenate([h_path_coattn, h_omic_coattn], axis=0)  # (SEQ, PROJ)

        # -------- coattn: MMAttentionLayer('self') -> FeedForward -> LayerNorm ---
        # TODO(synk): MMAttentionLayer / FeedForward sources not provided; implemented
        # as LN -> qkv Linear (no bias) -> 1-head softmax attn, and LN -> Linear -> GELU.
        tn = _layernorm(tokens, ln1g_ref[...], ln1b_ref[...])
        qkv = jnp.dot(tn, wqkv_ref[...], preferred_element_type=jnp.float32)
        q = qkv[:, :DIM_HEAD]
        k = qkv[:, DIM_HEAD:2 * DIM_HEAD]
        vv = qkv[:, 2 * DIM_HEAD:]
        s = jnp.dot(q, k.T, preferred_element_type=jnp.float32) * (DIM_HEAD ** -0.5)
        s = s - jnp.max(s, axis=-1, keepdims=True)
        p_attn = jnp.exp(s)
        p_attn = p_attn / jnp.sum(p_attn, axis=-1, keepdims=True)
        x = jnp.dot(p_attn, vv, preferred_element_type=jnp.float32)       # (SEQ, DH)

        x = _layernorm(x, ln2g_ref[...], ln2b_ref[...])
        x = _gelu(jnp.dot(x, ffw_ref[...], preferred_element_type=jnp.float32)
                  + ffb_ref[...])
        x = _layernorm(x, ln3g_ref[...], ln3b_ref[...])                   # (SEQ, FF_DIM)

        # mean pooling (pathway / histology tokens)
        row = lax.broadcasted_iota(jnp.int32, (SEQ, 1), 0)
        is_path = row < NUM_PATHWAYS
        paths_emb = jnp.sum(jnp.where(is_path, x, 0.0), axis=0, keepdims=True) / NUM_PATHWAYS
        wsi_emb = jnp.sum(jnp.where(is_path, 0.0, x), axis=0, keepdims=True) / NUM_PROTO

        cls_w = cls_ref[...]                                              # (2*FF_DIM, C)
        logits = (jnp.dot(paths_emb, cls_w[:FF_DIM, :], preferred_element_type=jnp.float32)
                  + jnp.dot(wsi_emb, cls_w[FF_DIM:, :], preferred_element_type=jnp.float32))
        logits_rows.append(logits)

    out_ref[0] = jnp.concatenate(logits_rows, axis=0)


# ------------------------------- parameters ------------------------------------
def init_params(key):
    def linear(k, din, dout, bias=True):
        k1, k2 = jax.random.split(k)
        lim = 1.0 / (din ** 0.5)
        w = jax.random.uniform(k1, (din, dout), jnp.float32, -lim, lim)
        b = jax.random.uniform(k2, (dout,), jnp.float32, -lim, lim) if bias else None
        return w, b

    keys = jax.random.split(key, 8)
    params = {}
    # per-pathway SNNs assembled into block-diagonal weights (zero padding rows =>
    # padded inputs are inert, results exact).
    w1_blocks, w2_blocks, b1s, b2s = [], [], [], []
    kit = iter(jax.random.split(keys[0], 2 * NUM_PATHWAYS))
    for sz in OMIC_SIZES:
        w1, b1 = linear(next(kit), sz, HIDDEN)
        w2, b2 = linear(next(kit), HIDDEN, HIDDEN)
        w1_blocks.append(jnp.pad(w1, ((0, MAX_OMIC - sz), (0, 0))))
        w2_blocks.append(w2)
        b1s.append(b1)
        b2s.append(b2)
    params["w1_bd"] = _block_diag(w1_blocks)                  # (P*MAX_OMIC, P*HIDDEN)
    params["w2_bd"] = _block_diag(w2_blocks)                  # (P*HIDDEN, P*HIDDEN)
    params["b1"] = jnp.concatenate(b1s).reshape(1, NUM_PATHWAYS * HIDDEN)
    params["b2"] = jnp.concatenate(b2s).reshape(1, NUM_PATHWAYS * HIDDEN)
    # histology projection
    params["proj_w"], pb = linear(keys[1], HISTO_IN, PATH_PROJ)
    params["proj_b"] = pb.reshape(1, PATH_PROJ)
    # MMAttentionLayer (self mode): LayerNorm(dim) + qkv Linear (no bias)
    params["ln1_g"] = jnp.ones((1, PATH_PROJ), jnp.float32)
    params["ln1_b"] = jnp.zeros((1, PATH_PROJ), jnp.float32)
    params["wqkv"], _ = linear(keys[2], PATH_PROJ, 3 * DIM_HEAD, bias=False)
    # FeedForward: LayerNorm(dim_head) + Linear(dim_head, dim_head*mult) + GELU
    params["ln2_g"] = jnp.ones((1, DIM_HEAD), jnp.float32)
    params["ln2_b"] = jnp.zeros((1, DIM_HEAD), jnp.float32)
    ffw, ffb = linear(keys[3], DIM_HEAD, FF_DIM)
    params["ff_w"] = ffw
    params["ff_b"] = ffb.reshape(1, FF_DIM)
    # final LayerNorm
    params["ln3_g"] = jnp.ones((1, FF_DIM), jnp.float32)
    params["ln3_b"] = jnp.zeros((1, FF_DIM), jnp.float32)
    # classifier (bias=False)
    params["cls_w"], _ = linear(keys[4], 2 * FF_DIM, NUM_CLASSES, bias=False)
    return params


# ------------------------------ forward pass ------------------------------------
def _default_num_blocks(batch):
    # v7x: 2 TensorCores/chip -> split the batch across them (grid 'parallel').
    # v5e/v6e: single TC -> the grid is a serial loop; lane-pack the whole batch.
    try:
        kind = jax.devices()[0].device_kind.lower()
        if ("v7" in kind or "7x" in kind) and batch % 2 == 0:
            return 2
    except Exception:
        pass
    return 1


def coattn_mot_forward(params, x_path, x_omics, num_blocks=None):
    B = x_path.shape[0]
    if num_blocks is None:
        num_blocks = _default_num_blocks(B)
    if B % num_blocks != 0:
        num_blocks = 1
    bb = B // num_blocks

    # zero-pad & flatten omics to (B, P*MAX_OMIC); padding inert (zero weight rows).
    x_omic_pad = jnp.stack(
        [jnp.pad(f, ((0, 0), (0, MAX_OMIC - f.shape[1]))) for f in x_omics], axis=1)
    x_omic_flat = x_omic_pad.reshape(num_blocks, bb, NUM_PATHWAYS * MAX_OMIC)
    x_path_blk = x_path.reshape(num_blocks, bb * NUM_PROTO, HISTO_IN)

    args = (x_omic_flat, x_path_blk,
            params["w1_bd"], params["b1"], params["w2_bd"], params["b2"],
            params["proj_w"], params["proj_b"],
            params["ln1_g"], params["ln1_b"], params["wqkv"],
            params["ln2_g"], params["ln2_b"], params["ff_w"], params["ff_b"],
            params["ln3_g"], params["ln3_b"], params["cls_w"])

    blk3 = lambda last2: pl.BlockSpec((1,) + last2, lambda i: (i, 0, 0))
    const2 = lambda shape: pl.BlockSpec(shape, lambda i: (0, 0))

    grid_spec = pltpu.PrefetchScalarGridSpec(
        num_scalar_prefetch=0,
        grid=(num_blocks,),
        in_specs=[
            blk3((bb, NUM_PATHWAYS * MAX_OMIC)),              # x_omic_flat
            blk3((bb * NUM_PROTO, HISTO_IN)),                 # x_path
            const2((NUM_PATHWAYS * MAX_OMIC, NUM_PATHWAYS * HIDDEN)),  # w1_bd
            const2((1, NUM_PATHWAYS * HIDDEN)),               # b1
            const2((NUM_PATHWAYS * HIDDEN, NUM_PATHWAYS * HIDDEN)),    # w2_bd
            const2((1, NUM_PATHWAYS * HIDDEN)),               # b2
            const2((HISTO_IN, PATH_PROJ)),                    # proj_w
            const2((1, PATH_PROJ)),                           # proj_b
            const2((1, PATH_PROJ)),                           # ln1_g
            const2((1, PATH_PROJ)),                           # ln1_b
            const2((PATH_PROJ, 3 * DIM_HEAD)),                # wqkv
            const2((1, DIM_HEAD)),                            # ln2_g
            const2((1, DIM_HEAD)),                            # ln2_b
            const2((DIM_HEAD, FF_DIM)),                       # ff_w
            const2((1, FF_DIM)),                              # ff_b
            const2((1, FF_DIM)),                              # ln3_g
            const2((1, FF_DIM)),                              # ln3_b
            const2((2 * FF_DIM, NUM_CLASSES)),                # cls_w
        ],
        out_specs=pl.BlockSpec((1, bb, NUM_CLASSES), lambda i: (i, 0, 0)),
    )

    # advisory cost: worst-case Sinkhorn dominates (2 reduces + 2 log/exp chains per iter)
    D = bb * (NUM_PROTO + NUM_PATHWAYS)
    cost = pl.CostEstimate(
        flops=int(num_blocks * (OT_ITERS * 4 * D * D + bb * 200_000)),
        transcendentals=int(num_blocks * (OT_ITERS * 4 * D + bb * 2_000)),
        bytes_accessed=int(sum(int(a.size) * 4 for a in args) + B * NUM_CLASSES * 4))

    kernel = functools.partial(_fused_forward_kernel, bb=bb)
    logits3 = pl.pallas_call(
        kernel,
        grid_spec=grid_spec,
        out_shape=jax.ShapeDtypeStruct((num_blocks, bb, NUM_CLASSES), jnp.float32),
        compiler_params=pltpu.CompilerParams(
            dimension_semantics=("parallel",)),
        cost_estimate=cost,
    )(*args)
    return logits3.reshape(B, NUM_CLASSES)


if __name__ == "__main__":
    key = jax.random.PRNGKey(0)
    kp, kx, ko = jax.random.split(key, 3)
    params = init_params(kp)
    B = 2
    x_path = jax.random.normal(kx, (B, NUM_PROTO, HISTO_IN), jnp.float32)
    okeys = jax.random.split(ko, NUM_PATHWAYS)
    x_omics = [jax.random.normal(okeys[i], (B, OMIC_SIZES[i]), jnp.float32)
               for i in range(NUM_PATHWAYS)]
    logits = coattn_mot_forward(params, x_path, x_omics)
    jax.block_until_ready(logits)
    assert logits.shape == (B, NUM_CLASSES)
    print("KERNEL_OK")
</pallas_src>

<mosaic_0001>
module attributes {stable_mosaic.version = 11 : i64} {
  func.func @_fused_forward_kernel(%arg0: i32, %arg1: memref<1x2x128xf32, #tpu.memory_space<vmem>>, %arg2: memref<1x16x48xf32, #tpu.memory_space<vmem>>, %arg3: memref<128x128xf32, #tpu.memory_space<vmem>>, %arg4: memref<1x128xf32, #tpu.memory_space<vmem>>, %arg5: memref<128x128xf32, #tpu.memory_space<vmem>>, %arg6: memref<1x128xf32, #tpu.memory_space<vmem>>, %arg7: memref<48x32xf32, #tpu.memory_space<vmem>>, %arg8: memref<1x32xf32, #tpu.memory_space<vmem>>, %arg9: memref<1x32xf32, #tpu.memory_space<vmem>>, %arg10: memref<1x32xf32, #tpu.memory_space<vmem>>, %arg11: memref<32x48xf32, #tpu.memory_space<vmem>>, %arg12: memref<1x16xf32, #tpu.memory_space<vmem>>, %arg13: memref<1x16xf32, #tpu.memory_space<vmem>>, %arg14: memref<16x16xf32, #tpu.memory_space<vmem>>, %arg15: memref<1x16xf32, #tpu.memory_space<vmem>>, %arg16: memref<1x16xf32, #tpu.memory_space<vmem>>, %arg17: memref<1x16xf32, #tpu.memory_space<vmem>>, %arg18: memref<32x4xf32, #tpu.memory_space<vmem>>, %arg19: memref<1x2x4xf32, #tpu.memory_space<vmem>>) attributes {dimension_semantics = [#tpu.dimension_semantics<parallel>], iteration_bounds = array<i64: 1>, scalar_prefetch = 0 : i64, scratch_operands = 0 : i64, tpu.core_type = #tpu.core_type<tc>, window_params = [{transform_indices = @transform_0, window_bounds = array<i64: 1, 2, 128>}, {transform_indices = @transform_1, window_bounds = array<i64: 1, 16, 48>}, {pipeline_mode = #tpu.pipeline_mode<synchronous>, transform_indices = @transform_2, window_bounds = array<i64: 128, 128>}, {pipeline_mode = #tpu.pipeline_mode<synchronous>, transform_indices = @transform_3, window_bounds = array<i64: 1, 128>}, {pipeline_mode = #tpu.pipeline_mode<synchronous>, transform_indices = @transform_4, window_bounds = array<i64: 128, 128>}, {pipeline_mode = #tpu.pipeline_mode<synchronous>, transform_indices = @transform_5, window_bounds = array<i64: 1, 128>}, {pipeline_mode = #tpu.pipeline_mode<synchronous>, transform_indices = @transform_6, window_bounds = array<i64: 48, 32>}, {pipeline_mode = #tpu.pipeline_mode<synchronous>, transform_indices = @transform_7, window_bounds = array<i64: 1, 32>}, {pipeline_mode = #tpu.pipeline_mode<synchronous>, transform_indices = @transform_8, window_bounds = array<i64: 1, 32>}, {pipeline_mode = #tpu.pipeline_mode<synchronous>, transform_indices = @transform_9, window_bounds = array<i64: 1, 32>}, {pipeline_mode = #tpu.pipeline_mode<synchronous>, transform_indices = @transform_10, window_bounds = array<i64: 32, 48>}, {pipeline_mode = #tpu.pipeline_mode<synchronous>, transform_indices = @transform_11, window_bounds = array<i64: 1, 16>}, {pipeline_mode = #tpu.pipeline_mode<synchronous>, transform_indices = @transform_12, window_bounds = array<i64: 1, 16>}, {pipeline_mode = #tpu.pipeline_mode<synchronous>, transform_indices = @transform_13, window_bounds = array<i64: 16, 16>}, {pipeline_mode = #tpu.pipeline_mode<synchronous>, transform_indices = @transform_14, window_bounds = array<i64: 1, 16>}, {pipeline_mode = #tpu.pipeline_mode<synchronous>, transform_indices = @transform_15, window_bounds = array<i64: 1, 16>}, {pipeline_mode = #tpu.pipeline_mode<synchronous>, transform_indices = @transform_16, window_bounds = array<i64: 1, 16>}, {pipeline_mode = #tpu.pipeline_mode<synchronous>, transform_indices = @transform_17, window_bounds = array<i64: 32, 4>}, {transform_indices = @transform_18, window_bounds = array<i64: 1, 2, 4>}]} {
    %c0 = arith.constant 0 : index
    %c0_0 = arith.constant 0 : index
    %c0_1 = arith.constant 0 : index
    %0 = vector.load %arg1[%c0, %c0_0, %c0_1] : memref<1x2x128xf32, #tpu.memory_space<vmem>>, vector<1x2x128xf32>
    %1 = vector.shape_cast %0 : vector<1x2x128xf32> to vector<2x128xf32>
    %c0_2 = arith.constant 0 : index
    %c0_3 = arith.constant 0 : index
    %2 = vector.load %arg3[%c0_2, %c0_3] : memref<128x128xf32, #tpu.memory_space<vmem>>, vector<128x128xf32>
    %cst = arith.constant dense<0.000000e+00> : vector<2x128xf32>
    %3 = tpu.matmul %1, %2, %cst {dimension_numbers = #tpu.dot_dimension_numbers<[1], [0], [0], [1], [0, 0, 1, 1], [], []>} : vector<2x128xf32>, vector<128x128xf32>, vector<2x128xf32> -> vector<2x128xf32>
    %c0_4 = arith.constant 0 : index
    %c0_5 = arith.constant 0 : index
    %4 = vector.load %arg4[%c0_4, %c0_5] : memref<1x128xf32, #tpu.memory_space<vmem>>, vector<1x128xf32>
    %5 = vector.broadcast %4 : vector<1x128xf32> to vector<2x128xf32>
    %6 = arith.addf %3, %5 : vector<2x128xf32>
    %cst_6 = arith.constant 0.000000e+00 : f32
    %7 = vector.broadcast %cst_6 : f32 to vector<2x128xf32>
    %8 = arith.cmpf ogt, %6, %7 : vector<2x128xf32>
    %cst_7 = arith.constant 0.000000e+00 : f32
    %9 = vector.broadcast %cst_7 : f32 to vector<2x128xf32>
    %10 = arith.minimumf %6, %9 : vector<2x128xf32>
    %11 = math.exp %10 : vector<2x128xf32>
    %cst_8 = arith.constant 1.000000e+00 : f32
    %12 = vector.broadcast %cst_8 : f32 to vector<2x128xf32>
    %13 = arith.subf %11, %12 : vector<2x128xf32>
    %14 = arith.select %8, %6, %13 : vector<2x128xi1>, vector<2x128xf32>
    %c0_9 = arith.constant 0 : index
    %c0_10 = arith.constant 0 : index
    %15 = vector.load %arg5[%c0_9, %c0_10] : memref<128x128xf32, #tpu.memory_space<vmem>>, vector<128x128xf32>
    %cst_11 = arith.constant dense<0.000000e+00> : vector<2x128xf32>
    %16 = tpu.matmul %14, %15, %cst_11 {dimension_numbers = #tpu.dot_dimension_numbers<[1], [0], [0], [1], [0, 0, 1, 1], [], []>} : vector<2x128xf32>, vector<128x128xf32>, vector<2x128xf32> -> vector<2x128xf32>
    %c0_12 = arith.constant 0 : index
    %c0_13 = arith.constant 0 : index
    %17 = vector.load %arg6[%c0_12, %c0_13] : memref<1x128xf32, #tpu.memory_space<vmem>>, vector<1x128xf32>
    %18 = vector.broadcast %17 : vector<1x128xf32> to vector<2x128xf32>
    %19 = arith.addf %16, %18 : vector<2x128xf32>
    %cst_14 = arith.constant 0.000000e+00 : f32
    %20 = vector.broadcast %cst_14 : f32 to vector<2x128xf32>
    %21 = arith.cmpf ogt, %19, %20 : vector<2x128xf32>
    %cst_15 = arith.constant 0.000000e+00 : f32
    %22 = vector.broadcast %cst_15 : f32 to vector<2x128xf32>
    %23 = arith.minimumf %19, %22 : vector<2x128xf32>
    %24 = math.exp %23 : vector<2x128xf32>
    %cst_16 = arith.constant 1.000000e+00 : f32
    %25 = vector.broadcast %cst_16 : f32 to vector<2x128xf32>
    %26 = arith.subf %24, %25 : vector<2x128xf32>
    %27 = arith.select %21, %19, %26 : vector<2x128xi1>, vector<2x128xf32>
    %c0_17 = arith.constant 0 : index
    %c0_18 = arith.constant 0 : index
    %c0_19 = arith.constant 0 : index
    %28 = vector.load %arg2[%c0_17, %c0_18, %c0_19] : memref<1x16x48xf32, #tpu.memory_space<vmem>>, vector<1x16x48xf32>
    %29 = vector.shape_cast %28 : vector<1x16x48xf32> to vector<16x48xf32>
    %c0_20 = arith.constant 0 : index
    %c0_21 = arith.constant 0 : index
    %30 = vector.load %arg7[%c0_20, %c0_21] : memref<48x32xf32, #tpu.memory_space<vmem>>, vector<48x32xf32>
    %cst_22 = arith.constant dense<0.000000e+00> : vector<16x32xf32>
    %31 = tpu.matmul %29, %30, %cst_22 {dimension_numbers = #tpu.dot_dimension_numbers<[1], [0], [0], [1], [0, 0, 1, 1], [], []>} : vector<16x48xf32>, vector<48x32xf32>, vector<16x32xf32> -> vector<16x32xf32>
    %c0_23 = arith.constant 0 : index
    %c0_24 = arith.constant 0 : index
    %32 = vector.load %arg8[%c0_23, %c0_24] : memref<1x32xf32, #tpu.memory_space<vmem>>, vector<1x32xf32>
    %33 = vector.broadcast %32 : vector<1x32xf32> to vector<16x32xf32>
    %34 = arith.addf %31, %33 : vector<16x32xf32>
    %35 = vector.extract_strided_slice %34 {offsets = [0, 0], sizes = [8, 32], strides = [1, 1]} : vector<16x32xf32> to vector<8x32xf32>
    %36 = vector.extract_strided_slice %27 {offsets = [0, 0], sizes = [1, 32], strides = [1, 1]} : vector<2x128xf32> to vector<1x32xf32>
    %37 = vector.extract_strided_slice %27 {offsets = [0, 32], sizes = [1, 32], strides = [1, 1]} : vector<2x128xf32> to vector<1x32xf32>
    %38 = vector.extract_strided_slice %27 {offsets = [0, 64], sizes = [1, 32], strides = [1, 1]} : vector<2x128xf32> to vector<1x32xf32>
    %39 = vector.extract_strided_slice %27 {offsets = [0, 96], sizes = [1, 32], strides = [1, 1]} : vector<2x128xf32> to vector<1x32xf32>
    %40 = tpu.concatenate %36, %37, %38, %39 in 0 : vector<1x32xf32>, vector<1x32xf32>, vector<1x32xf32>, vector<1x32xf32> -> vector<4x32xf32>
    %cst_25 = arith.constant dense<0x7F800000> : vector<8xf32>
    %41 = vector.multi_reduction <minimumf>, %35, %cst_25 [1] : vector<8x32xf32> to vector<8xf32>
    %42 = vector.shape_cast %41 : vector<8xf32> to vector<8x1xf32>
    %43 = vector.broadcast %42 : vector<8x1xf32> to vector<8x32xf32>
    %44 = arith.subf %35, %43 : vector<8x32xf32>
    %cst_26 = arith.constant dense<0x7F800000> : vector<4xf32>
    %45 = vector.multi_reduction <minimumf>, %40, %cst_26 [1] : vector<4x32xf32> to vector<4xf32>
    %46 = vector.shape_cast %45 : vector<4xf32> to vector<4x1xf32>
    %47 = vector.broadcast %46 : vector<4x1xf32> to vector<4x32xf32>
    %48 = arith.subf %40, %47 : vector<4x32xf32>
    %49 = arith.mulf %44, %44 : vector<8x32xf32>
    %cst_27 = arith.constant dense<0.000000e+00> : vector<8xf32>
    %50 = vector.multi_reduction <add>, %49, %cst_27 [1] : vector<8x32xf32> to vector<8xf32>
    %51 = vector.shape_cast %50 : vector<8xf32> to vector<8x1xf32>
    %52 = arith.mulf %48, %48 : vector<4x32xf32>
    %cst_28 = arith.constant dense<0.000000e+00> : vector<4xf32>
    %53 = vector.multi_reduction <add>, %52, %cst_28 [1] : vector<4x32xf32> to vector<4xf32>
    %54 = vector.shape_cast %53 : vector<4xf32> to vector<4x1xf32>
    %55 = tpu.transpose %48, [1, 0] : vector<4x32xf32> -> vector<32x4xf32>
    %cst_29 = arith.constant dense<0.000000e+00> : vector<8x4xf32>
    %56 = tpu.matmul %44, %55, %cst_29 {dimension_numbers = #tpu.dot_dimension_numbers<[1], [0], [0], [1], [0, 0, 1, 1], [], []>} : vector<8x32xf32>, vector<32x4xf32>, vector<8x4xf32> -> vector<8x4xf32>
    %57 = tpu.transpose %54, [1, 0] : vector<4x1xf32> -> vector<1x4xf32>
    %58 = vector.broadcast %51 : vector<8x1xf32> to vector<8x4xf32>
    %59 = vector.broadcast %57 : vector<1x4xf32> to vector<8x4xf32>
    %60 = arith.addf %58, %59 : vector<8x4xf32>
    %cst_30 = arith.constant 2.000000e+00 : f32
    %61 = vector.broadcast %cst_30 : f32 to vector<8x4xf32>
    %62 = arith.mulf %61, %56 : vector<8x4xf32>
    %63 = arith.subf %60, %62 : vector<8x4xf32>
    %cst_31 = arith.constant 0.000000e+00 : f32
    %64 = vector.broadcast %cst_31 : f32 to vector<8x4xf32>
    %65 = arith.maximumf %63, %64 : vector<8x4xf32>
    %66 = vector.shape_cast %65 : vector<8x4xf32> to vector<1x8x4xf32>
    %cst_32 = arith.constant dense<0xFF800000> : vector<1xf32>
    %67 = vector.multi_reduction <maximumf>, %66, %cst_32 [1, 2] : vector<1x8x4xf32> to vector<1xf32>
    %68 = vector.shape_cast %67 : vector<1xf32> to vector<1x1x1xf32>
    %69 = vector.extract %68[0, 0, 0] : f32 from vector<1x1x1xf32>
    %cst_33 = arith.constant 1.000000e-30 : f32
    %70 = arith.maximumf %69, %cst_33 : f32
    %71 = vector.broadcast %70 : f32 to vector<8x4xf32>
    %72 = arith.divf %65, %71 : vector<8x4xf32>
    %cst_34 = arith.constant 0.000000e+00 : f32
    %73 = vector.broadcast %cst_34 : f32 to vector<8x4xf32>
    %74 = arith.subf %73, %72 : vector<8x4xf32>
    %cst_35 = arith.constant 1.000000e-01 : f32
    %75 = vector.broadcast %cst_35 : f32 to vector<8x4xf32>
    %76 = arith.divf %74, %75 : vector<8x4xf32>
    %77 = math.exp %76 : vector<8x4xf32>
    %78 = vector.extract_strided_slice %34 {offsets = [8, 0], sizes = [8, 32], strides = [1, 1]} : vector<16x32xf32> to vector<8x32xf32>
    %79 = vector.extract_strided_slice %27 {offsets = [1, 0], sizes = [1, 32], strides = [1, 1]} : vector<2x128xf32> to vector<1x32xf32>
    %80 = vector.extract_strided_slice %27 {offsets = [1, 32], sizes = [1, 32], strides = [1, 1]} : vector<2x128xf32> to vector<1x32xf32>
    %81 = vector.extract_strided_slice %27 {offsets = [1, 64], sizes = [1, 32], strides = [1, 1]} : vector<2x128xf32> to vector<1x32xf32>
    %82 = vector.extract_strided_slice %27 {offsets = [1, 96], sizes = [1, 32], strides = [1, 1]} : vector<2x128xf32> to vector<1x32xf32>
    %83 = tpu.concatenate %79, %80, %81, %82 in 0 : vector<1x32xf32>, vector<1x32xf32>, vector<1x32xf32>, vector<1x32xf32> -> vector<4x32xf32>
    %cst_36 = arith.constant dense<0x7F800000> : vector<8xf32>
    %84 = vector.multi_reduction <minimumf>, %78, %cst_36 [1] : vector<8x32xf32> to vector<8xf32>
    %85 = vector.shape_cast %84 : vector<8xf32> to vector<8x1xf32>
    %86 = vector.broadcast %85 : vector<8x1xf32> to vector<8x32xf32>
    %87 = arith.subf %78, %86 : vector<8x32xf32>
    %cst_37 = arith.constant dense<0x7F800000> : vector<4xf32>
    %88 = vector.multi_reduction <minimumf>, %83, %cst_37 [1] : vector<4x32xf32> to vector<4xf32>
    %89 = vector.shape_cast %88 : vector<4xf32> to vector<4x1xf32>
    %90 = vector.broadcast %89 : vector<4x1xf32> to vector<4x32xf32>
    %91 = arith.subf %83, %90 : vector<4x32xf32>
    %92 = arith.mulf %87, %87 : vector<8x32xf32>
    %cst_38 = arith.constant dense<0.000000e+00> : vector<8xf32>
    %93 = vector.multi_reduction <add>, %92, %cst_38 [1] : vector<8x32xf32> to vector<8xf32>
    %94 = vector.shape_cast %93 : vector<8xf32> to vector<8x1xf32>
    %95 = arith.mulf %91, %91 : vector<4x32xf32>
    %cst_39 = arith.constant dense<0.000000e+00> : vector<4xf32>
    %96 = vector.multi_reduction <add>, %95, %cst_39 [1] : vector<4x32xf32> to vector<4xf32>
    %97 = vector.shape_cast %96 : vector<4xf32> to vector<4x1xf32>
    %98 = tpu.transpose %91, [1, 0] : vector<4x32xf32> -> vector<32x4xf32>
    %cst_40 = arith.constant dense<0.000000e+00> : vector<8x4xf32>
    %99 = tpu.matmul %87, %98, %cst_40 {dimension_numbers = #tpu.dot_dimension_numbers<[1], [0], [0], [1], [0, 0, 1, 1], [], []>} : vector<8x32xf32>, vector<32x4xf32>, vector<8x4xf32> -> vector<8x4xf32>
    %100 = tpu.transpose %97, [1, 0] : vector<4x1xf32> -> vector<1x4xf32>
    %101 = vector.broadcast %94 : vector<8x1xf32> to vector<8x4xf32>
    %102 = vector.broadcast %100 : vector<1x4xf32> to vector<8x4xf32>
    %103 = arith.addf %101, %102 : vector<8x4xf32>
    %cst_41 = arith.constant 2.000000e+00 : f32
    %104 = vector.broadcast %cst_41 : f32 to vector<8x4xf32>
    %105 = arith.mulf %104, %99 : vector<8x4xf32>
    %106 = arith.subf %103, %105 : vector<8x4xf32>
    %cst_42 = arith.constant 0.000000e+00 : f32
    %107 = vector.broadcast %cst_42 : f32 to vector<8x4xf32>
    %108 = arith.maximumf %106, %107 : vector<8x4xf32>
    %109 = vector.shape_cast %108 : vector<8x4xf32> to vector<1x8x4xf32>
    %cst_43 = arith.constant dense<0xFF800000> : vector<1xf32>
    %110 = vector.multi_reduction <maximumf>, %109, %cst_43 [1, 2] : vector<1x8x4xf32> to vector<1xf32>
    %111 = vector.shape_cast %110 : vector<1xf32> to vector<1x1x1xf32>
    %112 = vector.extract %111[0, 0, 0] : f32 from vector<1x1x1xf32>
    %cst_44 = arith.constant 1.000000e-30 : f32
    %113 = arith.maximumf %112, %cst_44 : f32
    %114 = vector.broadcast %113 : f32 to vector<8x4xf32>
    %115 = arith.divf %108, %114 : vector<8x4xf32>
    %cst_45 = arith.constant 0.000000e+00 : f32
    %116 = vector.broadcast %cst_45 : f32 to vector<8x4xf32>
    %117 = arith.subf %116, %115 : vector<8x4xf32>
    %cst_46 = arith.constant 1.000000e-01 : f32
    %118 = vector.broadcast %cst_46 : f32 to vector<8x4xf32>
    %119 = arith.divf %117, %118 : vector<8x4xf32>
    %120 = math.exp %119 : vector<8x4xf32>
    %121 = tpu.transpose %77, [1, 0] : vector<8x4xf32> -> vector<4x8xf32>
    %122 = tpu.transpose %120, [1, 0] : vector<8x4xf32> -> vector<4x8xf32>
    %cst_47 = arith.constant 0.000000e+00 : f32
    %123 = vector.broadcast %cst_47 : f32 to vector<8x20xf32>
    %124 = tpu.concatenate %77, %123 in 1 : vector<8x4xf32>, vector<8x20xf32> -> vector<8x24xf32>
    %cst_48 = arith.constant 0.000000e+00 : f32
    %125 = vector.broadcast %cst_48 : f32 to vector<8x4xf32>
    %cst_49 = arith.constant 0.000000e+00 : f32
    %126 = vector.broadcast %cst_49 : f32 to vector<8x16xf32>
    %127 = tpu.concatenate %125, %120, %126 in 1 : vector<8x4xf32>, vector<8x4xf32>, vector<8x16xf32> -> vector<8x24xf32>
    %cst_50 = arith.constant 0.000000e+00 : f32
    %128 = vector.broadcast %cst_50 : f32 to vector<4x8xf32>
    %cst_51 = arith.constant 0.000000e+00 : f32
    %129 = vector.broadcast %cst_51 : f32 to vector<4x8xf32>
    %130 = tpu.concatenate %128, %121, %129 in 1 : vector<4x8xf32>, vector<4x8xf32>, vector<4x8xf32> -> vector<4x24xf32>
    %cst_52 = arith.constant 0.000000e+00 : f32
    %131 = vector.broadcast %cst_52 : f32 to vector<4x16xf32>
    %132 = tpu.concatenate %131, %122 in 1 : vector<4x16xf32>, vector<4x8xf32> -> vector<4x24xf32>
    %133 = tpu.concatenate %124, %127, %130, %132 in 0 : vector<8x24xf32>, vector<8x24xf32>, vector<4x24xf32>, vector<4x24xf32> -> vector<24x24xf32>
    %134 = tpu.iota {dimensions = array<i32: 0>} : vector<24x1xi32>
    %135 = tpu.iota {dimensions = array<i32: 1>} : vector<1x24xi32>
    %c16_i32 = arith.constant 16 : i32
    %136 = vector.broadcast %c16_i32 : i32 to vector<24x1xi32>
    %137 = arith.cmpi slt, %134, %136 : vector<24x1xi32>
    %cst_53 = arith.constant 0.176776692 : f32
    %cst_54 = arith.constant 0.314980268 : f32
    %138 = vector.broadcast %cst_53 : f32 to vector<24x1xf32>
    %139 = vector.broadcast %cst_54 : f32 to vector<24x1xf32>
    %140 = arith.select %137, %138, %139 : vector<24x1xi1>, vector<24x1xf32>
    %c8_i32 = arith.constant 8 : i32
    %141 = vector.broadcast %c8_i32 : i32 to vector<1x24xi32>
    %142 = arith.cmpi slt, %135, %141 : vector<1x24xi32>
    %cst_55 = arith.constant 0.314980268 : f32
    %cst_56 = arith.constant 0.176776692 : f32
    %143 = vector.broadcast %cst_55 : f32 to vector<1x24xf32>
    %144 = vector.broadcast %cst_56 : f32 to vector<1x24xf32>
    %145 = arith.select %142, %143, %144 : vector<1x24xi1>, vector<1x24xf32>
    %c16_i32_57 = arith.constant 16 : i32
    %146 = vector.broadcast %c16_i32_57 : i32 to vector<24x1xi32>
    %147 = arith.cmpi slt, %134, %146 : vector<24x1xi32>
    %cst_58 = arith.constant 1.250000e-01 : f32
    %cst_59 = arith.constant 2.500000e-01 : f32
    %148 = vector.broadcast %cst_58 : f32 to vector<24x1xf32>
    %149 = vector.broadcast %cst_59 : f32 to vector<24x1xf32>
    %150 = arith.select %147, %148, %149 : vector<24x1xi1>, vector<24x1xf32>
    %c8_i32_60 = arith.constant 8 : i32
    %151 = vector.broadcast %c8_i32_60 : i32 to vector<1x24xi32>
    %152 = arith.cmpi slt, %135, %151 : vector<1x24xi32>
    %cst_61 = arith.constant 2.500000e-01 : f32
    %cst_62 = arith.constant 1.250000e-01 : f32
    %153 = vector.broadcast %cst_61 : f32 to vector<1x24xf32>
    %154 = vector.broadcast %cst_62 : f32 to vector<1x24xf32>
    %155 = arith.select %152, %153, %154 : vector<1x24xi1>, vector<1x24xf32>
    %c0_i32 = arith.constant 0 : i32
    %cst_63 = arith.constant 2.000000e-06 : f32
    %156:4 = scf.while (%arg20 = %c0_i32, %arg21 = %cst_63, %arg22 = %150, %arg23 = %155) : (i32, f32, vector<24x1xf32>, vector<1x24xf32>) -> (i32, f32, vector<24x1xf32>, vector<1x24xf32>) {
      %c1000_i32 = arith.constant 1000 : i32
      %463 = arith.cmpi slt, %arg20, %c1000_i32 : i32
      %cst_180 = arith.constant 9.99999997E-7 : f32
      %464 = arith.cmpf oge, %arg21, %cst_180 : f32
      %465 = arith.andi %463, %464 : i1
      scf.condition(%465) %arg20, %arg21, %arg22, %arg23 : i32, f32, vector<24x1xf32>, vector<1x24xf32>
    } do {
    ^bb0(%arg20: i32, %arg21: f32, %arg22: vector<24x1xf32>, %arg23: vector<1x24xf32>):
      %463 = vector.broadcast %arg23 : vector<1x24xf32> to vector<24x24xf32>
      %464 = arith.mulf %133, %463 : vector<24x24xf32>
      %cst_180 = arith.constant dense<0.000000e+00> : vector<24xf32>
      %465 = vector.multi_reduction <add>, %464, %cst_180 [1] : vector<24x24xf32> to vector<24xf32>
      %466 = vector.shape_cast %465 : vector<24xf32> to vector<24x1xf32>
      %cst_181 = arith.constant 1.000000e-30 : f32
      %467 = vector.broadcast %cst_181 : f32 to vector<24x1xf32>
      %468 = arith.maximumf %466, %467 : vector<24x1xf32>
      %469 = math.log %468 : vector<24x1xf32>
      %cst_182 = arith.constant -0.833333313 : f32
      %470 = vector.broadcast %cst_182 : f32 to vector<24x1xf32>
      %471 = arith.mulf %470, %469 : vector<24x1xf32>
      %472 = math.exp %471 : vector<24x1xf32>
      %473 = arith.mulf %140, %472 : vector<24x1xf32>
      %474 = vector.broadcast %473 : vector<24x1xf32> to vector<24x24xf32>
      %475 = arith.mulf %133, %474 : vector<24x24xf32>
      %cst_183 = arith.constant dense<0.000000e+00> : vector<24xf32>
      %476 = vector.multi_reduction <add>, %475, %cst_183 [0] : vector<24x24xf32> to vector<24xf32>
      %477 = vector.shape_cast %476 : vector<24xf32> to vector<1x24xf32>
      %cst_184 = arith.constant 1.000000e-30 : f32
      %478 = vector.broadcast %cst_184 : f32 to vector<1x24xf32>
      %479 = arith.maximumf %477, %478 : vector<1x24xf32>
      %480 = math.log %479 : vector<1x24xf32>
      %cst_185 = arith.constant -0.833333313 : f32
      %481 = vector.broadcast %cst_185 : f32 to vector<1x24xf32>
      %482 = arith.mulf %481, %480 : vector<1x24xf32>
      %483 = math.exp %482 : vector<1x24xf32>
      %484 = arith.mulf %145, %483 : vector<1x24xf32>
      %485 = vector.broadcast %484 : vector<1x24xf32> to vector<24x24xf32>
      %486 = arith.mulf %133, %485 : vector<24x24xf32>
      %cst_186 = arith.constant dense<0.000000e+00> : vector<24xf32>
      %487 = vector.multi_reduction <add>, %486, %cst_186 [1] : vector<24x24xf32> to vector<24xf32>
      %488 = vector.shape_cast %487 : vector<24xf32> to vector<24x1xf32>
      %cst_187 = arith.constant 1.000000e-30 : f32
      %489 = vector.broadcast %cst_187 : f32 to vector<24x1xf32>
      %490 = arith.maximumf %488, %489 : vector<24x1xf32>
      %491 = math.log %490 : vector<24x1xf32>
      %cst_188 = arith.constant -0.833333313 : f32
      %492 = vector.broadcast %cst_188 : f32 to vector<24x1xf32>
      %493 = arith.mulf %492, %491 : vector<24x1xf32>
      %494 = math.exp %493 : vector<24x1xf32>
      %495 = arith.mulf %140, %494 : vector<24x1xf32>
      %496 = vector.broadcast %495 : vector<24x1xf32> to vector<24x24xf32>
      %497 = arith.mulf %133, %496 : vector<24x24xf32>
      %cst_189 = arith.constant dense<0.000000e+00> : vector<24xf32>
      %498 = vector.multi_reduction <add>, %497, %cst_189 [0] : vector<24x24xf32> to vector<24xf32>
      %499 = vector.shape_cast %498 : vector<24xf32> to vector<1x24xf32>
      %cst_190 = arith.constant 1.000000e-30 : f32
      %500 = vector.broadcast %cst_190 : f32 to vector<1x24xf32>
      %501 = arith.maximumf %499, %500 : vector<1x24xf32>
      %502 = math.log %501 : vector<1x24xf32>
      %cst_191 = arith.constant -0.833333313 : f32
      %503 = vector.broadcast %cst_191 : f32 to vector<1x24xf32>
      %504 = arith.mulf %503, %502 : vector<1x24xf32>
      %505 = math.exp %504 : vector<1x24xf32>
      %506 = arith.mulf %145, %505 : vector<1x24xf32>
      %507 = vector.broadcast %506 : vector<1x24xf32> to vector<24x24xf32>
      %508 = arith.mulf %133, %507 : vector<24x24xf32>
      %cst_192 = arith.constant dense<0.000000e+00> : vector<24xf32>
      %509 = vector.multi_reduction <add>, %508, %cst_192 [1] : vector<24x24xf32> to vector<24xf32>
      %510 = vector.shape_cast %509 : vector<24xf32> to vector<24x1xf32>
      %cst_193 = arith.constant 1.000000e-30 : f32
      %511 = vector.broadcast %cst_193 : f32 to vector<24x1xf32>
      %512 = arith.maximumf %510, %511 : vector<24x1xf32>
      %513 = math.log %512 : vector<24x1xf32>
      %cst_194 = arith.constant -0.833333313 : f32
      %514 = vector.broadcast %cst_194 : f32 to vector<24x1xf32>
      %515 = arith.mulf %514, %513 : vector<24x1xf32>
      %516 = math.exp %515 : vector<24x1xf32>
      %517 = arith.mulf %140, %516 : vector<24x1xf32>
      %518 = vector.broadcast %517 : vector<24x1xf32> to vector<24x24xf32>
      %519 = arith.mulf %133, %518 : vector<24x24xf32>
      %cst_195 = arith.constant dense<0.000000e+00> : vector<24xf32>
      %520 = vector.multi_reduction <add>, %519, %cst_195 [0] : vector<24x24xf32> to vector<24xf32>
      %521 = vector.shape_cast %520 : vector<24xf32> to vector<1x24xf32>
      %cst_196 = arith.constant 1.000000e-30 : f32
      %522 = vector.broadcast %cst_196 : f32 to vector<1x24xf32>
      %523 = arith.maximumf %521, %522 : vector<1x24xf32>
      %524 = math.log %523 : vector<1x24xf32>
      %cst_197 = arith.constant -0.833333313 : f32
      %525 = vector.broadcast %cst_197 : f32 to vector<1x24xf32>
      %526 = arith.mulf %525, %524 : vector<1x24xf32>
      %527 = math.exp %526 : vector<1x24xf32>
      %528 = arith.mulf %145, %527 : vector<1x24xf32>
      %529 = vector.broadcast %528 : vector<1x24xf32> to vector<24x24xf32>
      %530 = arith.mulf %133, %529 : vector<24x24xf32>
      %cst_198 = arith.constant dense<0.000000e+00> : vector<24xf32>
      %531 = vector.multi_reduction <add>, %530, %cst_198 [1] : vector<24x24xf32> to vector<24xf32>
      %532 = vector.shape_cast %531 : vector<24xf32> to vector<24x1xf32>
      %cst_199 = arith.constant 1.000000e-30 : f32
      %533 = vector.broadcast %cst_199 : f32 to vector<24x1xf32>
      %534 = arith.maximumf %532, %533 : vector<24x1xf32>
      %535 = math.log %534 : vector<24x1xf32>
      %cst_200 = arith.constant -0.833333313 : f32
      %536 = vector.broadcast %cst_200 : f32 to vector<24x1xf32>
      %537 = arith.mulf %536, %535 : vector<24x1xf32>
      %538 = math.exp %537 : vector<24x1xf32>
      %539 = arith.mulf %140, %538 : vector<24x1xf32>
      %540 = vector.broadcast %539 : vector<24x1xf32> to vector<24x24xf32>
      %541 = arith.mulf %133, %540 : vector<24x24xf32>
      %cst_201 = arith.constant dense<0.000000e+00> : vector<24xf32>
      %542 = vector.multi_reduction <add>, %541, %cst_201 [0] : vector<24x24xf32> to vector<24xf32>
      %543 = vector.shape_cast %542 : vector<24xf32> to vector<1x24xf32>
      %cst_202 = arith.constant 1.000000e-30 : f32
      %544 = vector.broadcast %cst_202 : f32 to vector<1x24xf32>
      %545 = arith.maximumf %543, %544 : vector<1x24xf32>
      %546 = math.log %545 : vector<1x24xf32>
      %cst_203 = arith.constant -0.833333313 : f32
      %547 = vector.broadcast %cst_203 : f32 to vector<1x24xf32>
      %548 = arith.mulf %547, %546 : vector<1x24xf32>
      %549 = math.exp %548 : vector<1x24xf32>
      %550 = arith.mulf %145, %549 : vector<1x24xf32>
      %551 = vector.broadcast %550 : vector<1x24xf32> to vector<24x24xf32>
      %552 = arith.mulf %133, %551 : vector<24x24xf32>
      %cst_204 = arith.constant dense<0.000000e+00> : vector<24xf32>
      %553 = vector.multi_reduction <add>, %552, %cst_204 [1] : vector<24x24xf32> to vector<24xf32>
      %554 = vector.shape_cast %553 : vector<24xf32> to vector<24x1xf32>
      %cst_205 = arith.constant 1.000000e-30 : f32
      %555 = vector.broadcast %cst_205 : f32 to vector<24x1xf32>
      %556 = arith.maximumf %554, %555 : vector<24x1xf32>
      %557 = math.log %556 : vector<24x1xf32>
      %cst_206 = arith.constant -0.833333313 : f32
      %558 = vector.broadcast %cst_206 : f32 to vector<24x1xf32>
      %559 = arith.mulf %558, %557 : vector<24x1xf32>
      %560 = math.exp %559 : vector<24x1xf32>
      %561 = arith.mulf %140, %560 : vector<24x1xf32>
      %562 = vector.broadcast %561 : vector<24x1xf32> to vector<24x24xf32>
      %563 = arith.mulf %133, %562 : vector<24x24xf32>
      %cst_207 = arith.constant dense<0.000000e+00> : vector<24xf32>
      %564 = vector.multi_reduction <add>, %563, %cst_207 [0] : vector<24x24xf32> to vector<24xf32>
      %565 = vector.shape_cast %564 : vector<24xf32> to vector<1x24xf32>
      %cst_208 = arith.constant 1.000000e-30 : f32
      %566 = vector.broadcast %cst_208 : f32 to vector<1x24xf32>
      %567 = arith.maximumf %565, %566 : vector<1x24xf32>
      %568 = math.log %567 : vector<1x24xf32>
      %cst_209 = arith.constant -0.833333313 : f32
      %569 = vector.broadcast %cst_209 : f32 to vector<1x24xf32>
      %570 = arith.mulf %569, %568 : vector<1x24xf32>
      %571 = math.exp %570 : vector<1x24xf32>
      %572 = arith.mulf %145, %571 : vector<1x24xf32>
      %573 = vector.broadcast %572 : vector<1x24xf32> to vector<24x24xf32>
      %574 = arith.mulf %133, %573 : vector<24x24xf32>
      %cst_210 = arith.constant dense<0.000000e+00> : vector<24xf32>
      %575 = vector.multi_reduction <add>, %574, %cst_210 [1] : vector<24x24xf32> to vector<24xf32>
      %576 = vector.shape_cast %575 : vector<24xf32> to vector<24x1xf32>
      %cst_211 = arith.constant 1.000000e-30 : f32
      %577 = vector.broadcast %cst_211 : f32 to vector<24x1xf32>
      %578 = arith.maximumf %576, %577 : vector<24x1xf32>
      %579 = math.log %578 : vector<24x1xf32>
      %cst_212 = arith.constant -0.833333313 : f32
      %580 = vector.broadcast %cst_212 : f32 to vector<24x1xf32>
      %581 = arith.mulf %580, %579 : vector<24x1xf32>
      %582 = math.exp %581 : vector<24x1xf32>
      %583 = arith.mulf %140, %582 : vector<24x1xf32>
      %584 = vector.broadcast %583 : vector<24x1xf32> to vector<24x24xf32>
      %585 = arith.mulf %133, %584 : vector<24x24xf32>
      %cst_213 = arith.constant dense<0.000000e+00> : vector<24xf32>
      %586 = vector.multi_reduction <add>, %585, %cst_213 [0] : vector<24x24xf32> to vector<24xf32>
      %587 = vector.shape_cast %586 : vector<24xf32> to vector<1x24xf32>
      %cst_214 = arith.constant 1.000000e-30 : f32
      %588 = vector.broadcast %cst_214 : f32 to vector<1x24xf32>
      %589 = arith.maximumf %587, %588 : vector<1x24xf32>
      %590 = math.log %589 : vector<1x24xf32>
      %cst_215 = arith.constant -0.833333313 : f32
      %591 = vector.broadcast %cst_215 : f32 to vector<1x24xf32>
      %592 = arith.mulf %591, %590 : vector<1x24xf32>
      %593 = math.exp %592 : vector<1x24xf32>
      %594 = arith.mulf %145, %593 : vector<1x24xf32>
      %595 = vector.broadcast %594 : vector<1x24xf32> to vector<24x24xf32>
      %596 = arith.mulf %133, %595 : vector<24x24xf32>
      %cst_216 = arith.constant dense<0.000000e+00> : vector<24xf32>
      %597 = vector.multi_reduction <add>, %596, %cst_216 [1] : vector<24x24xf32> to vector<24xf32>
      %598 = vector.shape_cast %597 : vector<24xf32> to vector<24x1xf32>
      %cst_217 = arith.constant 1.000000e-30 : f32
      %599 = vector.broadcast %cst_217 : f32 to vector<24x1xf32>
      %600 = arith.maximumf %598, %599 : vector<24x1xf32>
      %601 = math.log %600 : vector<24x1xf32>
      %cst_218 = arith.constant -0.833333313 : f32
      %602 = vector.broadcast %cst_218 : f32 to vector<24x1xf32>
      %603 = arith.mulf %602, %601 : vector<24x1xf32>
      %604 = math.exp %603 : vector<24x1xf32>
      %605 = arith.mulf %140, %604 : vector<24x1xf32>
      %606 = vector.broadcast %605 : vector<24x1xf32> to vector<24x24xf32>
      %607 = arith.mulf %133, %606 : vector<24x24xf32>
      %cst_219 = arith.constant dense<0.000000e+00> : vector<24xf32>
      %608 = vector.multi_reduction <add>, %607, %cst_219 [0] : vector<24x24xf32> to vector<24xf32>
      %609 = vector.shape_cast %608 : vector<24xf32> to vector<1x24xf32>
      %cst_220 = arith.constant 1.000000e-30 : f32
      %610 = vector.broadcast %cst_220 : f32 to vector<1x24xf32>
      %611 = arith.maximumf %609, %610 : vector<1x24xf32>
      %612 = math.log %611 : vector<1x24xf32>
      %cst_221 = arith.constant -0.833333313 : f32
      %613 = vector.broadcast %cst_221 : f32 to vector<1x24xf32>
      %614 = arith.mulf %613, %612 : vector<1x24xf32>
      %615 = math.exp %614 : vector<1x24xf32>
      %616 = arith.mulf %145, %615 : vector<1x24xf32>
      %617 = vector.broadcast %616 : vector<1x24xf32> to vector<24x24xf32>
      %618 = arith.mulf %133, %617 : vector<24x24xf32>
      %cst_222 = arith.constant dense<0.000000e+00> : vector<24xf32>
      %619 = vector.multi_reduction <add>, %618, %cst_222 [1] : vector<24x24xf32> to vector<24xf32>
      %620 = vector.shape_cast %619 : vector<24xf32> to vector<24x1xf32>
      %cst_223 = arith.constant 1.000000e-30 : f32
      %621 = vector.broadcast %cst_223 : f32 to vector<24x1xf32>
      %622 = arith.maximumf %620, %621 : vector<24x1xf32>
      %623 = math.log %622 : vector<24x1xf32>
      %cst_224 = arith.constant -0.833333313 : f32
      %624 = vector.broadcast %cst_224 : f32 to vector<24x1xf32>
      %625 = arith.mulf %624, %623 : vector<24x1xf32>
      %626 = math.exp %625 : vector<24x1xf32>
      %627 = arith.mulf %140, %626 : vector<24x1xf32>
      %628 = vector.broadcast %627 : vector<24x1xf32> to vector<24x24xf32>
      %629 = arith.mulf %133, %628 : vector<24x24xf32>
      %cst_225 = arith.constant dense<0.000000e+00> : vector<24xf32>
      %630 = vector.multi_reduction <add>, %629, %cst_225 [0] : vector<24x24xf32> to vector<24xf32>
      %631 = vector.shape_cast %630 : vector<24xf32> to vector<1x24xf32>
      %cst_226 = arith.constant 1.000000e-30 : f32
      %632 = vector.broadcast %cst_226 : f32 to vector<1x24xf32>
      %633 = arith.maximumf %631, %632 : vector<1x24xf32>
      %634 = math.log %633 : vector<1x24xf32>
      %cst_227 = arith.constant -0.833333313 : f32
      %635 = vector.broadcast %cst_227 : f32 to vector<1x24xf32>
      %636 = arith.mulf %635, %634 : vector<1x24xf32>
      %637 = math.exp %636 : vector<1x24xf32>
      %638 = arith.mulf %145, %637 : vector<1x24xf32>
      %639 = vector.broadcast %638 : vector<1x24xf32> to vector<24x24xf32>
      %640 = arith.mulf %133, %639 : vector<24x24xf32>
      %cst_228 = arith.constant dense<0.000000e+00> : vector<24xf32>
      %641 = vector.multi_reduction <add>, %640, %cst_228 [1] : vector<24x24xf32> to vector<24xf32>
      %642 = vector.shape_cast %641 : vector<24xf32> to vector<24x1xf32>
      %cst_229 = arith.constant 1.000000e-30 : f32
      %643 = vector.broadcast %cst_229 : f32 to vector<24x1xf32>
      %644 = arith.maximumf %642, %643 : vector<24x1xf32>
      %645 = math.log %644 : vector<24x1xf32>
      %cst_230 = arith.constant -0.833333313 : f32
      %646 = vector.broadcast %cst_230 : f32 to vector<24x1xf32>
      %647 = arith.mulf %646, %645 : vector<24x1xf32>
      %648 = math.exp %647 : vector<24x1xf32>
      %649 = arith.mulf %140, %648 : vector<24x1xf32>
      %650 = vector.broadcast %649 : vector<24x1xf32> to vector<24x24xf32>
      %651 = arith.mulf %133, %650 : vector<24x24xf32>
      %cst_231 = arith.constant dense<0.000000e+00> : vector<24xf32>
      %652 = vector.multi_reduction <add>, %651, %cst_231 [0] : vector<24x24xf32> to vector<24xf32>
      %653 = vector.shape_cast %652 : vector<24xf32> to vector<1x24xf32>
      %cst_232 = arith.constant 1.000000e-30 : f32
      %654 = vector.broadcast %cst_232 : f32 to vector<1x24xf32>
      %655 = arith.maximumf %653, %654 : vector<1x24xf32>
      %656 = math.log %655 : vector<1x24xf32>
      %cst_233 = arith.constant -0.833333313 : f32
      %657 = vector.broadcast %cst_233 : f32 to vector<1x24xf32>
      %658 = arith.mulf %657, %656 : vector<1x24xf32>
      %659 = math.exp %658 : vector<1x24xf32>
      %660 = arith.mulf %145, %659 : vector<1x24xf32>
      %661 = vector.broadcast %660 : vector<1x24xf32> to vector<24x24xf32>
      %662 = arith.mulf %133, %661 : vector<24x24xf32>
      %cst_234 = arith.constant dense<0.000000e+00> : vector<24xf32>
      %663 = vector.multi_reduction <add>, %662, %cst_234 [1] : vector<24x24xf32> to vector<24xf32>
      %664 = vector.shape_cast %663 : vector<24xf32> to vector<24x1xf32>
      %cst_235 = arith.constant 1.000000e-30 : f32
      %665 = vector.broadcast %cst_235 : f32 to vector<24x1xf32>
      %666 = arith.maximumf %664, %665 : vector<24x1xf32>
      %667 = math.log %666 : vector<24x1xf32>
      %cst_236 = arith.constant -0.833333313 : f32
      %668 = vector.broadcast %cst_236 : f32 to vector<24x1xf32>
      %669 = arith.mulf %668, %667 : vector<24x1xf32>
      %670 = math.exp %669 : vector<24x1xf32>
      %671 = arith.mulf %140, %670 : vector<24x1xf32>
      %672 = vector.broadcast %671 : vector<24x1xf32> to vector<24x24xf32>
      %673 = arith.mulf %133, %672 : vector<24x24xf32>
      %cst_237 = arith.constant dense<0.000000e+00> : vector<24xf32>
      %674 = vector.multi_reduction <add>, %673, %cst_237 [0] : vector<24x24xf32> to vector<24xf32>
      %675 = vector.shape_cast %674 : vector<24xf32> to vector<1x24xf32>
      %cst_238 = arith.constant 1.000000e-30 : f32
      %676 = vector.broadcast %cst_238 : f32 to vector<1x24xf32>
      %677 = arith.maximumf %675, %676 : vector<1x24xf32>
      %678 = math.log %677 : vector<1x24xf32>
      %cst_239 = arith.constant -0.833333313 : f32
      %679 = vector.broadcast %cst_239 : f32 to vector<1x24xf32>
      %680 = arith.mulf %679, %678 : vector<1x24xf32>
      %681 = math.exp %680 : vector<1x24xf32>
      %682 = arith.mulf %145, %681 : vector<1x24xf32>
      %683 = vector.broadcast %682 : vector<1x24xf32> to vector<24x24xf32>
      %684 = arith.mulf %133, %683 : vector<24x24xf32>
      %cst_240 = arith.constant dense<0.000000e+00> : vector<24xf32>
      %685 = vector.multi_reduction <add>, %684, %cst_240 [1] : vector<24x24xf32> to vector<24xf32>
      %686 = vector.shape_cast %685 : vector<24xf32> to vector<24x1xf32>
      %cst_241 = arith.constant 1.000000e-30 : f32
      %687 = vector.broadcast %cst_241 : f32 to vector<24x1xf32>
      %688 = arith.maximumf %686, %687 : vector<24x1xf32>
      %689 = math.log %688 : vector<24x1xf32>
      %cst_242 = arith.constant -0.833333313 : f32
      %690 = vector.broadcast %cst_242 : f32 to vector<24x1xf32>
      %691 = arith.mulf %690, %689 : vector<24x1xf32>
      %692 = math.exp %691 : vector<24x1xf32>
      %693 = arith.mulf %140, %692 : vector<24x1xf32>
      %694 = vector.broadcast %693 : vector<24x1xf32> to vector<24x24xf32>
      %695 = arith.mulf %133, %694 : vector<24x24xf32>
      %cst_243 = arith.constant dense<0.000000e+00> : vector<24xf32>
      %696 = vector.multi_reduction <add>, %695, %cst_243 [0] : vector<24x24xf32> to vector<24xf32>
      %697 = vector.shape_cast %696 : vector<24xf32> to vector<1x24xf32>
      %cst_244 = arith.constant 1.000000e-30 : f32
      %698 = vector.broadcast %cst_244 : f32 to vector<1x24xf32>
      %699 = arith.maximumf %697, %698 : vector<1x24xf32>
      %700 = math.log %699 : vector<1x24xf32>
      %cst_245 = arith.constant -0.833333313 : f32
      %701 = vector.broadcast %cst_245 : f32 to vector<1x24xf32>
      %702 = arith.mulf %701, %700 : vector<1x24xf32>
      %703 = math.exp %702 : vector<1x24xf32>
      %704 = arith.mulf %145, %703 : vector<1x24xf32>
      %705 = vector.broadcast %704 : vector<1x24xf32> to vector<24x24xf32>
      %706 = arith.mulf %133, %705 : vector<24x24xf32>
      %cst_246 = arith.constant dense<0.000000e+00> : vector<24xf32>
      %707 = vector.multi_reduction <add>, %706, %cst_246 [1] : vector<24x24xf32> to vector<24xf32>
      %708 = vector.shape_cast %707 : vector<24xf32> to vector<24x1xf32>
      %cst_247 = arith.constant 1.000000e-30 : f32
      %709 = vector.broadcast %cst_247 : f32 to vector<24x1xf32>
      %710 = arith.maximumf %708, %709 : vector<24x1xf32>
      %711 = math.log %710 : vector<24x1xf32>
      %cst_248 = arith.constant -0.833333313 : f32
      %712 = vector.broadcast %cst_248 : f32 to vector<24x1xf32>
      %713 = arith.mulf %712, %711 : vector<24x1xf32>
      %714 = math.exp %713 : vector<24x1xf32>
      %715 = arith.mulf %140, %714 : vector<24x1xf32>
      %716 = vector.broadcast %715 : vector<24x1xf32> to vector<24x24xf32>
      %717 = arith.mulf %133, %716 : vector<24x24xf32>
      %cst_249 = arith.constant dense<0.000000e+00> : vector<24xf32>
      %718 = vector.multi_reduction <add>, %717, %cst_249 [0] : vector<24x24xf32> to vector<24xf32>
      %719 = vector.shape_cast %718 : vector<24xf32> to vector<1x24xf32>
      %cst_250 = arith.constant 1.000000e-30 : f32
      %720 = vector.broadcast %cst_250 : f32 to vector<1x24xf32>
      %721 = arith.maximumf %719, %720 : vector<1x24xf32>
      %722 = math.log %721 : vector<1x24xf32>
      %cst_251 = arith.constant -0.833333313 : f32
      %723 = vector.broadcast %cst_251 : f32 to vector<1x24xf32>
      %724 = arith.mulf %723, %722 : vector<1x24xf32>
      %725 = math.exp %724 : vector<1x24xf32>
      %726 = arith.mulf %145, %725 : vector<1x24xf32>
      %727 = vector.broadcast %726 : vector<1x24xf32> to vector<24x24xf32>
      %728 = arith.mulf %133, %727 : vector<24x24xf32>
      %cst_252 = arith.constant dense<0.000000e+00> : vector<24xf32>
      %729 = vector.multi_reduction <add>, %728, %cst_252 [1] : vector<24x24xf32> to vector<24xf32>
      %730 = vector.shape_cast %729 : vector<24xf32> to vector<24x1xf32>
      %cst_253 = arith.constant 1.000000e-30 : f32
      %731 = vector.broadcast %cst_253 : f32 to vector<24x1xf32>
      %732 = arith.maximumf %730, %731 : vector<24x1xf32>
      %733 = math.log %732 : vector<24x1xf32>
      %cst_254 = arith.constant -0.833333313 : f32
      %734 = vector.broadcast %cst_254 : f32 to vector<24x1xf32>
      %735 = arith.mulf %734, %733 : vector<24x1xf32>
      %736 = math.exp %735 : vector<24x1xf32>
      %737 = arith.mulf %140, %736 : vector<24x1xf32>
      %738 = vector.broadcast %737 : vector<24x1xf32> to vector<24x24xf32>
      %739 = arith.mulf %133, %738 : vector<24x24xf32>
      %cst_255 = arith.constant dense<0.000000e+00> : vector<24xf32>
      %740 = vector.multi_reduction <add>, %739, %cst_255 [0] : vector<24x24xf32> to vector<24xf32>
      %741 = vector.shape_cast %740 : vector<24xf32> to vector<1x24xf32>
      %cst_256 = arith.constant 1.000000e-30 : f32
      %742 = vector.broadcast %cst_256 : f32 to vector<1x24xf32>
      %743 = arith.maximumf %741, %742 : vector<1x24xf32>
      %744 = math.log %743 : vector<1x24xf32>
      %cst_257 = arith.constant -0.833333313 : f32
      %745 = vector.broadcast %cst_257 : f32 to vector<1x24xf32>
      %746 = arith.mulf %745, %744 : vector<1x24xf32>
      %747 = math.exp %746 : vector<1x24xf32>
      %748 = arith.mulf %145, %747 : vector<1x24xf32>
      %749 = vector.broadcast %748 : vector<1x24xf32> to vector<24x24xf32>
      %750 = arith.mulf %133, %749 : vector<24x24xf32>
      %cst_258 = arith.constant dense<0.000000e+00> : vector<24xf32>
      %751 = vector.multi_reduction <add>, %750, %cst_258 [1] : vector<24x24xf32> to vector<24xf32>
      %752 = vector.shape_cast %751 : vector<24xf32> to vector<24x1xf32>
      %cst_259 = arith.constant 1.000000e-30 : f32
      %753 = vector.broadcast %cst_259 : f32 to vector<24x1xf32>
      %754 = arith.maximumf %752, %753 : vector<24x1xf32>
      %755 = math.log %754 : vector<24x1xf32>
      %cst_260 = arith.constant -0.833333313 : f32
      %756 = vector.broadcast %cst_260 : f32 to vector<24x1xf32>
      %757 = arith.mulf %756, %755 : vector<24x1xf32>
      %758 = math.exp %757 : vector<24x1xf32>
      %759 = arith.mulf %140, %758 : vector<24x1xf32>
      %760 = vector.broadcast %759 : vector<24x1xf32> to vector<24x24xf32>
      %761 = arith.mulf %133, %760 : vector<24x24xf32>
      %cst_261 = arith.constant dense<0.000000e+00> : vector<24xf32>
      %762 = vector.multi_reduction <add>, %761, %cst_261 [0] : vector<24x24xf32> to vector<24xf32>
      %763 = vector.shape_cast %762 : vector<24xf32> to vector<1x24xf32>
      %cst_262 = arith.constant 1.000000e-30 : f32
      %764 = vector.broadcast %cst_262 : f32 to vector<1x24xf32>
      %765 = arith.maximumf %763, %764 : vector<1x24xf32>
      %766 = math.log %765 : vector<1x24xf32>
      %cst_263 = arith.constant -0.833333313 : f32
      %767 = vector.broadcast %cst_263 : f32 to vector<1x24xf32>
      %768 = arith.mulf %767, %766 : vector<1x24xf32>
      %769 = math.exp %768 : vector<1x24xf32>
      %770 = arith.mulf %145, %769 : vector<1x24xf32>
      %771 = vector.broadcast %770 : vector<1x24xf32> to vector<24x24xf32>
      %772 = arith.mulf %133, %771 : vector<24x24xf32>
      %cst_264 = arith.constant dense<0.000000e+00> : vector<24xf32>
      %773 = vector.multi_reduction <add>, %772, %cst_264 [1] : vector<24x24xf32> to vector<24xf32>
      %774 = vector.shape_cast %773 : vector<24xf32> to vector<24x1xf32>
      %cst_265 = arith.constant 1.000000e-30 : f32
      %775 = vector.broadcast %cst_265 : f32 to vector<24x1xf32>
      %776 = arith.maximumf %774, %775 : vector<24x1xf32>
      %777 = math.log %776 : vector<24x1xf32>
      %cst_266 = arith.constant -0.833333313 : f32
      %778 = vector.broadcast %cst_266 : f32 to vector<24x1xf32>
      %779 = arith.mulf %778, %777 : vector<24x1xf32>
      %780 = math.exp %779 : vector<24x1xf32>
      %781 = arith.mulf %140, %780 : vector<24x1xf32>
      %782 = vector.broadcast %781 : vector<24x1xf32> to vector<24x24xf32>
      %783 = arith.mulf %133, %782 : vector<24x24xf32>
      %cst_267 = arith.constant dense<0.000000e+00> : vector<24xf32>
      %784 = vector.multi_reduction <add>, %783, %cst_267 [0] : vector<24x24xf32> to vector<24xf32>
      %785 = vector.shape_cast %784 : vector<24xf32> to vector<1x24xf32>
      %cst_268 = arith.constant 1.000000e-30 : f32
      %786 = vector.broadcast %cst_268 : f32 to vector<1x24xf32>
      %787 = arith.maximumf %785, %786 : vector<1x24xf32>
      %788 = math.log %787 : vector<1x24xf32>
      %cst_269 = arith.constant -0.833333313 : f32
      %789 = vector.broadcast %cst_269 : f32 to vector<1x24xf32>
      %790 = arith.mulf %789, %788 : vector<1x24xf32>
      %791 = math.exp %790 : vector<1x24xf32>
      %792 = arith.mulf %145, %791 : vector<1x24xf32>
      %793 = vector.broadcast %792 : vector<1x24xf32> to vector<24x24xf32>
      %794 = arith.mulf %133, %793 : vector<24x24xf32>
      %cst_270 = arith.constant dense<0.000000e+00> : vector<24xf32>
      %795 = vector.multi_reduction <add>, %794, %cst_270 [1] : vector<24x24xf32> to vector<24xf32>
      %796 = vector.shape_cast %795 : vector<24xf32> to vector<24x1xf32>
      %cst_271 = arith.constant 1.000000e-30 : f32
      %797 = vector.broadcast %cst_271 : f32 to vector<24x1xf32>
      %798 = arith.maximumf %796, %797 : vector<24x1xf32>
      %799 = math.log %798 : vector<24x1xf32>
      %cst_272 = arith.constant -0.833333313 : f32
      %800 = vector.broadcast %cst_272 : f32 to vector<24x1xf32>
      %801 = arith.mulf %800, %799 : vector<24x1xf32>
      %802 = math.exp %801 : vector<24x1xf32>
      %803 = arith.mulf %140, %802 : vector<24x1xf32>
      %804 = vector.broadcast %803 : vector<24x1xf32> to vector<24x24xf32>
      %805 = arith.mulf %133, %804 : vector<24x24xf32>
      %cst_273 = arith.constant dense<0.000000e+00> : vector<24xf32>
      %806 = vector.multi_reduction <add>, %805, %cst_273 [0] : vector<24x24xf32> to vector<24xf32>
      %807 = vector.shape_cast %806 : vector<24xf32> to vector<1x24xf32>
      %cst_274 = arith.constant 1.000000e-30 : f32
      %808 = vector.broadcast %cst_274 : f32 to vector<1x24xf32>
      %809 = arith.maximumf %807, %808 : vector<1x24xf32>
      %810 = math.log %809 : vector<1x24xf32>
      %cst_275 = arith.constant -0.833333313 : f32
      %811 = vector.broadcast %cst_275 : f32 to vector<1x24xf32>
      %812 = arith.mulf %811, %810 : vector<1x24xf32>
      %813 = math.exp %812 : vector<1x24xf32>
      %814 = arith.mulf %145, %813 : vector<1x24xf32>
      %815 = vector.broadcast %814 : vector<1x24xf32> to vector<24x24xf32>
      %816 = arith.mulf %133, %815 : vector<24x24xf32>
      %cst_276 = arith.constant dense<0.000000e+00> : vector<24xf32>
      %817 = vector.multi_reduction <add>, %816, %cst_276 [1] : vector<24x24xf32> to vector<24xf32>
      %818 = vector.shape_cast %817 : vector<24xf32> to vector<24x1xf32>
      %cst_277 = arith.constant 1.000000e-30 : f32
      %819 = vector.broadcast %cst_277 : f32 to vector<24x1xf32>
      %820 = arith.maximumf %818, %819 : vector<24x1xf32>
      %821 = math.log %820 : vector<24x1xf32>
      %cst_278 = arith.constant -0.833333313 : f32
      %822 = vector.broadcast %cst_278 : f32 to vector<24x1xf32>
      %823 = arith.mulf %822, %821 : vector<24x1xf32>
      %824 = math.exp %823 : vector<24x1xf32>
      %825 = arith.mulf %140, %824 : vector<24x1xf32>
      %826 = vector.broadcast %825 : vector<24x1xf32> to vector<24x24xf32>
      %827 = arith.mulf %133, %826 : vector<24x24xf32>
      %cst_279 = arith.constant dense<0.000000e+00> : vector<24xf32>
      %828 = vector.multi_reduction <add>, %827, %cst_279 [0] : vector<24x24xf32> to vector<24xf32>
      %829 = vector.shape_cast %828 : vector<24xf32> to vector<1x24xf32>
      %cst_280 = arith.constant 1.000000e-30 : f32
      %830 = vector.broadcast %cst_280 : f32 to vector<1x24xf32>
      %831 = arith.maximumf %829, %830 : vector<1x24xf32>
      %832 = math.log %831 : vector<1x24xf32>
      %cst_281 = arith.constant -0.833333313 : f32
      %833 = vector.broadcast %cst_281 : f32 to vector<1x24xf32>
      %834 = arith.mulf %833, %832 : vector<1x24xf32>
      %835 = math.exp %834 : vector<1x24xf32>
      %836 = arith.mulf %145, %835 : vector<1x24xf32>
      %837 = vector.broadcast %836 : vector<1x24xf32> to vector<24x24xf32>
      %838 = arith.mulf %133, %837 : vector<24x24xf32>
      %cst_282 = arith.constant dense<0.000000e+00> : vector<24xf32>
      %839 = vector.multi_reduction <add>, %838, %cst_282 [1] : vector<24x24xf32> to vector<24xf32>
      %840 = vector.shape_cast %839 : vector<24xf32> to vector<24x1xf32>
      %cst_283 = arith.constant 1.000000e-30 : f32
      %841 = vector.broadcast %cst_283 : f32 to vector<24x1xf32>
      %842 = arith.maximumf %840, %841 : vector<24x1xf32>
      %843 = math.log %842 : vector<24x1xf32>
      %cst_284 = arith.constant -0.833333313 : f32
      %844 = vector.broadcast %cst_284 : f32 to vector<24x1xf32>
      %845 = arith.mulf %844, %843 : vector<24x1xf32>
      %846 = math.exp %845 : vector<24x1xf32>
      %847 = arith.mulf %140, %846 : vector<24x1xf32>
      %848 = vector.broadcast %847 : vector<24x1xf32> to vector<24x24xf32>
      %849 = arith.mulf %133, %848 : vector<24x24xf32>
      %cst_285 = arith.constant dense<0.000000e+00> : vector<24xf32>
      %850 = vector.multi_reduction <add>, %849, %cst_285 [0] : vector<24x24xf32> to vector<24xf32>
      %851 = vector.shape_cast %850 : vector<24xf32> to vector<1x24xf32>
      %cst_286 = arith.constant 1.000000e-30 : f32
      %852 = vector.broadcast %cst_286 : f32 to vector<1x24xf32>
      %853 = arith.maximumf %851, %852 : vector<1x24xf32>
      %854 = math.log %853 : vector<1x24xf32>
      %cst_287 = arith.constant -0.833333313 : f32
      %855 = vector.broadcast %cst_287 : f32 to vector<1x24xf32>
      %856 = arith.mulf %855, %854 : vector<1x24xf32>
      %857 = math.exp %856 : vector<1x24xf32>
      %858 = arith.mulf %145, %857 : vector<1x24xf32>
      %859 = vector.broadcast %858 : vector<1x24xf32> to vector<24x24xf32>
      %860 = arith.mulf %133, %859 : vector<24x24xf32>
      %cst_288 = arith.constant dense<0.000000e+00> : vector<24xf32>
      %861 = vector.multi_reduction <add>, %860, %cst_288 [1] : vector<24x24xf32> to vector<24xf32>
      %862 = vector.shape_cast %861 : vector<24xf32> to vector<24x1xf32>
      %cst_289 = arith.constant 1.000000e-30 : f32
      %863 = vector.broadcast %cst_289 : f32 to vector<24x1xf32>
      %864 = arith.maximumf %862, %863 : vector<24x1xf32>
      %865 = math.log %864 : vector<24x1xf32>
      %cst_290 = arith.constant -0.833333313 : f32
      %866 = vector.broadcast %cst_290 : f32 to vector<24x1xf32>
      %867 = arith.mulf %866, %865 : vector<24x1xf32>
      %868 = math.exp %867 : vector<24x1xf32>
      %869 = arith.mulf %140, %868 : vector<24x1xf32>
      %870 = vector.broadcast %869 : vector<24x1xf32> to vector<24x24xf32>
      %871 = arith.mulf %133, %870 : vector<24x24xf32>
      %cst_291 = arith.constant dense<0.000000e+00> : vector<24xf32>
      %872 = vector.multi_reduction <add>, %871, %cst_291 [0] : vector<24x24xf32> to vector<24xf32>
      %873 = vector.shape_cast %872 : vector<24xf32> to vector<1x24xf32>
      %cst_292 = arith.constant 1.000000e-30 : f32
      %874 = vector.broadcast %cst_292 : f32 to vector<1x24xf32>
      %875 = arith.maximumf %873, %874 : vector<1x24xf32>
      %876 = math.log %875 : vector<1x24xf32>
      %cst_293 = arith.constant -0.833333313 : f32
      %877 = vector.broadcast %cst_293 : f32 to vector<1x24xf32>
      %878 = arith.mulf %877, %876 : vector<1x24xf32>
      %879 = math.exp %878 : vector<1x24xf32>
      %880 = arith.mulf %145, %879 : vector<1x24xf32>
      %881 = vector.broadcast %880 : vector<1x24xf32> to vector<24x24xf32>
      %882 = arith.mulf %133, %881 : vector<24x24xf32>
      %cst_294 = arith.constant dense<0.000000e+00> : vector<24xf32>
      %883 = vector.multi_reduction <add>, %882, %cst_294 [1] : vector<24x24xf32> to vector<24xf32>
      %884 = vector.shape_cast %883 : vector<24xf32> to vector<24x1xf32>
      %cst_295 = arith.constant 1.000000e-30 : f32
      %885 = vector.broadcast %cst_295 : f32 to vector<24x1xf32>
      %886 = arith.maximumf %884, %885 : vector<24x1xf32>
      %887 = math.log %886 : vector<24x1xf32>
      %cst_296 = arith.constant -0.833333313 : f32
      %888 = vector.broadcast %cst_296 : f32 to vector<24x1xf32>
      %889 = arith.mulf %888, %887 : vector<24x1xf32>
      %890 = math.exp %889 : vector<24x1xf32>
      %891 = arith.mulf %140, %890 : vector<24x1xf32>
      %892 = vector.broadcast %891 : vector<24x1xf32> to vector<24x24xf32>
      %893 = arith.mulf %133, %892 : vector<24x24xf32>
      %cst_297 = arith.constant dense<0.000000e+00> : vector<24xf32>
      %894 = vector.multi_reduction <add>, %893, %cst_297 [0] : vector<24x24xf32> to vector<24xf32>
      %895 = vector.shape_cast %894 : vector<24xf32> to vector<1x24xf32>
      %cst_298 = arith.constant 1.000000e-30 : f32
      %896 = vector.broadcast %cst_298 : f32 to vector<1x24xf32>
      %897 = arith.maximumf %895, %896 : vector<1x24xf32>
      %898 = math.log %897 : vector<1x24xf32>
      %cst_299 = arith.constant -0.833333313 : f32
      %899 = vector.broadcast %cst_299 : f32 to vector<1x24xf32>
      %900 = arith.mulf %899, %898 : vector<1x24xf32>
      %901 = math.exp %900 : vector<1x24xf32>
      %902 = arith.mulf %145, %901 : vector<1x24xf32>
      %903 = math.absf %891 : vector<24x1xf32>
      %904 = vector.shape_cast %903 : vector<24x1xf32> to vector<1x24x1xf32>
      %cst_300 = arith.constant dense<0xFF800000> : vector<1xf32>
      %905 = vector.multi_reduction <maximumf>, %904, %cst_300 [1, 2] : vector<1x24x1xf32> to vector<1xf32>
      %906 = vector.shape_cast %905 : vector<1xf32> to vector<1x1x1xf32>
      %907 = vector.extract %906[0, 0, 0] : f32 from vector<1x1x1xf32>
      %908 = math.absf %arg22 : vector<24x1xf32>
      %909 = vector.shape_cast %908 : vector<24x1xf32> to vector<1x24x1xf32>
      %cst_301 = arith.constant dense<0xFF800000> : vector<1xf32>
      %910 = vector.multi_reduction <maximumf>, %909, %cst_301 [1, 2] : vector<1x24x1xf32> to vector<1xf32>
      %911 = vector.shape_cast %910 : vector<1xf32> to vector<1x1x1xf32>
      %912 = vector.extract %911[0, 0, 0] : f32 from vector<1x1x1xf32>
      %913 = arith.maximumf %907, %912 : f32
      %cst_302 = arith.constant 1.000000e+00 : f32
      %914 = arith.maximumf %913, %cst_302 : f32
      %915 = arith.subf %891, %arg22 : vector<24x1xf32>
      %916 = math.absf %915 : vector<24x1xf32>
      %917 = vector.shape_cast %916 : vector<24x1xf32> to vector<1x24x1xf32>
      %cst_303 = arith.constant dense<0xFF800000> : vector<1xf32>
      %918 = vector.multi_reduction <maximumf>, %917, %cst_303 [1, 2] : vector<1x24x1xf32> to vector<1xf32>
      %919 = vector.shape_cast %918 : vector<1xf32> to vector<1x1x1xf32>
      %920 = vector.extract %919[0, 0, 0] : f32 from vector<1x1x1xf32>
      %921 = arith.divf %920, %914 : f32
      %922 = math.absf %902 : vector<1x24xf32>
      %923 = vector.shape_cast %922 : vector<1x24xf32> to vector<1x1x24xf32>
      %cst_304 = arith.constant dense<0xFF800000> : vector<1xf32>
      %924 = vector.multi_reduction <maximumf>, %923, %cst_304 [1, 2] : vector<1x1x24xf32> to vector<1xf32>
      %925 = vector.shape_cast %924 : vector<1xf32> to vector<1x1x1xf32>
      %926 = vector.extract %925[0, 0, 0] : f32 from vector<1x1x1xf32>
      %927 = math.absf %arg23 : vector<1x24xf32>
      %928 = vector.shape_cast %927 : vector<1x24xf32> to vector<1x1x24xf32>
      %cst_305 = arith.constant dense<0xFF800000> : vector<1xf32>
      %929 = vector.multi_reduction <maximumf>, %928, %cst_305 [1, 2] : vector<1x1x24xf32> to vector<1xf32>
      %930 = vector.shape_cast %929 : vector<1xf32> to vector<1x1x1xf32>
      %931 = vector.extract %930[0, 0, 0] : f32 from vector<1x1x1xf32>
      %932 = arith.maximumf %926, %931 : f32
      %cst_306 = arith.constant 1.000000e+00 : f32
      %933 = arith.maximumf %932, %cst_306 : f32
      %934 = arith.subf %902, %arg23 : vector<1x24xf32>
      %935 = math.absf %934 : vector<1x24xf32>
      %936 = vector.shape_cast %935 : vector<1x24xf32> to vector<1x1x24xf32>
      %cst_307 = arith.constant dense<0xFF800000> : vector<1xf32>
      %937 = vector.multi_reduction <maximumf>, %936, %cst_307 [1, 2] : vector<1x1x24xf32> to vector<1xf32>
      %938 = vector.shape_cast %937 : vector<1xf32> to vector<1x1x1xf32>
      %939 = vector.extract %938[0, 0, 0] : f32 from vector<1x1x1xf32>
      %940 = arith.divf %939, %933 : f32
      %941 = arith.maximumf %921, %940 : f32
      %c20_i32 = arith.constant 20 : i32
      %942 = arith.addi %arg20, %c20_i32 : i32
      scf.yield %942, %941, %891, %902 : i32, f32, vector<24x1xf32>, vector<1x24xf32>
    }
    %157 = vector.extract_strided_slice %156#2 {offsets = [0, 0], sizes = [8, 1], strides = [1, 1]} : vector<24x1xf32> to vector<8x1xf32>
    %158 = vector.extract_strided_slice %156#2 {offsets = [16, 0], sizes = [4, 1], strides = [1, 1]} : vector<24x1xf32> to vector<4x1xf32>
    %159 = vector.extract_strided_slice %156#3 {offsets = [0, 0], sizes = [1, 4], strides = [1, 1]} : vector<1x24xf32> to vector<1x4xf32>
    %160 = vector.extract_strided_slice %156#3 {offsets = [0, 8], sizes = [1, 8], strides = [1, 1]} : vector<1x24xf32> to vector<1x8xf32>
    %161 = vector.broadcast %157 : vector<8x1xf32> to vector<8x4xf32>
    %162 = arith.mulf %161, %77 : vector<8x4xf32>
    %163 = vector.broadcast %159 : vector<1x4xf32> to vector<8x4xf32>
    %164 = arith.mulf %162, %163 : vector<8x4xf32>
    %cst_64 = arith.constant dense<0.000000e+00> : vector<4x32xf32>
    %165 = tpu.matmul %164, %35, %cst_64 {dimension_numbers = #tpu.dot_dimension_numbers<[0], [0], [1], [1], [0, 1, 1, 1], [], []>} : vector<8x4xf32>, vector<8x32xf32>, vector<4x32xf32> -> vector<4x32xf32>
    %166 = tpu.transpose %160, [1, 0] : vector<1x8xf32> -> vector<8x1xf32>
    %167 = vector.broadcast %166 : vector<8x1xf32> to vector<8x4xf32>
    %168 = arith.mulf %167, %77 : vector<8x4xf32>
    %169 = tpu.transpose %158, [1, 0] : vector<4x1xf32> -> vector<1x4xf32>
    %170 = vector.broadcast %169 : vector<1x4xf32> to vector<8x4xf32>
    %171 = arith.mulf %168, %170 : vector<8x4xf32>
    %cst_65 = arith.constant dense<0.000000e+00> : vector<8x32xf32>
    %172 = tpu.matmul %171, %40, %cst_65 {dimension_numbers = #tpu.dot_dimension_numbers<[1], [0], [0], [1], [0, 0, 1, 1], [], []>} : vector<8x4xf32>, vector<4x32xf32>, vector<8x32xf32> -> vector<8x32xf32>
    %173 = tpu.concatenate %165, %172 in 0 : vector<4x32xf32>, vector<8x32xf32> -> vector<12x32xf32>
    %c0_66 = arith.constant 0 : index
    %c0_67 = arith.constant 0 : index
    %174 = vector.load %arg9[%c0_66, %c0_67] : memref<1x32xf32, #tpu.memory_space<vmem>>, vector<1x32xf32>
    %c0_68 = arith.constant 0 : index
    %c0_69 = arith.constant 0 : index
    %175 = vector.load %arg10[%c0_68, %c0_69] : memref<1x32xf32, #tpu.memory_space<vmem>>, vector<1x32xf32>
    %cst_70 = arith.constant dense<0.000000e+00> : vector<12xf32>
    %176 = vector.multi_reduction <add>, %173, %cst_70 [1] : vector<12x32xf32> to vector<12xf32>
    %177 = vector.shape_cast %176 : vector<12xf32> to vector<12x1xf32>
    %cst_71 = arith.constant 3.200000e+01 : f32
    %178 = vector.broadcast %cst_71 : f32 to vector<12x1xf32>
    %179 = arith.divf %177, %178 : vector<12x1xf32>
    %180 = vector.broadcast %179 : vector<12x1xf32> to vector<12x32xf32>
    %181 = arith.subf %173, %180 : vector<12x32xf32>
    %182 = arith.mulf %181, %181 : vector<12x32xf32>
    %cst_72 = arith.constant dense<0.000000e+00> : vector<12xf32>
    %183 = vector.multi_reduction <add>, %182, %cst_72 [1] : vector<12x32xf32> to vector<12xf32>
    %184 = vector.shape_cast %183 : vector<12xf32> to vector<12x1xf32>
    %cst_73 = arith.constant 3.200000e+01 : f32
    %185 = vector.broadcast %cst_73 : f32 to vector<12x1xf32>
    %186 = arith.divf %184, %185 : vector<12x1xf32>
    %187 = vector.broadcast %179 : vector<12x1xf32> to vector<12x32xf32>
    %188 = arith.subf %173, %187 : vector<12x32xf32>
    %cst_74 = arith.constant 9.99999974E-6 : f32
    %189 = vector.broadcast %cst_74 : f32 to vector<12x1xf32>
    %190 = arith.addf %186, %189 : vector<12x1xf32>
    %191 = math.rsqrt %190 : vector<12x1xf32>
    %192 = vector.broadcast %191 : vector<12x1xf32> to vector<12x32xf32>
    %193 = arith.mulf %188, %192 : vector<12x32xf32>
    %194 = vector.broadcast %174 : vector<1x32xf32> to vector<12x32xf32>
    %195 = arith.mulf %193, %194 : vector<12x32xf32>
    %196 = vector.broadcast %175 : vector<1x32xf32> to vector<12x32xf32>
    %197 = arith.addf %195, %196 : vector<12x32xf32>
    %c0_75 = arith.constant 0 : index
    %c0_76 = arith.constant 0 : index
    %198 = vector.load %arg11[%c0_75, %c0_76] : memref<32x48xf32, #tpu.memory_space<vmem>>, vector<32x48xf32>
    %cst_77 = arith.constant dense<0.000000e+00> : vector<12x48xf32>
    %199 = tpu.matmul %197, %198, %cst_77 {dimension_numbers = #tpu.dot_dimension_numbers<[1], [0], [0], [1], [0, 0, 1, 1], [], []>} : vector<12x32xf32>, vector<32x48xf32>, vector<12x48xf32> -> vector<12x48xf32>
    %200 = vector.extract_strided_slice %199 {offsets = [0, 0], sizes = [12, 16], strides = [1, 1]} : vector<12x48xf32> to vector<12x16xf32>
    %201 = vector.extract_strided_slice %199 {offsets = [0, 16], sizes = [12, 16], strides = [1, 1]} : vector<12x48xf32> to vector<12x16xf32>
    %202 = vector.extract_strided_slice %199 {offsets = [0, 32], sizes = [12, 16], strides = [1, 1]} : vector<12x48xf32> to vector<12x16xf32>
    %203 = tpu.transpose %201, [1, 0] : vector<12x16xf32> -> vector<16x12xf32>
    %cst_78 = arith.constant dense<0.000000e+00> : vector<12x12xf32>
    %204 = tpu.matmul %200, %203, %cst_78 {dimension_numbers = #tpu.dot_dimension_numbers<[1], [0], [0], [1], [0, 0, 1, 1], [], []>} : vector<12x16xf32>, vector<16x12xf32>, vector<12x12xf32> -> vector<12x12xf32>
    %cst_79 = arith.constant 2.500000e-01 : f32
    %205 = vector.broadcast %cst_79 : f32 to vector<12x12xf32>
    %206 = arith.mulf %204, %205 : vector<12x12xf32>
    %cst_80 = arith.constant dense<0xFF800000> : vector<12xf32>
    %207 = vector.multi_reduction <maximumf>, %206, %cst_80 [1] : vector<12x12xf32> to vector<12xf32>
    %208 = vector.shape_cast %207 : vector<12xf32> to vector<12x1xf32>
    %209 = vector.broadcast %208 : vector<12x1xf32> to vector<12x12xf32>
    %210 = arith.subf %206, %209 : vector<12x12xf32>
    %211 = math.exp %210 : vector<12x12xf32>
    %cst_81 = arith.constant dense<0.000000e+00> : vector<12xf32>
    %212 = vector.multi_reduction <add>, %211, %cst_81 [1] : vector<12x12xf32> to vector<12xf32>
    %213 = vector.shape_cast %212 : vector<12xf32> to vector<12x1xf32>
    %214 = vector.broadcast %213 : vector<12x1xf32> to vector<12x12xf32>
    %215 = arith.divf %211, %214 : vector<12x12xf32>
    %cst_82 = arith.constant dense<0.000000e+00> : vector<12x16xf32>
    %216 = tpu.matmul %215, %202, %cst_82 {dimension_numbers = #tpu.dot_dimension_numbers<[1], [0], [0], [1], [0, 0, 1, 1], [], []>} : vector<12x12xf32>, vector<12x16xf32>, vector<12x16xf32> -> vector<12x16xf32>
    %c0_83 = arith.constant 0 : index
    %c0_84 = arith.constant 0 : index
    %217 = vector.load %arg12[%c0_83, %c0_84] : memref<1x16xf32, #tpu.memory_space<vmem>>, vector<1x16xf32>
    %c0_85 = arith.constant 0 : index
    %c0_86 = arith.constant 0 : index
    %218 = vector.load %arg13[%c0_85, %c0_86] : memref<1x16xf32, #tpu.memory_space<vmem>>, vector<1x16xf32>
    %cst_87 = arith.constant dense<0.000000e+00> : vector<12xf32>
    %219 = vector.multi_reduction <add>, %216, %cst_87 [1] : vector<12x16xf32> to vector<12xf32>
    %220 = vector.shape_cast %219 : vector<12xf32> to vector<12x1xf32>
    %cst_88 = arith.constant 1.600000e+01 : f32
    %221 = vector.broadcast %cst_88 : f32 to vector<12x1xf32>
    %222 = arith.divf %220, %221 : vector<12x1xf32>
    %223 = vector.broadcast %222 : vector<12x1xf32> to vector<12x16xf32>
    %224 = arith.subf %216, %223 : vector<12x16xf32>
    %225 = arith.mulf %224, %224 : vector<12x16xf32>
    %cst_89 = arith.constant dense<0.000000e+00> : vector<12xf32>
    %226 = vector.multi_reduction <add>, %225, %cst_89 [1] : vector<12x16xf32> to vector<12xf32>
    %227 = vector.shape_cast %226 : vector<12xf32> to vector<12x1xf32>
    %cst_90 = arith.constant 1.600000e+01 : f32
    %228 = vector.broadcast %cst_90 : f32 to vector<12x1xf32>
    %229 = arith.divf %227, %228 : vector<12x1xf32>
    %230 = vector.broadcast %222 : vector<12x1xf32> to vector<12x16xf32>
    %231 = arith.subf %216, %230 : vector<12x16xf32>
    %cst_91 = arith.constant 9.99999974E-6 : f32
    %232 = vector.broadcast %cst_91 : f32 to vector<12x1xf32>
    %233 = arith.addf %229, %232 : vector<12x1xf32>
    %234 = math.rsqrt %233 : vector<12x1xf32>
    %235 = vector.broadcast %234 : vector<12x1xf32> to vector<12x16xf32>
    %236 = arith.mulf %231, %235 : vector<12x16xf32>
    %237 = vector.broadcast %217 : vector<1x16xf32> to vector<12x16xf32>
    %238 = arith.mulf %236, %237 : vector<12x16xf32>
    %239 = vector.broadcast %218 : vector<1x16xf32> to vector<12x16xf32>
    %240 = arith.addf %238, %239 : vector<12x16xf32>
    %c0_92 = arith.constant 0 : index
    %c0_93 = arith.constant 0 : index
    %241 = vector.load %arg14[%c0_92, %c0_93] : memref<16x16xf32, #tpu.memory_space<vmem>>, vector<16x16xf32>
    %cst_94 = arith.constant dense<0.000000e+00> : vector<12x16xf32>
    %242 = tpu.matmul %240, %241, %cst_94 {dimension_numbers = #tpu.dot_dimension_numbers<[1], [0], [0], [1], [0, 0, 1, 1], [], []>} : vector<12x16xf32>, vector<16x16xf32>, vector<12x16xf32> -> vector<12x16xf32>
    %c0_95 = arith.constant 0 : index
    %c0_96 = arith.constant 0 : index
    %243 = vector.load %arg15[%c0_95, %c0_96] : memref<1x16xf32, #tpu.memory_space<vmem>>, vector<1x16xf32>
    %244 = vector.broadcast %243 : vector<1x16xf32> to vector<12x16xf32>
    %245 = arith.addf %242, %244 : vector<12x16xf32>
    %cst_97 = arith.constant 5.000000e-01 : f32
    %246 = vector.broadcast %cst_97 : f32 to vector<12x16xf32>
    %247 = arith.mulf %246, %245 : vector<12x16xf32>
    %cst_98 = arith.constant 4.471500e-02 : f32
    %248 = vector.broadcast %cst_98 : f32 to vector<12x16xf32>
    %249 = arith.mulf %248, %245 : vector<12x16xf32>
    %250 = arith.mulf %249, %245 : vector<12x16xf32>
    %251 = arith.mulf %250, %245 : vector<12x16xf32>
    %252 = arith.addf %245, %251 : vector<12x16xf32>
    %cst_99 = arith.constant 0.797884583 : f32
    %253 = vector.broadcast %cst_99 : f32 to vector<12x16xf32>
    %254 = arith.mulf %253, %252 : vector<12x16xf32>
    %255 = math.tanh %254 : vector<12x16xf32>
    %cst_100 = arith.constant 1.000000e+00 : f32
    %256 = vector.broadcast %cst_100 : f32 to vector<12x16xf32>
    %257 = arith.addf %256, %255 : vector<12x16xf32>
    %258 = arith.mulf %247, %257 : vector<12x16xf32>
    %c0_101 = arith.constant 0 : index
    %c0_102 = arith.constant 0 : index
    %259 = vector.load %arg16[%c0_101, %c0_102] : memref<1x16xf32, #tpu.memory_space<vmem>>, vector<1x16xf32>
    %c0_103 = arith.constant 0 : index
    %c0_104 = arith.constant 0 : index
    %260 = vector.load %arg17[%c0_103, %c0_104] : memref<1x16xf32, #tpu.memory_space<vmem>>, vector<1x16xf32>
    %cst_105 = arith.constant dense<0.000000e+00> : vector<12xf32>
    %261 = vector.multi_reduction <add>, %258, %cst_105 [1] : vector<12x16xf32> to vector<12xf32>
    %262 = vector.shape_cast %261 : vector<12xf32> to vector<12x1xf32>
    %cst_106 = arith.constant 1.600000e+01 : f32
    %263 = vector.broadcast %cst_106 : f32 to vector<12x1xf32>
    %264 = arith.divf %262, %263 : vector<12x1xf32>
    %265 = vector.broadcast %264 : vector<12x1xf32> to vector<12x16xf32>
    %266 = arith.subf %258, %265 : vector<12x16xf32>
    %267 = arith.mulf %266, %266 : vector<12x16xf32>
    %cst_107 = arith.constant dense<0.000000e+00> : vector<12xf32>
    %268 = vector.multi_reduction <add>, %267, %cst_107 [1] : vector<12x16xf32> to vector<12xf32>
    %269 = vector.shape_cast %268 : vector<12xf32> to vector<12x1xf32>
    %cst_108 = arith.constant 1.600000e+01 : f32
    %270 = vector.broadcast %cst_108 : f32 to vector<12x1xf32>
    %271 = arith.divf %269, %270 : vector<12x1xf32>
    %272 = vector.broadcast %264 : vector<12x1xf32> to vector<12x16xf32>
    %273 = arith.subf %258, %272 : vector<12x16xf32>
    %cst_109 = arith.constant 9.99999974E-6 : f32
    %274 = vector.broadcast %cst_109 : f32 to vector<12x1xf32>
    %275 = arith.addf %271, %274 : vector<12x1xf32>
    %276 = math.rsqrt %275 : vector<12x1xf32>
    %277 = vector.broadcast %276 : vector<12x1xf32> to vector<12x16xf32>
    %278 = arith.mulf %273, %277 : vector<12x16xf32>
    %279 = vector.broadcast %259 : vector<1x16xf32> to vector<12x16xf32>
    %280 = arith.mulf %278, %279 : vector<12x16xf32>
    %281 = vector.broadcast %260 : vector<1x16xf32> to vector<12x16xf32>
    %282 = arith.addf %280, %281 : vector<12x16xf32>
    %283 = tpu.iota {dimensions = array<i32: 0>} : vector<12x1xi32>
    %c4_i32 = arith.constant 4 : i32
    %284 = vector.broadcast %c4_i32 : i32 to vector<12x1xi32>
    %285 = arith.cmpi slt, %283, %284 : vector<12x1xi32>
    %cst_110 = arith.constant 0.000000e+00 : f32
    %286 = vector.shape_cast %285 : vector<12x1xi1> to vector<12x1xi1>
    %287 = vector.broadcast %286 : vector<12x1xi1> to vector<12x16xi1>
    %288 = vector.broadcast %cst_110 : f32 to vector<12x16xf32>
    %289 = arith.select %287, %282, %288 : vector<12x16xi1>, vector<12x16xf32>
    %cst_111 = arith.constant dense<0.000000e+00> : vector<16xf32>
    %290 = vector.multi_reduction <add>, %289, %cst_111 [0] : vector<12x16xf32> to vector<16xf32>
    %291 = vector.shape_cast %290 : vector<16xf32> to vector<1x16xf32>
    %cst_112 = arith.constant 4.000000e+00 : f32
    %292 = vector.broadcast %cst_112 : f32 to vector<1x16xf32>
    %293 = arith.divf %291, %292 : vector<1x16xf32>
    %cst_113 = arith.constant 0.000000e+00 : f32
    %294 = vector.shape_cast %285 : vector<12x1xi1> to vector<12x1xi1>
    %295 = vector.broadcast %294 : vector<12x1xi1> to vector<12x16xi1>
    %296 = vector.broadcast %cst_113 : f32 to vector<12x16xf32>
    %297 = arith.select %295, %296, %282 : vector<12x16xi1>, vector<12x16xf32>
    %cst_114 = arith.constant dense<0.000000e+00> : vector<16xf32>
    %298 = vector.multi_reduction <add>, %297, %cst_114 [0] : vector<12x16xf32> to vector<16xf32>
    %299 = vector.shape_cast %298 : vector<16xf32> to vector<1x16xf32>
    %cst_115 = arith.constant 8.000000e+00 : f32
    %300 = vector.broadcast %cst_115 : f32 to vector<1x16xf32>
    %301 = arith.divf %299, %300 : vector<1x16xf32>
    %c0_116 = arith.constant 0 : index
    %c0_117 = arith.constant 0 : index
    %302 = vector.load %arg18[%c0_116, %c0_117] : memref<32x4xf32, #tpu.memory_space<vmem>>, vector<32x4xf32>
    %303 = vector.extract_strided_slice %302 {offsets = [0, 0], sizes = [16, 4], strides = [1, 1]} : vector<32x4xf32> to vector<16x4xf32>
    %cst_118 = arith.constant dense<0.000000e+00> : vector<1x4xf32>
    %304 = tpu.matmul %293, %303, %cst_118 {dimension_numbers = #tpu.dot_dimension_numbers<[1], [0], [0], [1], [0, 0, 1, 1], [], []>} : vector<1x16xf32>, vector<16x4xf32>, vector<1x4xf32> -> vector<1x4xf32>
    %305 = vector.extract_strided_slice %302 {offsets = [16, 0], sizes = [16, 4], strides = [1, 1]} : vector<32x4xf32> to vector<16x4xf32>
    %cst_119 = arith.constant dense<0.000000e+00> : vector<1x4xf32>
    %306 = tpu.matmul %301, %305, %cst_119 {dimension_numbers = #tpu.dot_dimension_numbers<[1], [0], [0], [1], [0, 0, 1, 1], [], []>} : vector<1x16xf32>, vector<16x4xf32>, vector<1x4xf32> -> vector<1x4xf32>
    %307 = arith.addf %304, %306 : vector<1x4xf32>
    %308 = vector.extract_strided_slice %156#2 {offsets = [8, 0], sizes = [8, 1], strides = [1, 1]} : vector<24x1xf32> to vector<8x1xf32>
    %309 = vector.extract_strided_slice %156#2 {offsets = [20, 0], sizes = [4, 1], strides = [1, 1]} : vector<24x1xf32> to vector<4x1xf32>
    %310 = vector.extract_strided_slice %156#3 {offsets = [0, 4], sizes = [1, 4], strides = [1, 1]} : vector<1x24xf32> to vector<1x4xf32>
    %311 = vector.extract_strided_slice %156#3 {offsets = [0, 16], sizes = [1, 8], strides = [1, 1]} : vector<1x24xf32> to vector<1x8xf32>
    %312 = vector.broadcast %308 : vector<8x1xf32> to vector<8x4xf32>
    %313 = arith.mulf %312, %120 : vector<8x4xf32>
    %314 = vector.broadcast %310 : vector<1x4xf32> to vector<8x4xf32>
    %315 = arith.mulf %313, %314 : vector<8x4xf32>
    %cst_120 = arith.constant dense<0.000000e+00> : vector<4x32xf32>
    %316 = tpu.matmul %315, %78, %cst_120 {dimension_numbers = #tpu.dot_dimension_numbers<[0], [0], [1], [1], [0, 1, 1, 1], [], []>} : vector<8x4xf32>, vector<8x32xf32>, vector<4x32xf32> -> vector<4x32xf32>
    %317 = tpu.transpose %311, [1, 0] : vector<1x8xf32> -> vector<8x1xf32>
    %318 = vector.broadcast %317 : vector<8x1xf32> to vector<8x4xf32>
    %319 = arith.mulf %318, %120 : vector<8x4xf32>
    %320 = tpu.transpose %309, [1, 0] : vector<4x1xf32> -> vector<1x4xf32>
    %321 = vector.broadcast %320 : vector<1x4xf32> to vector<8x4xf32>
    %322 = arith.mulf %319, %321 : vector<8x4xf32>
    %cst_121 = arith.constant dense<0.000000e+00> : vector<8x32xf32>
    %323 = tpu.matmul %322, %83, %cst_121 {dimension_numbers = #tpu.dot_dimension_numbers<[1], [0], [0], [1], [0, 0, 1, 1], [], []>} : vector<8x4xf32>, vector<4x32xf32>, vector<8x32xf32> -> vector<8x32xf32>
    %324 = tpu.concatenate %316, %323 in 0 : vector<4x32xf32>, vector<8x32xf32> -> vector<12x32xf32>
    %c0_122 = arith.constant 0 : index
    %c0_123 = arith.constant 0 : index
    %325 = vector.load %arg9[%c0_122, %c0_123] : memref<1x32xf32, #tpu.memory_space<vmem>>, vector<1x32xf32>
    %c0_124 = arith.constant 0 : index
    %c0_125 = arith.constant 0 : index
    %326 = vector.load %arg10[%c0_124, %c0_125] : memref<1x32xf32, #tpu.memory_space<vmem>>, vector<1x32xf32>
    %cst_126 = arith.constant dense<0.000000e+00> : vector<12xf32>
    %327 = vector.multi_reduction <add>, %324, %cst_126 [1] : vector<12x32xf32> to vector<12xf32>
    %328 = vector.shape_cast %327 : vector<12xf32> to vector<12x1xf32>
    %cst_127 = arith.constant 3.200000e+01 : f32
    %329 = vector.broadcast %cst_127 : f32 to vector<12x1xf32>
    %330 = arith.divf %328, %329 : vector<12x1xf32>
    %331 = vector.broadcast %330 : vector<12x1xf32> to vector<12x32xf32>
    %332 = arith.subf %324, %331 : vector<12x32xf32>
    %333 = arith.mulf %332, %332 : vector<12x32xf32>
    %cst_128 = arith.constant dense<0.000000e+00> : vector<12xf32>
    %334 = vector.multi_reduction <add>, %333, %cst_128 [1] : vector<12x32xf32> to vector<12xf32>
    %335 = vector.shape_cast %334 : vector<12xf32> to vector<12x1xf32>
    %cst_129 = arith.constant 3.200000e+01 : f32
    %336 = vector.broadcast %cst_129 : f32 to vector<12x1xf32>
    %337 = arith.divf %335, %336 : vector<12x1xf32>
    %338 = vector.broadcast %330 : vector<12x1xf32> to vector<12x32xf32>
    %339 = arith.subf %324, %338 : vector<12x32xf32>
    %cst_130 = arith.constant 9.99999974E-6 : f32
    %340 = vector.broadcast %cst_130 : f32 to vector<12x1xf32>
    %341 = arith.addf %337, %340 : vector<12x1xf32>
    %342 = math.rsqrt %341 : vector<12x1xf32>
    %343 = vector.broadcast %342 : vector<12x1xf32> to vector<12x32xf32>
    %344 = arith.mulf %339, %343 : vector<12x32xf32>
    %345 = vector.broadcast %325 : vector<1x32xf32> to vector<12x32xf32>
    %346 = arith.mulf %344, %345 : vector<12x32xf32>
    %347 = vector.broadcast %326 : vector<1x32xf32> to vector<12x32xf32>
    %348 = arith.addf %346, %347 : vector<12x32xf32>
    %c0_131 = arith.constant 0 : index
    %c0_132 = arith.constant 0 : index
    %349 = vector.load %arg11[%c0_131, %c0_132] : memref<32x48xf32, #tpu.memory_space<vmem>>, vector<32x48xf32>
    %cst_133 = arith.constant dense<0.000000e+00> : vector<12x48xf32>
    %350 = tpu.matmul %348, %349, %cst_133 {dimension_numbers = #tpu.dot_dimension_numbers<[1], [0], [0], [1], [0, 0, 1, 1], [], []>} : vector<12x32xf32>, vector<32x48xf32>, vector<12x48xf32> -> vector<12x48xf32>
    %351 = vector.extract_strided_slice %350 {offsets = [0, 0], sizes = [12, 16], strides = [1, 1]} : vector<12x48xf32> to vector<12x16xf32>
    %352 = vector.extract_strided_slice %350 {offsets = [0, 16], sizes = [12, 16], strides = [1, 1]} : vector<12x48xf32> to vector<12x16xf32>
    %353 = vector.extract_strided_slice %350 {offsets = [0, 32], sizes = [12, 16], strides = [1, 1]} : vector<12x48xf32> to vector<12x16xf32>
    %354 = tpu.transpose %352, [1, 0] : vector<12x16xf32> -> vector<16x12xf32>
    %cst_134 = arith.constant dense<0.000000e+00> : vector<12x12xf32>
    %355 = tpu.matmul %351, %354, %cst_134 {dimension_numbers = #tpu.dot_dimension_numbers<[1], [0], [0], [1], [0, 0, 1, 1], [], []>} : vector<12x16xf32>, vector<16x12xf32>, vector<12x12xf32> -> vector<12x12xf32>
    %cst_135 = arith.constant 2.500000e-01 : f32
    %356 = vector.broadcast %cst_135 : f32 to vector<12x12xf32>
    %357 = arith.mulf %355, %356 : vector<12x12xf32>
    %cst_136 = arith.constant dense<0xFF800000> : vector<12xf32>
    %358 = vector.multi_reduction <maximumf>, %357, %cst_136 [1] : vector<12x12xf32> to vector<12xf32>
    %359 = vector.shape_cast %358 : vector<12xf32> to vector<12x1xf32>
    %360 = vector.broadcast %359 : vector<12x1xf32> to vector<12x12xf32>
    %361 = arith.subf %357, %360 : vector<12x12xf32>
    %362 = math.exp %361 : vector<12x12xf32>
    %cst_137 = arith.constant dense<0.000000e+00> : vector<12xf32>
    %363 = vector.multi_reduction <add>, %362, %cst_137 [1] : vector<12x12xf32> to vector<12xf32>
    %364 = vector.shape_cast %363 : vector<12xf32> to vector<12x1xf32>
    %365 = vector.broadcast %364 : vector<12x1xf32> to vector<12x12xf32>
    %366 = arith.divf %362, %365 : vector<12x12xf32>
    %cst_138 = arith.constant dense<0.000000e+00> : vector<12x16xf32>
    %367 = tpu.matmul %366, %353, %cst_138 {dimension_numbers = #tpu.dot_dimension_numbers<[1], [0], [0], [1], [0, 0, 1, 1], [], []>} : vector<12x12xf32>, vector<12x16xf32>, vector<12x16xf32> -> vector<12x16xf32>
    %c0_139 = arith.constant 0 : index
    %c0_140 = arith.constant 0 : index
    %368 = vector.load %arg12[%c0_139, %c0_140] : memref<1x16xf32, #tpu.memory_space<vmem>>, vector<1x16xf32>
    %c0_141 = arith.constant 0 : index
    %c0_142 = arith.constant 0 : index
    %369 = vector.load %arg13[%c0_141, %c0_142] : memref<1x16xf32, #tpu.memory_space<vmem>>, vector<1x16xf32>
    %cst_143 = arith.constant dense<0.000000e+00> : vector<12xf32>
    %370 = vector.multi_reduction <add>, %367, %cst_143 [1] : vector<12x16xf32> to vector<12xf32>
    %371 = vector.shape_cast %370 : vector<12xf32> to vector<12x1xf32>
    %cst_144 = arith.constant 1.600000e+01 : f32
    %372 = vector.broadcast %cst_144 : f32 to vector<12x1xf32>
    %373 = arith.divf %371, %372 : vector<12x1xf32>
    %374 = vector.broadcast %373 : vector<12x1xf32> to vector<12x16xf32>
    %375 = arith.subf %367, %374 : vector<12x16xf32>
    %376 = arith.mulf %375, %375 : vector<12x16xf32>
    %cst_145 = arith.constant dense<0.000000e+00> : vector<12xf32>
    %377 = vector.multi_reduction <add>, %376, %cst_145 [1] : vector<12x16xf32> to vector<12xf32>
    %378 = vector.shape_cast %377 : vector<12xf32> to vector<12x1xf32>
    %cst_146 = arith.constant 1.600000e+01 : f32
    %379 = vector.broadcast %cst_146 : f32 to vector<12x1xf32>
    %380 = arith.divf %378, %379 : vector<12x1xf32>
    %381 = vector.broadcast %373 : vector<12x1xf32> to vector<12x16xf32>
    %382 = arith.subf %367, %381 : vector<12x16xf32>
    %cst_147 = arith.constant 9.99999974E-6 : f32
    %383 = vector.broadcast %cst_147 : f32 to vector<12x1xf32>
    %384 = arith.addf %380, %383 : vector<12x1xf32>
    %385 = math.rsqrt %384 : vector<12x1xf32>
    %386 = vector.broadcast %385 : vector<12x1xf32> to vector<12x16xf32>
    %387 = arith.mulf %382, %386 : vector<12x16xf32>
    %388 = vector.broadcast %368 : vector<1x16xf32> to vector<12x16xf32>
    %389 = arith.mulf %387, %388 : vector<12x16xf32>
    %390 = vector.broadcast %369 : vector<1x16xf32> to vector<12x16xf32>
    %391 = arith.addf %389, %390 : vector<12x16xf32>
    %c0_148 = arith.constant 0 : index
    %c0_149 = arith.constant 0 : index
    %392 = vector.load %arg14[%c0_148, %c0_149] : memref<16x16xf32, #tpu.memory_space<vmem>>, vector<16x16xf32>
    %cst_150 = arith.constant dense<0.000000e+00> : vector<12x16xf32>
    %393 = tpu.matmul %391, %392, %cst_150 {dimension_numbers = #tpu.dot_dimension_numbers<[1], [0], [0], [1], [0, 0, 1, 1], [], []>} : vector<12x16xf32>, vector<16x16xf32>, vector<12x16xf32> -> vector<12x16xf32>
    %c0_151 = arith.constant 0 : index
    %c0_152 = arith.constant 0 : index
    %394 = vector.load %arg15[%c0_151, %c0_152] : memref<1x16xf32, #tpu.memory_space<vmem>>, vector<1x16xf32>
    %395 = vector.broadcast %394 : vector<1x16xf32> to vector<12x16xf32>
    %396 = arith.addf %393, %395 : vector<12x16xf32>
    %cst_153 = arith.constant 5.000000e-01 : f32
    %397 = vector.broadcast %cst_153 : f32 to vector<12x16xf32>
    %398 = arith.mulf %397, %396 : vector<12x16xf32>
    %cst_154 = arith.constant 4.471500e-02 : f32
    %399 = vector.broadcast %cst_154 : f32 to vector<12x16xf32>
    %400 = arith.mulf %399, %396 : vector<12x16xf32>
    %401 = arith.mulf %400, %396 : vector<12x16xf32>
    %402 = arith.mulf %401, %396 : vector<12x16xf32>
    %403 = arith.addf %396, %402 : vector<12x16xf32>
    %cst_155 = arith.constant 0.797884583 : f32
    %404 = vector.broadcast %cst_155 : f32 to vector<12x16xf32>
    %405 = arith.mulf %404, %403 : vector<12x16xf32>
    %406 = math.tanh %405 : vector<12x16xf32>
    %cst_156 = arith.constant 1.000000e+00 : f32
    %407 = vector.broadcast %cst_156 : f32 to vector<12x16xf32>
    %408 = arith.addf %407, %406 : vector<12x16xf32>
    %409 = arith.mulf %398, %408 : vector<12x16xf32>
    %c0_157 = arith.constant 0 : index
    %c0_158 = arith.constant 0 : index
    %410 = vector.load %arg16[%c0_157, %c0_158] : memref<1x16xf32, #tpu.memory_space<vmem>>, vector<1x16xf32>
    %c0_159 = arith.constant 0 : index
    %c0_160 = arith.constant 0 : index
    %411 = vector.load %arg17[%c0_159, %c0_160] : memref<1x16xf32, #tpu.memory_space<vmem>>, vector<1x16xf32>
    %cst_161 = arith.constant dense<0.000000e+00> : vector<12xf32>
    %412 = vector.multi_reduction <add>, %409, %cst_161 [1] : vector<12x16xf32> to vector<12xf32>
    %413 = vector.shape_cast %412 : vector<12xf32> to vector<12x1xf32>
    %cst_162 = arith.constant 1.600000e+01 : f32
    %414 = vector.broadcast %cst_162 : f32 to vector<12x1xf32>
    %415 = arith.divf %413, %414 : vector<12x1xf32>
    %416 = vector.broadcast %415 : vector<12x1xf32> to vector<12x16xf32>
    %417 = arith.subf %409, %416 : vector<12x16xf32>
    %418 = arith.mulf %417, %417 : vector<12x16xf32>
    %cst_163 = arith.constant dense<0.000000e+00> : vector<12xf32>
    %419 = vector.multi_reduction <add>, %418, %cst_163 [1] : vector<12x16xf32> to vector<12xf32>
    %420 = vector.shape_cast %419 : vector<12xf32> to vector<12x1xf32>
    %cst_164 = arith.constant 1.600000e+01 : f32
    %421 = vector.broadcast %cst_164 : f32 to vector<12x1xf32>
    %422 = arith.divf %420, %421 : vector<12x1xf32>
    %423 = vector.broadcast %415 : vector<12x1xf32> to vector<12x16xf32>
    %424 = arith.subf %409, %423 : vector<12x16xf32>
    %cst_165 = arith.constant 9.99999974E-6 : f32
    %425 = vector.broadcast %cst_165 : f32 to vector<12x1xf32>
    %426 = arith.addf %422, %425 : vector<12x1xf32>
    %427 = math.rsqrt %426 : vector<12x1xf32>
    %428 = vector.broadcast %427 : vector<12x1xf32> to vector<12x16xf32>
    %429 = arith.mulf %424, %428 : vector<12x16xf32>
    %430 = vector.broadcast %410 : vector<1x16xf32> to vector<12x16xf32>
    %431 = arith.mulf %429, %430 : vector<12x16xf32>
    %432 = vector.broadcast %411 : vector<1x16xf32> to vector<12x16xf32>
    %433 = arith.addf %431, %432 : vector<12x16xf32>
    %434 = tpu.iota {dimensions = array<i32: 0>} : vector<12x1xi32>
    %c4_i32_166 = arith.constant 4 : i32
    %435 = vector.broadcast %c4_i32_166 : i32 to vector<12x1xi32>
    %436 = arith.cmpi slt, %434, %435 : vector<12x1xi32>
    %cst_167 = arith.constant 0.000000e+00 : f32
    %437 = vector.shape_cast %436 : vector<12x1xi1> to vector<12x1xi1>
    %438 = vector.broadcast %437 : vector<12x1xi1> to vector<12x16xi1>
    %439 = vector.broadcast %cst_167 : f32 to vector<12x16xf32>
    %440 = arith.select %438, %433, %439 : vector<12x16xi1>, vector<12x16xf32>
    %cst_168 = arith.constant dense<0.000000e+00> : vector<16xf32>
    %441 = vector.multi_reduction <add>, %440, %cst_168 [0] : vector<12x16xf32> to vector<16xf32>
    %442 = vector.shape_cast %441 : vector<16xf32> to vector<1x16xf32>
    %cst_169 = arith.constant 4.000000e+00 : f32
    %443 = vector.broadcast %cst_169 : f32 to vector<1x16xf32>
    %444 = arith.divf %442, %443 : vector<1x16xf32>
    %cst_170 = arith.constant 0.000000e+00 : f32
    %445 = vector.shape_cast %436 : vector<12x1xi1> to vector<12x1xi1>
    %446 = vector.broadcast %445 : vector<12x1xi1> to vector<12x16xi1>
    %447 = vector.broadcast %cst_170 : f32 to vector<12x16xf32>
    %448 = arith.select %446, %447, %433 : vector<12x16xi1>, vector<12x16xf32>
    %cst_171 = arith.constant dense<0.000000e+00> : vector<16xf32>
    %449 = vector.multi_reduction <add>, %448, %cst_171 [0] : vector<12x16xf32> to vector<16xf32>
    %450 = vector.shape_cast %449 : vector<16xf32> to vector<1x16xf32>
    %cst_172 = arith.constant 8.000000e+00 : f32
    %451 = vector.broadcast %cst_172 : f32 to vector<1x16xf32>
    %452 = arith.divf %450, %451 : vector<1x16xf32>
    %c0_173 = arith.constant 0 : index
    %c0_174 = arith.constant 0 : index
    %453 = vector.load %arg18[%c0_173, %c0_174] : memref<32x4xf32, #tpu.memory_space<vmem>>, vector<32x4xf32>
    %454 = vector.extract_strided_slice %453 {offsets = [0, 0], sizes = [16, 4], strides = [1, 1]} : vector<32x4xf32> to vector<16x4xf32>
    %cst_175 = arith.constant dense<0.000000e+00> : vector<1x4xf32>
    %455 = tpu.matmul %444, %454, %cst_175 {dimension_numbers = #tpu.dot_dimension_numbers<[1], [0], [0], [1], [0, 0, 1, 1], [], []>} : vector<1x16xf32>, vector<16x4xf32>, vector<1x4xf32> -> vector<1x4xf32>
    %456 = vector.extract_strided_slice %453 {offsets = [16, 0], sizes = [16, 4], strides = [1, 1]} : vector<32x4xf32> to vector<16x4xf32>
    %cst_176 = arith.constant dense<0.000000e+00> : vector<1x4xf32>
    %457 = tpu.matmul %452, %456, %cst_176 {dimension_numbers = #tpu.dot_dimension_numbers<[1], [0], [0], [1], [0, 0, 1, 1], [], []>} : vector<1x16xf32>, vector<16x4xf32>, vector<1x4xf32> -> vector<1x4xf32>
    %458 = arith.addf %455, %457 : vector<1x4xf32>
    %459 = tpu.concatenate %307, %458 in 0 : vector<1x4xf32>, vector<1x4xf32> -> vector<2x4xf32>
    %c0_177 = arith.constant 0 : index
    %c0_178 = arith.constant 0 : index
    %c0_179 = arith.constant 0 : index
    %460 = vector.load %arg19[%c0_177, %c0_178, %c0_179] : memref<1x2x4xf32, #tpu.memory_space<vmem>>, vector<1x2x4xf32>
    %461 = vector.shape_cast %460 : vector<1x2x4xf32> to vector<2x4xf32>
    %462 = vector.shape_cast %459 : vector<2x4xf32> to vector<1x2x4xf32>
    tpu.vector_store %arg19[%c0_177, %c0_178, %c0_179], %462 {strides = array<i32>} : memref<1x2x4xf32, #tpu.memory_space<vmem>>, vector<1x2x4xf32>,
    return
  }
  func.func @transform_0(%arg0: i32) -> (i32, i32, i32) {
    %c0_i32 = arith.constant 0 : i32
    %c0_i32_0 = arith.constant 0 : i32
    %c0_i32_1 = arith.constant 0 : i32
    return %arg0, %c0_i32, %c0_i32_0 : i32, i32, i32
  }
  func.func @transform_1(%arg0: i32) -> (i32, i32, i32) {
    %c0_i32 = arith.constant 0 : i32
    %c0_i32_0 = arith.constant 0 : i32
    %c0_i32_1 = arith.constant 0 : i32
    return %arg0, %c0_i32, %c0_i32_0 : i32, i32, i32
  }
  func.func @transform_2(%arg0: i32) -> (i32, i32) {
    %c0_i32 = arith.constant 0 : i32
    %c0_i32_0 = arith.constant 0 : i32
    %c0_i32_1 = arith.constant 0 : i32
    return %c0_i32, %c0_i32_0 : i32, i32
  }
  func.func @transform_3(%arg0: i32) -> (i32, i32) {
    %c0_i32 = arith.constant 0 : i32
    %c0_i32_0 = arith.constant 0 : i32
    %c0_i32_1 = arith.constant 0 : i32
    return %c0_i32, %c0_i32_0 : i32, i32
  }
  func.func @transform_4(%arg0: i32) -> (i32, i32) {
    %c0_i32 = arith.constant 0 : i32
    %c0_i32_0 = arith.constant 0 : i32
    %c0_i32_1 = arith.constant 0 : i32
    return %c0_i32, %c0_i32_0 : i32, i32
  }
  func.func @transform_5(%arg0: i32) -> (i32, i32) {
    %c0_i32 = arith.constant 0 : i32
    %c0_i32_0 = arith.constant 0 : i32
    %c0_i32_1 = arith.constant 0 : i32
    return %c0_i32, %c0_i32_0 : i32, i32
  }
  func.func @transform_6(%arg0: i32) -> (i32, i32) {
    %c0_i32 = arith.constant 0 : i32
    %c0_i32_0 = arith.constant 0 : i32
    %c0_i32_1 = arith.constant 0 : i32
    return %c0_i32, %c0_i32_0 : i32, i32
  }
  func.func @transform_7(%arg0: i32) -> (i32, i32) {
    %c0_i32 = arith.constant 0 : i32
    %c0_i32_0 = arith.constant 0 : i32
    %c0_i32_1 = arith.constant 0 : i32
    return %c0_i32, %c0_i32_0 : i32, i32
  }
  func.func @transform_8(%arg0: i32) -> (i32, i32) {
    %c0_i32 = arith.constant 0 : i32
    %c0_i32_0 = arith.constant 0 : i32
    %c0_i32_1 = arith.constant 0 : i32
    return %c0_i32, %c0_i32_0 : i32, i32
  }
  func.func @transform_9(%arg0: i32) -> (i32, i32) {
    %c0_i32 = arith.constant 0 : i32
    %c0_i32_0 = arith.constant 0 : i32
    %c0_i32_1 = arith.constant 0 : i32
    return %c0_i32, %c0_i32_0 : i32, i32
  }
  func.func @transform_10(%arg0: i32) -> (i32, i32) {
    %c0_i32 = arith.constant 0 : i32
    %c0_i32_0 = arith.constant 0 : i32
    %c0_i32_1 = arith.constant 0 : i32
    return %c0_i32, %c0_i32_0 : i32, i32
  }
  func.func @transform_11(%arg0: i32) -> (i32, i32) {
    %c0_i32 = arith.constant 0 : i32
    %c0_i32_0 = arith.constant 0 : i32
    %c0_i32_1 = arith.constant 0 : i32
    return %c0_i32, %c0_i32_0 : i32, i32
  }
  func.func @transform_12(%arg0: i32) -> (i32, i32) {
    %c0_i32 = arith.constant 0 : i32
    %c0_i32_0 = arith.constant 0 : i32
    %c0_i32_1 = arith.constant 0 : i32
    return %c0_i32, %c0_i32_0 : i32, i32
  }
  func.func @transform_13(%arg0: i32) -> (i32, i32) {
    %c0_i32 = arith.constant 0 : i32
    %c0_i32_0 = arith.constant 0 : i32
    %c0_i32_1 = arith.constant 0 : i32
    return %c0_i32, %c0_i32_0 : i32, i32
  }
  func.func @transform_14(%arg0: i32) -> (i32, i32) {
    %c0_i32 = arith.constant 0 : i32
    %c0_i32_0 = arith.constant 0 : i32
    %c0_i32_1 = arith.constant 0 : i32
    return %c0_i32, %c0_i32_0 : i32, i32
  }
  func.func @transform_15(%arg0: i32) -> (i32, i32) {
    %c0_i32 = arith.constant 0 : i32
    %c0_i32_0 = arith.constant 0 : i32
    %c0_i32_1 = arith.constant 0 : i32
    return %c0_i32, %c0_i32_0 : i32, i32
  }
  func.func @transform_16(%arg0: i32) -> (i32, i32) {
    %c0_i32 = arith.constant 0 : i32
    %c0_i32_0 = arith.constant 0 : i32
    %c0_i32_1 = arith.constant 0 : i32
    return %c0_i32, %c0_i32_0 : i32, i32
  }
  func.func @transform_17(%arg0: i32) -> (i32, i32) {
    %c0_i32 = arith.constant 0 : i32
    %c0_i32_0 = arith.constant 0 : i32
    %c0_i32_1 = arith.constant 0 : i32
    return %c0_i32, %c0_i32_0 : i32, i32
  }
  func.func @transform_18(%arg0: i32) -> (i32, i32, i32) {
    %c0_i32 = arith.constant 0 : i32
    %c0_i32_0 = arith.constant 0 : i32
    %c0_i32_1 = arith.constant 0 : i32
    return %arg0, %c0_i32, %c0_i32_0 : i32, i32, i32
  }
}

</mosaic_0001>

<bundles_post_ra>
// kernel: tpu_custom_call.1
= control target key start
LH: loop header
LB: loop body
LE: loop exit
PB: predicated region body
PF: predicated region fallthrough
CT: control target
= control target key end

     0   :  { %s6251_s0 = inlined_call_operand.vmem [shape: f32[1,2,128], index: 0, kind: input, shape index: {}]   ;;  %s6252_s1 = inlined_call_operand.hbm [shape: f32[1,16,48], index: 1, kind: input, shape index: {}]   ;;  %s6253_s2 = inlined_call_operand.hbm [shape: f32[128,128], index: 2, kind: input, shape index: {}]   ;;  %s6254_s3 = inlined_call_operand.hbm [shape: f32[1,128], index: 3, kind: input, shape index: {}]   ;;  %s6255_s4 = inlined_call_operand.vmem [shape: f32[128,128], index: 4, kind: input, shape index: {}]   ;;  %s6256_s5 = inlined_call_operand.hbm [shape: f32[1,128], index: 5, kind: input, shape index: {}]   ;;  %s6257_s6 = inlined_call_operand.vmem [shape: f32[48,32], index: 6, kind: input, shape index: {}]   ;;  %s6258_s7 = inlined_call_operand.hbm [shape: f32[1,32], index: 7, kind: input, shape index: {}]   ;;  %s6259_s8 = inlined_call_operand.hbm [shape: f32[1,32], index: 8, kind: input, shape index: {}]   ;;  %s6260_s9 = inlined_call_operand.hbm [shape: f32[1,32], index: 9, kind: input, shape index: {}]   ;;  %s6261_s10 = inlined_call_operand.hbm [shape: f32[32,48], index: 10, kind: input, shape index: {}]   ;;  %s6262_s11 = inlined_call_operand.vmem [shape: f32[1,16], index: 11, kind: input, shape index: {}]   ;;  %s6263_s12 = inlined_call_operand.vmem [shape: f32[1,16], index: 12, kind: input, shape index: {}]   ;;  %s6264_s13 = inlined_call_operand.vmem [shape: f32[16,16], index: 13, kind: input, shape index: {}]   ;;  %s6265_s14 = inlined_call_operand.vmem [shape: f32[1,16], index: 14, kind: input, shape index: {}]   ;;  %s6266_s15 = inlined_call_operand.vmem [shape: f32[1,16], index: 15, kind: input, shape index: {}]   ;;  %s6267_s16 = inlined_call_operand.vmem [shape: f32[1,16], index: 16, kind: input, shape index: {}]   ;;  %s6268_s17 = inlined_call_operand.vmem [shape: f32[32,4], index: 17, kind: input, shape index: {}]   ;;  %s6269_s18 = inlined_call_operand.hbm [shape: f32[1,2,4], index: 18, kind: output, shape index: {}]  }
   0x1   :  { %6274 = sst [smem:[#allocation23_spill]] %s6251_s0 }
   0x2   :  { %6275 = sst [smem:[#allocation24_spill]] %s6252_s1 }
   0x3   :  { %6276 = sst [smem:[#allocation25_spill]] %s6253_s2 }
   0x4   :  { %23 = vsyncpa [#allocation3], 0 }
   0x5   :  { %24 = vsyncpa [#allocation6], 0 }
   0x6   :  { %25 = vsyncpa [#allocation9], 0 }
   0x7   :  { %26 = vsyncpa [#allocation12], 0 }
   0x8   :  { %27 = vsyncpa [#allocation15], 0 }
   0x9   :  { %28 = vsyncpa [#allocation4], 0  ;;  %s5225_s27 = smov [#allocation5]   ;;  %s5226_s29 = smov [#allocation8]  }
   0xa   :  { %s48_s28 = sshll.u32 %s5225_s27, 4  ;;  %s73_s30 = sshll.u32 %s5226_s29, 4  ;;  %s49_s28 = int_to_ptr.vmem [resolvable:$true] %s48_s28  ;;  %s5348_s30 = int_to_ptr.vmem [resolvable:$true] %s73_s30 }
   0xb   :  { %s6277_s1 = sld [smem:[#allocation25_spill]] }
  0x11   :  { %s4975_s20 = scalar_lea.hbm %s6277_s1, 2048 }
  0x12   :  { %p4976_p0 = scmp.ne.s32.totalorder %s6277_s1, %s4975_s20  ;;  %p4979_p1 = scmp.lt.u32.totalorder %s4975_s20, %s6277_s1 }
  0x14   :  { %p4981_p2 = pnand %p4979_p1, %p4976_p0 }
  0x16   :  { %4984 = shalt.err (!%p4981_p2)
}
  0x17   :  { %s4985_s24 = scalar_lea.vmem %s49_s28, 2048  ;;  %p4990_p4 = scmp.lt.s32.totalorder %s49_s28, %s49_s28 }
  0x18   :  { %p4986_p3 = scmp.ne.s32.totalorder %s49_s28, %s4985_s24  ;;  %p4991_p5 = scmp.lt.s32.totalorder %s4985_s24, %s4985_s24 }
  0x1a   :  { %p4992_p6 = por %p4991_p5, %p4990_p4 }
  0x1c   :  { %p4993_p7 = pnand %p4992_p6, %p4986_p3 }
  0x1e   :  { %4996 = shalt.err (!%p4993_p7)
}
  0x1f   :  { %s6272_s25 = smov 128   ;;  %s5228_s26 = smov 8  }
  0x20   :  { %54 = dma.hbm_to_vmem [thread:$0]  %s6277_s1, 2048, %s49_s28, [#allocation6], %s6272_s25, %s6272_s25, %s5228_s26  }
  0x21   :  { %s4997_s20 = scalar_lea.hbm %s6256_s5, 16 }
  0x22   :  { %p4998_p8 = scmp.ne.s32.totalorder %s6256_s5, %s4997_s20  ;;  %p5001_p9 = scmp.lt.u32.totalorder %s4997_s20, %s6256_s5 }
  0x24   :  { %p5003_p10 = pnand %p5001_p9, %p4998_p8 }
  0x26   :  { %5006 = shalt.err (!%p5003_p10)
}
  0x27   :  { %s5007_s24 = scalar_lea.vmem %s5348_s30, 16  ;;  %s5011_s28 = scalar_lea.vmem %s5348_s30, 32 }
  0x28   :  { %p5008_p11 = scmp.ne.s32.totalorder %s5348_s30, %s5007_s24  ;;  %p5012_p12 = scmp.lt.s32.totalorder %s5348_s30, %s5348_s30 }
  0x29   :  { %p5013_p13 = scmp.lt.s32.totalorder %s5011_s28, %s5007_s24 }
  0x2b   :  { %p5014_p0 = por %p5013_p13, %p5012_p12 }
  0x2d   :  { %p5015_p1 = pnand %p5014_p0, %p5008_p11 }
  0x2f   :  { %5018 = shalt.err (!%p5015_p1)
}
  0x30   :  { %76 = dma.hbm_to_vmem [thread:$0]  %s6256_s5, 16, %s5348_s30, [#allocation9]  }
  0x31   :  { %s5229_s29 = smov [#allocation11]   ;;  %s5230_s19 = smov [#allocation2]  }
  0x32   :  { %s95_s0 = sshll.u32 %s5229_s29, 4  ;;  %s36_s20 = sshll.u32 %s5230_s19, 4  ;;  %s96_s0 = int_to_ptr.vmem [resolvable:$true] %s95_s0  ;;  %s5383_s20 = int_to_ptr.vmem [resolvable:$true] %s36_s20 }
  0x33   :  { %s5019_s2 = scalar_lea.hbm %s6259_s8, 16 }
  0x34   :  { %p5020_p2 = scmp.ne.s32.totalorder %s6259_s8, %s5019_s2  ;;  %p5023_p3 = scmp.lt.u32.totalorder %s5019_s2, %s6259_s8 }
  0x36   :  { %p5025_p4 = pnand %p5023_p3, %p5020_p2 }
  0x38   :  { %5028 = shalt.err (!%p5025_p4)
}
  0x39   :  { %s5029_s5 = scalar_lea.vmem %s96_s0, 16  ;;  %s5033_s30 = scalar_lea.vmem %s96_s0, 32 }
  0x3a   :  { %p5030_p5 = scmp.ne.s32.totalorder %s96_s0, %s5029_s5  ;;  %p5034_p6 = scmp.lt.s32.totalorder %s96_s0, %s96_s0 }
  0x3b   :  { %p5035_p7 = scmp.lt.s32.totalorder %s5033_s30, %s5029_s5 }
  0x3d   :  { %p5036_p8 = por %p5035_p7, %p5034_p6 }
  0x3f   :  { %p5037_p9 = pnand %p5036_p8, %p5030_p5 }
  0x41   :  { %5040 = shalt.err (!%p5037_p9)
}
  0x42   :  { %98 = dma.hbm_to_vmem [thread:$0]  %s6259_s8, 16, %s96_s0, [#allocation12]  }
  0x43   :  { %s6278_s21 = sld [smem:[#allocation24_spill]] }
  0x49   :  { %s5041_s22 = scalar_lea.hbm %s6278_s21, 256 }
  0x4a   :  { %p5042_p10 = scmp.ne.s32.totalorder %s6278_s21, %s5041_s22  ;;  %p5045_p11 = scmp.lt.u32.totalorder %s5041_s22, %s6278_s21 }
  0x4c   :  { %p5047_p12 = pnand %p5045_p11, %p5042_p10 }
  0x4e   :  { %5050 = shalt.err (!%p5047_p12)
}
  0x4f   :  { %s5051_s28 = scalar_lea.vmem %s5383_s20, 256  ;;  %p5056_p0 = scmp.lt.s32.totalorder %s5383_s20, %s5383_s20 }
  0x50   :  { %p5052_p13 = scmp.ne.s32.totalorder %s5383_s20, %s5051_s28  ;;  %p5057_p1 = scmp.lt.s32.totalorder %s5051_s28, %s5051_s28 }
  0x52   :  { %p5058_p2 = por %p5057_p1, %p5056_p0 }
  0x54   :  { %p5059_p3 = pnand %p5058_p2, %p5052_p13 }
  0x56   :  { %5062 = shalt.err (!%p5059_p3)
}
  0x57   :  { %s6279_s8 = smov 128   ;;  %s5231_s30 = smov [#allocation7]  }
  0x58   :  { %42 = dma.hbm_to_vmem [thread:$0]  %s6278_s21, 256, %s5383_s20, [#allocation3], %s6279_s8, %s6279_s8, %s5228_s26  }
  0x59   :  { %s61_s1 = sshll.u32 %s5231_s30, 4  ;;  %s5232_s27 = smov [#allocation10]   ;;  %s62_s1 = int_to_ptr.vmem [resolvable:$true] %s61_s1 }
  0x5a   :  { %s85_s29 = sshll.u32 %s5232_s27, 4  ;;  %s5063_s25 = scalar_lea.hbm %s6254_s3, 16  ;;  %s86_s29 = int_to_ptr.vmem [resolvable:$true] %s85_s29 }
  0x5b   :  { %p5064_p4 = scmp.ne.s32.totalorder %s6254_s3, %s5063_s25  ;;  %p5067_p5 = scmp.lt.u32.totalorder %s5063_s25, %s6254_s3 }
  0x5d   :  { %p5069_p6 = pnand %p5067_p5, %p5064_p4 }
  0x5f   :  { %5072 = shalt.err (!%p5069_p6)
}
  0x60   :  { %s5073_s20 = scalar_lea.vmem %s62_s1, 16  ;;  %s5077_s21 = scalar_lea.vmem %s62_s1, 32 }
  0x61   :  { %p5074_p7 = scmp.ne.s32.totalorder %s62_s1, %s5073_s20  ;;  %p5078_p8 = scmp.lt.s32.totalorder %s62_s1, %s62_s1 }
  0x62   :  { %p5079_p9 = scmp.lt.s32.totalorder %s5077_s21, %s5073_s20 }
  0x64   :  { %p5080_p10 = por %p5079_p9, %p5078_p8 }
  0x66   :  { %p5081_p11 = pnand %p5080_p10, %p5074_p7 }
  0x68   :  { %5084 = shalt.err (!%p5081_p11)
}
  0x69   :  { %64 = dma.hbm_to_vmem [thread:$0]  %s6254_s3, 16, %s62_s1, [#allocation6]  }
  0x6a   :  { %s5085_s19 = scalar_lea.hbm %s6258_s7, 16 }
  0x6b   :  { %p5086_p12 = scmp.ne.s32.totalorder %s6258_s7, %s5085_s19  ;;  %p5089_p13 = scmp.lt.u32.totalorder %s5085_s19, %s6258_s7 }
  0x6d   :  { %p5091_p0 = pnand %p5089_p13, %p5086_p12 }
  0x6f   :  { %5094 = shalt.err (!%p5091_p0)
}
  0x70   :  { %s5095_s24 = scalar_lea.vmem %s86_s29, 16  ;;  %s5099_s28 = scalar_lea.vmem %s86_s29, 32 }
  0x71   :  { %p5096_p1 = scmp.ne.s32.totalorder %s86_s29, %s5095_s24  ;;  %p5100_p2 = scmp.lt.s32.totalorder %s86_s29, %s86_s29 }
  0x72   :  { %p5101_p3 = scmp.lt.s32.totalorder %s5099_s28, %s5095_s24 }
  0x74   :  { %p5102_p4 = por %p5101_p3, %p5100_p2 }
  0x76   :  { %p5103_p5 = pnand %p5102_p4, %p5096_p1 }
  0x78   :  { %5106 = shalt.err (!%p5103_p5)
}
  0x79   :  { %88 = dma.hbm_to_vmem [thread:$0]  %s6258_s7, 16, %s86_s29, [#allocation9]  }
  0x7a   :  { %s5233_s20 = smov [#allocation13]   ;;  %s5234_s0 = smov [#allocation14]  }
  0x7b   :  { %s105_s21 = sshll.u32 %s5233_s20, 4  ;;  %s114_s5 = sshll.u32 %s5234_s0, 4  ;;  %s106_s21 = int_to_ptr.vmem [resolvable:$true] %s105_s21  ;;  %s5441_s5 = int_to_ptr.vmem [resolvable:$true] %s114_s5 }
  0x7c   :  { %s5107_s19 = scalar_lea.hbm %s6260_s9, 16 }
  0x7d   :  { %p5108_p6 = scmp.ne.s32.totalorder %s6260_s9, %s5107_s19  ;;  %p5111_p7 = scmp.lt.u32.totalorder %s5107_s19, %s6260_s9 }
  0x7f   :  { %p5113_p8 = pnand %p5111_p7, %p5108_p6 }
  0x81   :  { %5116 = shalt.err (!%p5113_p8)
}
  0x82   :  { %s5117_s7 = scalar_lea.vmem %s106_s21, 16  ;;  %s5121_s29 = scalar_lea.vmem %s106_s21, 32 }
  0x83   :  { %p5118_p9 = scmp.ne.s32.totalorder %s106_s21, %s5117_s7  ;;  %p5122_p10 = scmp.lt.s32.totalorder %s106_s21, %s106_s21 }
  0x84   :  { %p5123_p11 = scmp.lt.s32.totalorder %s5121_s29, %s5117_s7 }
  0x86   :  { %p5124_p12 = por %p5123_p11, %p5122_p10 }
  0x88   :  { %p5125_p13 = pnand %p5124_p12, %p5118_p9 }
  0x8a   :  { %5128 = shalt.err (!%p5125_p13)
}
  0x8b   :  { %108 = dma.hbm_to_vmem [thread:$0]  %s6260_s9, 16, %s106_s21, [#allocation12]  }
  0x8c   :  { %s5129_s20 = scalar_lea.hbm %s6261_s10, 512 }
  0x8d   :  { %p5130_p0 = scmp.ne.s32.totalorder %s6261_s10, %s5129_s20  ;;  %p5133_p1 = scmp.lt.u32.totalorder %s5129_s20, %s6261_s10 }
  0x8f   :  { %p5135_p2 = pnand %p5133_p1, %p5130_p0 }
  0x91   :  { %5138 = shalt.err (!%p5135_p2)
}
  0x92   :  { %s5139_s22 = scalar_lea.vmem %s5441_s5, 512  ;;  %p5144_p4 = scmp.lt.s32.totalorder %s5441_s5, %s5441_s5 }
  0x93   :  { %p5140_p3 = scmp.ne.s32.totalorder %s5441_s5, %s5139_s22  ;;  %p5145_p5 = scmp.lt.s32.totalorder %s5139_s22, %s5139_s22 }
  0x95   :  { %p5146_p6 = por %p5145_p5, %p5144_p4 }
  0x97   :  { %p5147_p7 = pnand %p5146_p6, %p5140_p3 }
  0x99   :  { %5150 = shalt.err (!%p5147_p7)
}
  0x9a   :  { %120 = dma.hbm_to_vmem [thread:$0]  %s6261_s10, 512, %s5441_s5, [#allocation15], %s6279_s8, %s6279_s8, %s5228_s26  }
  0x9b   :  { %5193 = dma.done.wait [#allocation3], 256  }
  0x9c   :  { %5194 = vsyncadd [#allocation3], 4294967040 }
  0x9d   :  { %5195 = dma.done.wait [#allocation6], 2064  }
  0x9e   :  { %5196 = vsyncadd [#allocation6], 4294965232 }
  0x9f   :  { %5197 = dma.done.wait [#allocation9], 32  }
  0xa0   :  { %5198 = vsyncadd [#allocation9], 4294967264 }
  0xa1   :  { %5199 = dma.done.wait [#allocation12], 32  }
  0xa2   :  { %5200 = vsyncadd [#allocation12], 4294967264 }
  0xa3   :  { %5201 = dma.done.wait [#allocation15], 512  }
  0xa4   :  { %5202 = vsyncadd [#allocation15], 4294966784  ;;  %v5235_v0 = vmov 0.0|0.0   ;;  %vm5236_vm0 = vmmov 0   ;;  %v5237_v1 = vmov 0.0   ;;  %v160_v2 = vld [vmem:[#allocation5] sm:$0xff] }
  0xa5   :  { %4357 = vmatprep.subr.bf16.mxu0 %v5235_v0  ;;  %4182 = vmatprep.mubr.msk.f32.mxu0 %vm5236_vm0, %v5237_v1  ;;  %v161_v3 = vld [vmem:[#allocation5 + $0x8] sm:$0xff]  ;;  %v162_v4 = vld [vmem:[#allocation5 + $0x10] sm:$0xff]  ;;  %v163_v6 = vld [vmem:[#allocation5 + $0x18] sm:$0xff]  ;;  %s6280_s30 = sld [smem:[#allocation23_spill]]  ;;  %vm373_vm1 = vcmask 392192   ;;  %s5239_s7 = smov 32  }
  0xa6   :  { %4381 = vmatprep.subr.bf16.mxu1 %v5235_v0  ;;  %4217 = vmatprep.mubr.msk.f32.mxu1 %vm5236_vm0, %v5237_v1  ;;  %v4358_v5 = vpack.c.bf16 %v161_v3, %v160_v2  ;;  %v4361_v7 = vpack.c.bf16 %v163_v6, %v162_v4  ;;  %v164_v8 = vld [vmem:[#allocation5 + $0x20] sm:$0xff]  ;;  %v165_v9 = vld [vmem:[#allocation5 + $0x28] sm:$0xff]  ;;  %v259_v10 = vld [vmem:[%s6255_s4] sm:$0xff]  ;;  %s5240_s29 = smov 64   ;;  %vm474_vm4 = vcmask 261120   ;;  %vm470_vm5 = vcmask 1041408  }
  0xa7   :  { %v260_v11 = vld [vmem:[%s6255_s4 + $0x8] sm:$0xff]  ;;  %v261_v12 = vld [vmem:[%s6255_s4 + $0x10] sm:$0xff]  ;;  %v262_v13 = vld [vmem:[%s6255_s4 + $0x18] sm:$0xff]  ;;  %v4364_v14 = vpack.c.bf16 %v165_v9, %v164_v8  ;;  %vm468_vm6 = vcmask 1040384   ;;  %vm472_vm7 = vcmask 1042432   ;;  %vm479_vm8 = vcmask 257024  }
  0xa8   :  { %4359 = vmatpush3.bf16.msra.mxu0 %v4358_v5  ;;  %v4382_v15 = vpack.c.bf16 %v260_v11, %v259_v10  ;;  %v166_v16 = vld [vmem:[#allocation5 + $0x30] sm:$0xff]  ;;  %v167_v17 = vld [vmem:[#allocation5 + $0x38] sm:$0xff]  ;;  %v4385_v18 = vpack.c.bf16 %v262_v13, %v261_v12  ;;  %v168_v22 = vld [vmem:[#allocation5 + $0x40] sm:$0xff]  ;;  %vm608_vm10 = vcmask 31744   ;;  %s5243_s28 = smov 1e-30  }
  0xa9   :  { %4360 = vmatprep.subr.bf16.mxu0 %v5235_v0  ;;  %v263_v19 = vld [vmem:[%s6255_s4 + $0x20] sm:$0xff]  ;;  %v264_v20 = vld [vmem:[%s6255_s4 + $0x28] sm:$0xff]  ;;  %v4367_v21 = vpack.c.bf16 %v167_v17, %v166_v16  ;;  %v169_v23 = vld [vmem:[#allocation5 + $0x48] sm:$0xff]  ;;  %s5244_s0 = smov 4   ;;  %vm862_vm11 = vcmask 64512   ;;  %vm869_vm12 = vcmask 130048  }
  0xaa   :  { %4383 = vmatpush3.bf16.msra.mxu1 %v4382_v15  ;;  %v4388_v24 = vpack.c.bf16 %v264_v20, %v263_v19  ;;  %v4370_v25 = vpack.c.bf16 %v169_v23, %v168_v22  ;;  %v170_v26 = vld [vmem:[#allocation5 + $0x50] sm:$0xff]  ;;  %v171_v27 = vld [vmem:[#allocation5 + $0x58] sm:$0xff]  ;;  %v172_v29 = vld [vmem:[#allocation5 + $0x60] sm:$0xff]  ;;  %vm879_vm13 = vcmask 1043456  }
  0xab   :  { %4384 = vmatprep.subr.bf16.mxu1 %v5235_v0  ;;  %v4373_v28 = vpack.c.bf16 %v171_v27, %v170_v26  ;;  %v173_v30 = vld [vmem:[#allocation5 + $0x68] sm:$0xff]  ;;  %v174_v32 = vld [vmem:[#allocation5 + $0x70] sm:$0xff]  ;;  %v175_v33 = vld [vmem:[#allocation5 + $0x78] sm:$0xff] }
  0xac   :  { %4362 = vmatpush3.bf16.msra.mxu0 %v4361_v7  ;;  %v4376_v31 = vpack.c.bf16 %v173_v30, %v172_v29  ;;  %v4379_v34 = vpack.c.bf16 %v175_v33, %v174_v32  ;;  %v159_v35 = vld [vmem:[%s6280_s30] sm:$0x3]  ;;  %v265_v36 = vld [vmem:[%s6255_s4 + $0x30] sm:$0xff]  ;;  %v266_v37 = vld [vmem:[%s6255_s4 + $0x38] sm:$0xff]  ;;  %s5245_s30 = smov 16  }
  0xad   :  { %4363 = vmatprep.subr.bf16.mxu0 %v5235_v0  ;;  %v4391_v38 = vpack.c.bf16 %v266_v37, %v265_v36  ;;  %v267_v39 = vld [vmem:[%s6255_s4 + $0x40] sm:$0xff]  ;;  %v268_v40 = vld [vmem:[%s6255_s4 + $0x48] sm:$0xff]  ;;  %v269_v42 = vld [vmem:[%s6255_s4 + $0x50] sm:$0xff] }
  0xae   :  { %4386 = vmatpush3.bf16.msra.mxu1 %v4385_v18  ;;  %v4394_v41 = vpack.c.bf16 %v268_v40, %v267_v39  ;;  %v270_v43 = vld [vmem:[%s6255_s4 + $0x58] sm:$0xff]  ;;  %v271_v44 = vld [vmem:[%s6255_s4 + $0x60] sm:$0xff]  ;;  %v272_v46 = vld [vmem:[%s6255_s4 + $0x68] sm:$0xff] }
  0xaf   :  { %4387 = vmatprep.subr.bf16.mxu1 %v5235_v0  ;;  %v4397_v45 = vpack.c.bf16 %v270_v43, %v269_v42  ;;  %v4400_v47 = vpack.c.bf16 %v272_v46, %v271_v44  ;;  %v273_v48 = vld [vmem:[%s6255_s4 + $0x70] sm:$0xff]  ;;  %v274_v49 = vld [vmem:[%s6255_s4 + $0x78] sm:$0xff]  ;;  %v360_v51 = vld [vmem:[%s6257_s6] sm:$0xff] }
  0xb0   :  { %4365 = vmatpush3.bf16.msra.mxu0 %v4364_v14  ;;  %v4403_v50 = vpack.c.bf16 %v274_v49, %v273_v48  ;;  %v361_v52 = vld [vmem:[%s6257_s6 + $0x8] sm:$0xff]  ;;  %v362_v53 = vld [vmem:[%s6257_s6 + $0x10] sm:$0xff]  ;;  %v363_v55 = vld [vmem:[%s6257_s6 + $0x18] sm:$0xff] }
  0xb1   :  { %4366 = vmatprep.subr.bf16.mxu0 %v5235_v0  ;;  %v4405_v54 = vpack.c.bf16 %v361_v52, %v360_v51  ;;  %v4409_v56 = vpack.c.bf16 %v363_v55, %v362_v53  ;;  %v364_v57 = vld [vmem:[%s6257_s6 + $0x20] sm:$0xff]  ;;  %v365_v58 = vld [vmem:[%s6257_s6 + $0x28] sm:$0xff]  ;;  %v3998_v62 = vld [vmem:[#allocation7] ss:$0 sm:$0xff]  ;;  %s5238_s6 = smov 96  }
  0xb2   :  { %4389 = vmatpush3.bf16.msra.mxu1 %v4388_v24  ;;  %v358_v59 = vld [vmem:[#allocation2] sm:$0xff]  ;;  %v4413_v60 = vpack.c.bf16 %v365_v58, %v364_v57  ;;  %v359_v61 = vld [vmem:[#allocation2 + $0x8] sm:$0xff]  ;;  %v4002_v10 = vld [vmem:[#allocation10] ss:$0 sm:$0xff] }
  0xb3   :  { %4390 = vmatprep.subr.bf16.mxu1 %v5235_v0  ;;  %v4000_v13 = vld [vmem:[#allocation8] ss:$0 sm:$0xff] }
  0xb4   :  { %4368 = vmatpush3.bf16.msra.mxu0 %v4367_v21 }
  0xb5   :  { %4369 = vmatprep.subr.bf16.mxu0 %v5235_v0 }
  0xb6   :  { %4392 = vmatpush3.bf16.msra.mxu1 %v4391_v38 }
  0xb7   :  { %4393 = vmatprep.subr.bf16.mxu1 %v5235_v0 }
  0xb8   :  { %4371 = vmatpush3.bf16.msra.mxu0 %v4370_v25 }
  0xb9   :  { %4372 = vmatprep.subr.bf16.mxu0 %v5235_v0 }
  0xba   :  { %4395 = vmatpush3.bf16.msra.mxu1 %v4394_v41 }
  0xbb   :  { %4396 = vmatprep.subr.bf16.mxu1 %v5235_v0 }
  0xbc   :  { %4374 = vmatpush3.bf16.msra.mxu0 %v4373_v28 }
  0xbd   :  { %4375 = vmatprep.subr.bf16.mxu0 %v5235_v0 }
  0xbe   :  { %4398 = vmatpush3.bf16.msra.mxu1 %v4397_v45 }
  0xbf   :  { %4399 = vmatprep.subr.bf16.mxu1 %v5235_v0 }
  0xc0   :  { %4377 = vmatpush3.bf16.msra.mxu0 %v4376_v31 }
  0xc1   :  { %4378 = vmatprep.subr.bf16.mxu0 %v5235_v0 }
  0xc2   :  { %4401 = vmatpush3.bf16.msra.mxu1 %v4400_v47 }
  0xc3   :  { %4402 = vmatprep.subr.bf16.mxu1 %v5235_v0 }
  0xc4   :  { %4380 = vmatpush3.bf16.msra.mxu0 %v4379_v34 }
  0xc5   :  { %4406 = vmatprep.subr.bf16.mxu0 %v4405_v54 }
  0xc6   :  { %4404 = vmatpush3.bf16.msra.mxu1 %v4403_v50 }
  0xc7   :  { %4183 = vmatmul.mubr.f32.vlgmr.msra.gmra.mrb[0].mxu0 %v159_v35  ;;  %4235 = vmatprep.subr.mxu1 %v5237_v1 }
  0xc8   :  { %4232 = vmatprep.mubr.msk.f32.mxu0 %vm373_vm1, %v358_v59  ;;  %4408 = vmatpush3.bf16.msra.mxu0 %v4405_v54  ;;  %v600_v59 = vlaneseq }
  0xc9   :  { %4410 = vmatprep.subr.bf16.mxu0 %v4409_v56 }
  0xcc   :  { %4412 = vmatpush3.bf16.msra.mxu0 %v4409_v56 }
  0xcd   :  { %4414 = vmatprep.subr.bf16.mxu0 %v4413_v60 }
  0xd0   :  { %4416 = vmatpush3.bf16.msra.mxu0 %v4413_v60  ;;  %v886_v60 = vand.u32 127, %v600_v59 }
  0xd2   :  { %vm893_vm9 = vcmp.lt.s32.totalorder %v886_v60, 8 }
  0xd3   :  { %4233 = vmatmul.mubr.msk.f32.vlgmr.msra.gmra.mrb[2].mxu0 %vm373_vm1, %v359_v61  ;;  %v5241_v61 = vmov 0.17677669  }
 0x19a   :  { %v249_v63 = vpop.f32.mrb[0].mxu0 }
 0x19b   :  { %v250_v2 = vadd.f32 %v3998_v62, %v249_v63  ;;  %v4184_v3 = vpop.f32.mrb[1].mxu0  ;;  %v5604_v62 = vsel %vm893_vm9, 0.31498027, %v5241_v61  ;;  %v5242_v63 = vmov 0.125  }
 0x19d   :  { %v254_v4 = vmin.f32 %v250_v2, 0.0  ;;  %vm253_vm2 = vcmp.gt.f32.partialorder %v250_v2, 0.0 }
 0x19f   :  { %v255_v5 = vmul.f32 1.442695, %v254_v4 }
 0x1a1   :  { %4569 = vpow2.f32 %v255_v5 }
 0x1a6   :  { %v4234_v9 = vpop.f32.mrb[2].mxu0 }
 0x1a7   :  { %v5569_v11 = vadd.f32 %v4234_v9, %v4002_v10  ;;  %v446_v12 = vpop.f32.mrb[3].mxu0  ;;  %v5608_v9 = vshrl.u32 %v600_v59, 7 }
 0x1a8   :  { %v5573_v25 = vadd.f32 %v4002_v10, %v446_v12 }
 0x1a9   :  { %v642_v42 = vsel %vm474_vm4, %v5569_v11, inf  ;;  %v5611_v12 = vsub.s32 0, %v5608_v9 }
 0x1aa   :  { %v475_v26 = vsel %vm474_vm4, %v5573_v25, inf }
 0x1ab   :  { %v4570_v6 = vpop.eup %4569 }
 0x1ac   :  { %v3999_v7 = vadd.f32 -1.0, %v4570_v6 }
 0x1ae   :  { %v258_v8 = vsel %vm253_vm2, %v250_v2, %v3999_v7  ;;  %v5606_v2 = vsel %vm893_vm9, 0.25, %v5242_v63  }
 0x1af   :  { %4218 = vmatmul.mubr.f32.vlgmr.msra.gmra.mrb[0].mxu1 %v258_v8 }
 0x1b0   :  { %4237 = vmatprep.mubr.msk.f32.mxu1 %vm5236_vm0, %v5237_v1 }
 0x282   :  { %v348_v14 = vpop.f32.mrb[0].mxu1 }
 0x283   :  { %v349_v15 = vadd.f32 %v4000_v13, %v348_v14  ;;  %v4219_v16 = vpop.f32.mrb[1].mxu1 }
 0x285   :  { %v353_v17 = vmin.f32 %v349_v15, 0.0  ;;  %vm352_vm3 = vcmp.gt.f32.partialorder %v349_v15, 0.0 }
 0x287   :  { %v354_v18 = vmul.f32 1.442695, %v353_v17 }
 0x289   :  { %4571 = vpow2.f32 %v354_v18 }
 0x293   :  { %v4572_v19 = vpop.eup %4571 }
 0x294   :  { %v4001_v20 = vadd.f32 -1.0, %v4572_v19 }
 0x296   :  { %v357_v21 = vsel %vm352_vm3, %v349_v15, %v4001_v20 }
 0x297   :  { %630 = vrot.lane.b32.xlu1 %v357_v21, %s5238_s6  ;;  %v456_v22 = vrot.slane %v357_v21, 7  ;;  %v464_v23 = vrot.slane %v357_v21, 5  ;;  %v460_v24 = vrot.slane %v357_v21, 6  ;;  %v628_v33 = vrot.slane %v357_v21, 1 }
 0x299   :  { %457 = vrot.lane.b32.xlu0 %v456_v22, %s5238_s6 }
 0x29b   :  { %465 = vrot.lane.b32.xlu1 %v464_v23, %s5239_s7 }
 0x29d   :  { %461 = vrot.lane.b32.xlu0 %v460_v24, %s5240_s29 }
 0x29f   :  { %636 = vrot.lane.b32.xlu1 %v460_v24, %s5239_s7 }
 0x2a1   :  { %633 = vrot.lane.b32.xlu0 %v456_v22, %s5240_s29 }
 0x2c3   :  { %476 = vmin.xlane.f32.xlu1 %v475_v26 }
 0x309   :  { %v631_v27 = vpop.permute.xlu1 %630 }
 0x30a   :  { %v639_v36 = vsel %vm468_vm6, %v628_v33, %v631_v27 }
 0x30b   :  { %v458_v28 = vpop.permute.xlu0 %457 }
 0x30c   :  { %v469_v30 = vsel %vm468_vm6, %v357_v21, %v458_v28 }
 0x30d   :  { %v466_v29 = vpop.permute.xlu1 %465 }
 0x30f   :  { %v462_v31 = vpop.permute.xlu0 %461 }
 0x310   :  { %v471_v32 = vsel %vm470_vm5, %v469_v30, %v462_v31 }
 0x311   :  { %v5578_v34 = vsel %vm472_vm7, %v471_v32, %v466_v29  ;;  %v637_v38 = vpop.permute.xlu1 %636 }
 0x312   :  { %v480_v35 = vsel %vm479_vm8, %v5578_v34, inf }
 0x313   :  { %481 = vmin.xlane.f32.xlu0 %v480_v35  ;;  %v634_v37 = vpop.permute.xlu0 %633 }
 0x314   :  { %v640_v39 = vsel %vm470_vm5, %v639_v36, %v634_v37 }
 0x315   :  { %v5583_v40 = vsel %vm472_vm7, %v640_v39, %v637_v38 }
 0x316   :  { %v646_v41 = vsel %vm479_vm8, %v5583_v40, inf }
 0x317   :  { %647 = vmin.xlane.f32.xlu0 %v646_v41 }
 0x31b   :  { %643 = vmin.xlane.f32.xlu0 %v642_v42 }
 0x350   :  { %v477_v43 = vpop.xlane.xlu1 %476 }
 0x351   :  { %v478_v45 = vsub.f32 %v5573_v25, %v477_v43 }
 0x353   :  { %v484_v51 = vmul.f32 %v478_v45, %v478_v45 }
 0x355   :  { %v485_v56 = vsel %vm474_vm4, %v484_v51, 0.0 }
 0x3a0   :  { %v482_v44 = vpop.xlane.xlu0 %481 }
 0x3a1   :  { %v483_v46 = vsub.f32 %v5578_v34, %v482_v44 }
 0x3a3   :  { %4236 = vmatpush3.xpose.msk.msra.mxu1 %vm474_vm4, %v483_v46  ;;  %v488_v47 = vmul.f32 %v483_v46, %v483_v46 }
 0x3a4   :  { %v648_v48 = vpop.xlane.xlu0 %647  ;;  %4240 = vmatprep.subr.mxu1 %v5237_v1 }
 0x3a5   :  { %v649_v49 = vsub.f32 %v5583_v40, %v648_v48  ;;  %v489_v50 = vsel %vm479_vm8, %v488_v47, 0.0 }
 0x3a6   :  { %490 = vadd.xlane.f32.xlu1 %v489_v50  ;;  %4238 = vmatmul.mubr.msk.f32.vlgmr.msra.gmra.mrb[2].mxu1 %vm474_vm4, %v478_v45 }
 0x3a7   :  { %4241 = vmatpush3.xpose.msk.msra.mxu1 %vm474_vm4, %v649_v49  ;;  %v654_v52 = vmul.f32 %v649_v49, %v649_v49  ;;  %4242 = vmatprep.mubr.msk.f32.mxu1 %vm5236_vm0, %v5237_v1 }
 0x3a8   :  { %v644_v53 = vpop.xlane.xlu0 %643 }
 0x3a9   :  { %v645_v54 = vsub.f32 %v5569_v11, %v644_v53  ;;  %v655_v55 = vsel %vm479_vm8, %v654_v52, 0.0 }
 0x3aa   :  { %656 = vadd.xlane.f32.xlu0 %v655_v55  ;;  %486 = vadd.xlane.f32.xlu1 %v485_v56 }
 0x3ab   :  { %4243 = vmatmul.mubr.msk.f32.vlgmr.msra.gmra.mrb[4].mxu1 %vm474_vm4, %v645_v54  ;;  %v650_v57 = vmul.f32 %v645_v54, %v645_v54 }
 0x3ad   :  { %v651_v58 = vsel %vm474_vm4, %v650_v57, 0.0 }
 0x3ae   :  { %652 = vadd.xlane.f32.xlu0 %v651_v58 }
 0x433   :  { %v491_v3 = vpop.xlane.xlu1 %490 }
 0x434   :  { %568 = vxpose.xlu1.b32.start.end [1/1] (short) (narrow) %v491_v3, 8 }
 0x437   :  { %v657_v4 = vpop.xlane.xlu0 %656  ;;  %v487_v10 = vpop.xlane.xlu1 %486 }
 0x438   :  { %734 = vxpose.xlu0.b32.start.end [1/1] (short) (narrow) %v657_v4, 8 }
 0x43b   :  { %v653_v13 = vpop.xlane.xlu0 %652 }
 0x479   :  { %v564_v5 = vpop.f32.mrb[2].mxu1 }
 0x47a   :  { %v4239_v6 = vpop.f32.mrb[3].mxu1  ;;  %v605_v16 = vmul.f32 2.0, %v564_v5 }
 0x47e   :  { %v730_v7 = vpop.f32.mrb[4].mxu1 }
 0x47f   :  { %v4244_v8 = vpop.f32.mrb[5].mxu1  ;;  %v771_v21 = vmul.f32 2.0, %v730_v7 }
 0x4b4   :  { %v584_v14 = vpop.trf.xlu1 }
 0x4b5   :  { %v603_v15 = vrot.slane %v584_v14, %v5611_v12 }
 0x4b7   :  { %v604_v17 = vadd.f32 %v603_v15, %v487_v10  ;;  %v5642_v15 = vmov 0.25  }
 0x4b8   :  { %v750_v18 = vpop.trf.xlu0 }
 0x4b9   :  { %v769_v19 = vrot.slane %v750_v18, %v5611_v12  ;;  %v606_v20 = vsub.f32 %v604_v17, %v605_v16  ;;  %v5644_v16 = vmov 0.125   ;;  %v5646_v17 = vmov 0.125  }
 0x4bb   :  { %v770_v22 = vadd.f32 %v769_v19, %v653_v13  ;;  %v607_v23 = vmax.f32 %v606_v20, 0.0 }
 0x4bd   :  { %v609_v24 = vsel %vm608_vm10, %v607_v23, -inf  ;;  %v772_v26 = vsub.f32 %v770_v22, %v771_v21 }
 0x4be   :  { %610 = vmax.xlane.f32.xlu0 %v609_v24 }
 0x4bf   :  { %v773_v27 = vmax.f32 %v772_v26, 0.0 }
 0x4c1   :  { %v774_v28 = vsel %vm608_vm10, %v773_v27, -inf }
 0x4c2   :  { %775 = vmax.xlane.f32.xlu1 %v774_v28 }
 0x54b   :  { %v611_v29 = vpop.xlane.xlu0 %610 }
 0x54c   :  { %v612_v30 = vrot.slane %v611_v29, 4 }
 0x54e   :  { %v613_v31 = vmax.f32 %v611_v29, %v612_v30 }
 0x54f   :  { %v776_v32 = vpop.xlane.xlu1 %775 }
 0x550   :  { %v614_v33 = vrot.slane %v613_v31, 2  ;;  %v777_v35 = vrot.slane %v776_v32, 4 }
 0x552   :  { %v778_v36 = vmax.f32 %v776_v32, %v777_v35  ;;  %v615_v37 = vmax.f32 %v613_v31, %v614_v33 }
 0x554   :  { %v779_v38 = vrot.slane %v778_v36, 2  ;;  %v616_v39 = vrot.slane %v615_v37, 1 }
 0x556   :  { %v617_v41 = vmax.f32 %v615_v37, %v616_v39  ;;  %v780_v42 = vmax.f32 %v778_v36, %v779_v38 }
 0x558   :  { %4481 = vpush %v617_v41  ;;  %v781_v43 = vrot.slane %v780_v42, 1 }
 0x55a   :  { %v782_v44 = vmax.f32 %v780_v42, %v781_v43 }
 0x55c   :  { %4483 = vpush %v782_v44 }
 0x589   :  { %s4482_s24 = spop %4481 }
 0x58a   :  { %s619_s3 = smax.f32 %s5243_s28, %s4482_s24 }
 0x58b   :  { %v620_v45 = vstv %s619_s3 }
 0x58c   :  { %4573 = vrcp.f32 %v620_v45 }
 0x58d   :  { %s4484_s1 = spop %4483 }
 0x58e   :  { %s784_s20 = smax.f32 %s5243_s28, %s4484_s1 }
 0x58f   :  { %v785_v46 = vstv %s784_s20 }
 0x590   :  { %4575 = vrcp.f32 %v785_v46 }
 0x596   :  { %v4574_v47 = vpop.eup %4573 }
 0x597   :  { %v622_v48 = vmul.f32 %v4574_v47, %v607_v23 }
 0x599   :  { %v623_v49 = vsub.f32 0.0, %v622_v48 }
 0x59a   :  { %v4576_v50 = vpop.eup %4575 }
 0x59b   :  { %v625_v51 = vmul.f32 10.0, %v623_v49  ;;  %v787_v52 = vmul.f32 %v4576_v50, %v773_v27 }
 0x59d   :  { %v626_v53 = vmul.f32 1.442695, %v625_v51  ;;  %v788_v54 = vsub.f32 0.0, %v787_v52 }
 0x59f   :  { %4577 = vpow2.f32 %v626_v53  ;;  %v789_v55 = vmul.f32 10.0, %v788_v54 }
 0x5a1   :  { %v790_v56 = vmul.f32 1.442695, %v789_v55 }
 0x5a3   :  { %4579 = vpow2.f32 %v790_v56 }
 0x5a9   :  { %v5617_v57 = vpop.eup %4577 }
 0x5aa   :  { %v5621_v58 = vsel %vm608_vm10, %v5617_v57, 0.0  ;;  %792 = vxpose.xlu1.b32.start.end [1/1] (short) (narrow) %v5617_v57, 8 }
 0x5ad   :  { %v5624_v59 = vpop.eup %4579 }
 0x5ae   :  { %824 = vxpose.xlu0.b32.start.end [1/1] (short) (narrow) %v5624_v59, 8 }
 0x5d7   :  { %858 = vrot.lane.b32.xlu0 %v5624_v59, %s5244_s0 }
 0x62a   :  { %v808_v60 = vpop.trf.xlu1 }
 0x62b   :  { %865 = vrot.lane.b32.xlu1 %v808_v60, %s5228_s26  ;;  %s5648_s26 = smov 0  }
 0x62e   :  { %v840_v61 = vpop.trf.xlu0 }
 0x62f   :  { %872 = vrot.lane.b32.xlu1 %v840_v61, %s5245_s30 }
 0x649   :  { %v859_v63 = vpop.permute.xlu0 %858 }
 0x64a   :  { %v861_v3 = vsel %vm608_vm10, 0.0, %v859_v63 }
 0x64b   :  { %v5631_v4 = vsel %vm862_vm11, %v861_v3, 0.0 }
 0x69d   :  { %v866_v5 = vpop.permute.xlu1 %865 }
 0x69e   :  { %v868_v6 = vsel %vm862_vm11, 0.0, %v866_v5 }
 0x69f   :  { %v870_v13 = vsel %vm869_vm12, %v868_v6, 0.0 }
 0x6a1   :  { %v873_v7 = vpop.permute.xlu1 %872 }
 0x6a2   :  { %v875_v8 = vsel %vm869_vm12, 0.0, %v873_v7 }
 0x6a3   :  { %v877_v10 = vrot.slane %v875_v8, 4 }
 0x6a5   :  { %v5637_v14 = vsel %vm879_vm13, %v870_v13, %v877_v10 }
 0x6a6 LB: > { %vm915_vm14 = vcmask 195584   ;;  %v912_v18 = vmul.f32 %v5207_v2, %v5621_v58  ;;  %v913_v19 = vmul.f32 %v5207_v2, %v5631_v4  ;;  %v914_v20 = vmul.f32 %v5207_v2, %v5637_v14  ;;  %s5246_s9 = smov 1.0   ;;  %s2061_s26 = sadd.s32 20, %s5223_s26   ;;  %s5223_s26 = sphi %s5648_s26, %s2061_s26   ;;  %v5219_v17 = vphi %v5646_v17, %v6284_v17   ;;  %v5215_v16 = vphi %v5644_v16, %v6283_v16   ;;  %v5211_v15 = vphi %v5642_v15, %v6282_v15   ;;  %v5207_v2 = vphi %v5606_v2, %v6281_v2  }
 0x6a7   : > { %p906_p8 = scmp.lt.s32.totalorder %s2061_s26, 1000 }
 0x6a8   : > { %v916_v21 = vsel %vm915_vm14, %v912_v18, 0.0  ;;  %v922_v22 = vsel %vm915_vm14, %v914_v20, 0.0  ;;  %v919_v23 = vsel %vm915_vm14, %v913_v19, 0.0 }
 0x6a9   : > { %917 = vadd.xlane.f32.xlu0 %v916_v21  ;;  %923 = vadd.xlane.f32.xlu1 %v922_v22 }
 0x6ad   : > { %920 = vadd.xlane.f32.xlu0 %v919_v23 }
 0x736   : > { %v918_v24 = vpop.xlane.xlu0 %917  ;;  %v924_v26 = vpop.xlane.xlu1 %923 }
 0x737   : > { %v925_v27 = vmax.f32 %v918_v24, 1e-30  ;;  %v927_v28 = vmax.f32 %v924_v26, 1e-30 }
 0x739   : > { %4581 = vlog2.f32 %v925_v27 }
 0x73a   : > { %v921_v29 = vpop.xlane.xlu0 %920  ;;  %4583 = vlog2.f32 %v927_v28 }
 0x73b   : > { %v926_v30 = vmax.f32 %v921_v29, 1e-30 }
 0x73d   : > { %4585 = vlog2.f32 %v926_v30 }
 0x743   : > { %v4582_v31 = vpop.eup %4581 }
 0x744   : > { %v4584_v32 = vpop.eup %4583  ;;  %v929_v33 = vmul.f32 0.6931472, %v4582_v31 }
 0x745   : > { %v933_v35 = vmul.f32 0.6931472, %v4584_v32 }
 0x746   : > { %v934_v36 = vmul.f32 -0.8333333, %v929_v33 }
 0x747   : > { %v4586_v37 = vpop.eup %4585  ;;  %v936_v38 = vmul.f32 -0.8333333, %v933_v35 }
 0x748   : > { %v937_v39 = vmul.f32 1.442695, %v934_v36  ;;  %v931_v41 = vmul.f32 0.6931472, %v4586_v37 }
 0x749   : > { %v941_v42 = vmul.f32 1.442695, %v936_v38 }
 0x74a   : > { %4587 = vpow2.f32 %v937_v39  ;;  %v935_v43 = vmul.f32 -0.8333333, %v931_v41 }
 0x74b   : > { %4589 = vpow2.f32 %v941_v42 }
 0x74c   : > { %v939_v44 = vmul.f32 1.442695, %v935_v43 }
 0x74e   : > { %4591 = vpow2.f32 %v939_v44 }
 0x754   : > { %v4588_v45 = vpop.eup %4587 }
 0x755   : > { %v4590_v46 = vpop.eup %4589  ;;  %v943_v47 = vmul.f32 0.17677669, %v4588_v45 }
 0x756   : > { %v945_v48 = vmul.f32 0.31498027, %v4590_v46 }
 0x757   : > { %v946_v50 = vmul.f32 %v943_v47, %v5621_v58 }
 0x758   : > { %v4592_v49 = vpop.eup %4591  ;;  %v948_v52 = vmul.f32 %v945_v48, %v5637_v14 }
 0x759   : > { %v944_v51 = vmul.f32 0.17677669, %v4592_v49  ;;  %v949_v54 = vsel %vm915_vm14, %v946_v50, 0.0 }
 0x75a   : > { %v952_v56 = vsel %vm915_vm14, %v948_v52, 0.0 }
 0x75b   : > { %v947_v53 = vmul.f32 %v944_v51, %v5631_v4 }
 0x75d   : > { %v950_v55 = vsel %vm915_vm14, %v947_v53, 0.0 }
 0x75e   : > { %v951_v60 = vadd.f32 %v950_v55, %v949_v54 }
 0x760   : > { %v953_v61 = vadd.f32 %v952_v56, %v951_v60 }
 0x762   : > { %v954_v63 = vrot.slane %v953_v61, 4 }
 0x764   : > { %v955_v3 = vadd.f32 %v954_v63, %v953_v61 }
 0x766   : > { %v956_v5 = vrot.slane %v955_v3, 2 }
 0x768   : > { %v957_v6 = vadd.f32 %v956_v5, %v955_v3 }
 0x76a   : > { %v958_v7 = vrot.slane %v957_v6, 1 }
 0x76c   : > { %v959_v8 = vadd.f32 %v958_v7, %v957_v6 }
 0x76e   : > { %v960_v10 = vmax.f32 %v959_v8, 1e-30 }
 0x770   : > { %4593 = vlog2.f32 %v960_v10 }
 0x77a   : > { %v4594_v13 = vpop.eup %4593 }
 0x77b   : > { %v962_v18 = vmul.f32 0.6931472, %v4594_v13 }
 0x77d   : > { %v963_v19 = vmul.f32 -0.8333333, %v962_v18 }
 0x77f   : > { %v964_v20 = vmul.f32 1.442695, %v963_v19 }
 0x781   : > { %4595 = vpow2.f32 %v964_v20 }
 0x78b   : > { %v4596_v21 = vpop.eup %4595 }
 0x78c   : > { %v966_v22 = vmul.f32 %v4596_v21, %v5604_v62 }
 0x78e   : > { %v968_v23 = vmul.f32 %v966_v22, %v5631_v4  ;;  %v967_v24 = vmul.f32 %v966_v22, %v5621_v58  ;;  %v969_v28 = vmul.f32 %v966_v22, %v5637_v14 }
 0x790   : > { %v973_v26 = vsel %vm915_vm14, %v968_v23, 0.0  ;;  %v970_v27 = vsel %vm915_vm14, %v967_v24, 0.0  ;;  %v976_v29 = vsel %vm915_vm14, %v969_v28, 0.0 }
 0x791   : > { %974 = vadd.xlane.f32.xlu0 %v973_v26  ;;  %971 = vadd.xlane.f32.xlu1 %v970_v27 }
 0x795   : > { %977 = vadd.xlane.f32.xlu1 %v976_v29 }
 0x81e   : > { %v975_v30 = vpop.xlane.xlu0 %974  ;;  %v972_v31 = vpop.xlane.xlu1 %971 }
 0x81f   : > { %v980_v32 = vmax.f32 %v975_v30, 1e-30  ;;  %v979_v33 = vmax.f32 %v972_v31, 1e-30 }
 0x821   : > { %4597 = vlog2.f32 %v980_v32 }
 0x822   : > { %4599 = vlog2.f32 %v979_v33  ;;  %v978_v35 = vpop.xlane.xlu1 %977 }
 0x823   : > { %v981_v36 = vmax.f32 %v978_v35, 1e-30 }
 0x825   : > { %4601 = vlog2.f32 %v981_v36 }
 0x82b   : > { %v4598_v37 = vpop.eup %4597 }
 0x82c   : > { %v4600_v38 = vpop.eup %4599  ;;  %v985_v39 = vmul.f32 0.6931472, %v4598_v37 }
 0x82d   : > { %v983_v41 = vmul.f32 0.6931472, %v4600_v38 }
 0x82e   : > { %v989_v42 = vmul.f32 -0.8333333, %v985_v39 }
 0x82f   : > { %v4602_v43 = vpop.eup %4601  ;;  %v988_v44 = vmul.f32 -0.8333333, %v983_v41 }
 0x830   : > { %v993_v45 = vmul.f32 1.442695, %v989_v42  ;;  %v987_v46 = vmul.f32 0.6931472, %v4602_v43 }
 0x831   : > { %v991_v47 = vmul.f32 1.442695, %v988_v44 }
 0x832   : > { %4603 = vpow2.f32 %v993_v45  ;;  %v990_v48 = vmul.f32 -0.8333333, %v987_v46 }
 0x833   : > { %4605 = vpow2.f32 %v991_v47 }
 0x834   : > { %v995_v49 = vmul.f32 1.442695, %v990_v48 }
 0x836   : > { %4607 = vpow2.f32 %v995_v49 }
 0x83c   : > { %v4604_v50 = vpop.eup %4603 }
 0x83d   : > { %v4606_v51 = vpop.eup %4605  ;;  %v998_v52 = vmul.f32 0.17677669, %v4604_v50 }
 0x83e   : > { %v997_v53 = vmul.f32 0.17677669, %v4606_v51 }
 0x83f   : > { %v1001_v54 = vmul.f32 %v998_v52, %v5631_v4 }
 0x840   : > { %v4608_v55 = vpop.eup %4607  ;;  %v1000_v56 = vmul.f32 %v997_v53, %v5621_v58 }
 0x841   : > { %v1004_v60 = vsel %vm915_vm14, %v1001_v54, 0.0  ;;  %v999_v61 = vmul.f32 0.31498027, %v4608_v55 }
 0x842   : > { %v1003_v63 = vsel %vm915_vm14, %v1000_v56, 0.0 }
 0x843   : > { %v1002_v3 = vmul.f32 %v999_v61, %v5637_v14  ;;  %v1005_v5 = vadd.f32 %v1004_v60, %v1003_v63 }
 0x845   : > { %v1006_v6 = vsel %vm915_vm14, %v1002_v3, 0.0 }
 0x846   : > { %v1007_v7 = vadd.f32 %v1006_v6, %v1005_v5 }
 0x848   : > { %v1008_v8 = vrot.slane %v1007_v7, 4 }
 0x84a   : > { %v1009_v10 = vadd.f32 %v1008_v8, %v1007_v7 }
 0x84c   : > { %v1010_v13 = vrot.slane %v1009_v10, 2 }
 0x84e   : > { %v1011_v18 = vadd.f32 %v1010_v13, %v1009_v10 }
 0x850   : > { %v1012_v19 = vrot.slane %v1011_v18, 1 }
 0x852   : > { %v1013_v20 = vadd.f32 %v1012_v19, %v1011_v18 }
 0x854   : > { %v1014_v21 = vmax.f32 %v1013_v20, 1e-30 }
 0x856   : > { %4609 = vlog2.f32 %v1014_v21 }
 0x860   : > { %v4610_v22 = vpop.eup %4609 }
 0x861   : > { %v1016_v23 = vmul.f32 0.6931472, %v4610_v22 }
 0x863   : > { %v1017_v24 = vmul.f32 -0.8333333, %v1016_v23 }
 0x865   : > { %v1018_v26 = vmul.f32 1.442695, %v1017_v24 }
 0x867   : > { %4611 = vpow2.f32 %v1018_v26 }
 0x871   : > { %v4612_v27 = vpop.eup %4611 }
 0x872   : > { %v1020_v28 = vmul.f32 %v4612_v27, %v5604_v62 }
 0x874   : > { %v1022_v29 = vmul.f32 %v1020_v28, %v5631_v4  ;;  %v1021_v30 = vmul.f32 %v1020_v28, %v5621_v58  ;;  %v1023_v33 = vmul.f32 %v1020_v28, %v5637_v14 }
 0x876   : > { %v1027_v31 = vsel %vm915_vm14, %v1022_v29, 0.0  ;;  %v1024_v32 = vsel %vm915_vm14, %v1021_v30, 0.0  ;;  %v1030_v35 = vsel %vm915_vm14, %v1023_v33, 0.0 }
 0x877   : > { %1028 = vadd.xlane.f32.xlu1 %v1027_v31  ;;  %1025 = vadd.xlane.f32.xlu0 %v1024_v32 }
 0x87b   : > { %1031 = vadd.xlane.f32.xlu0 %v1030_v35 }
 0x904   : > { %v1029_v36 = vpop.xlane.xlu1 %1028  ;;  %v1026_v37 = vpop.xlane.xlu0 %1025 }
 0x905   : > { %v1034_v38 = vmax.f32 %v1029_v36, 1e-30  ;;  %v1033_v39 = vmax.f32 %v1026_v37, 1e-30 }
 0x907   : > { %4613 = vlog2.f32 %v1034_v38 }
 0x908   : > { %4615 = vlog2.f32 %v1033_v39  ;;  %v1032_v41 = vpop.xlane.xlu0 %1031 }
 0x909   : > { %v1035_v42 = vmax.f32 %v1032_v41, 1e-30 }
 0x90b   : > { %4617 = vlog2.f32 %v1035_v42 }
 0x911   : > { %v4614_v43 = vpop.eup %4613 }
 0x912   : > { %v4616_v44 = vpop.eup %4615  ;;  %v1039_v45 = vmul.f32 0.6931472, %v4614_v43 }
 0x913   : > { %v1037_v46 = vmul.f32 0.6931472, %v4616_v44 }
 0x914   : > { %v1043_v47 = vmul.f32 -0.8333333, %v1039_v45 }
 0x915   : > { %v4618_v48 = vpop.eup %4617  ;;  %v1042_v49 = vmul.f32 -0.8333333, %v1037_v46 }
 0x916   : > { %v1047_v50 = vmul.f32 1.442695, %v1043_v47  ;;  %v1041_v51 = vmul.f32 0.6931472, %v4618_v48 }
 0x917   : > { %v1045_v52 = vmul.f32 1.442695, %v1042_v49 }
 0x918   : > { %4619 = vpow2.f32 %v1047_v50  ;;  %v1044_v53 = vmul.f32 -0.8333333, %v1041_v51 }
 0x919   : > { %4621 = vpow2.f32 %v1045_v52 }
 0x91a   : > { %v1049_v54 = vmul.f32 1.442695, %v1044_v53 }
 0x91c   : > { %4623 = vpow2.f32 %v1049_v54 }
 0x922   : > { %v4620_v55 = vpop.eup %4619 }
 0x923   : > { %v4622_v56 = vpop.eup %4621  ;;  %v1052_v60 = vmul.f32 0.17677669, %v4620_v55 }
 0x924   : > { %v1051_v61 = vmul.f32 0.17677669, %v4622_v56 }
 0x925   : > { %v1055_v63 = vmul.f32 %v1052_v60, %v5631_v4 }
 0x926   : > { %v4624_v3 = vpop.eup %4623  ;;  %v1054_v5 = vmul.f32 %v1051_v61, %v5621_v58 }
 0x927   : > { %v1058_v6 = vsel %vm915_vm14, %v1055_v63, 0.0  ;;  %v1053_v7 = vmul.f32 0.31498027, %v4624_v3 }
 0x928   : > { %v1057_v8 = vsel %vm915_vm14, %v1054_v5, 0.0 }
 0x929   : > { %v1056_v10 = vmul.f32 %v1053_v7, %v5637_v14  ;;  %v1059_v13 = vadd.f32 %v1058_v6, %v1057_v8 }
 0x92b   : > { %v1060_v18 = vsel %vm915_vm14, %v1056_v10, 0.0 }
 0x92c   : > { %v1061_v19 = vadd.f32 %v1060_v18, %v1059_v13 }
 0x92e   : > { %v1062_v20 = vrot.slane %v1061_v19, 4 }
 0x930   : > { %v1063_v21 = vadd.f32 %v1062_v20, %v1061_v19 }
 0x932   : > { %v1064_v22 = vrot.slane %v1063_v21, 2 }
 0x934   : > { %v1065_v23 = vadd.f32 %v1064_v22, %v1063_v21 }
 0x936   : > { %v1066_v24 = vrot.slane %v1065_v23, 1 }
 0x938   : > { %v1067_v26 = vadd.f32 %v1066_v24, %v1065_v23 }
 0x93a   : > { %v1068_v27 = vmax.f32 %v1067_v26, 1e-30 }
 0x93c   : > { %4625 = vlog2.f32 %v1068_v27 }
 0x946   : > { %v4626_v28 = vpop.eup %4625 }
 0x947   : > { %v1070_v29 = vmul.f32 0.6931472, %v4626_v28 }
 0x949   : > { %v1071_v30 = vmul.f32 -0.8333333, %v1070_v29 }
 0x94b   : > { %v1072_v31 = vmul.f32 1.442695, %v1071_v30 }
 0x94d   : > { %4627 = vpow2.f32 %v1072_v31 }
 0x957   : > { %v4628_v32 = vpop.eup %4627 }
 0x958   : > { %v1074_v33 = vmul.f32 %v4628_v32, %v5604_v62 }
 0x95a   : > { %v1076_v35 = vmul.f32 %v1074_v33, %v5631_v4  ;;  %v1075_v36 = vmul.f32 %v1074_v33, %v5621_v58  ;;  %v1077_v39 = vmul.f32 %v1074_v33, %v5637_v14 }
 0x95c   : > { %v1081_v37 = vsel %vm915_vm14, %v1076_v35, 0.0  ;;  %v1078_v38 = vsel %vm915_vm14, %v1075_v36, 0.0  ;;  %v1084_v41 = vsel %vm915_vm14, %v1077_v39, 0.0 }
 0x95d   : > { %1082 = vadd.xlane.f32.xlu0 %v1081_v37  ;;  %1079 = vadd.xlane.f32.xlu1 %v1078_v38 }
 0x961   : > { %1085 = vadd.xlane.f32.xlu1 %v1084_v41 }
 0x9ea   : > { %v1083_v42 = vpop.xlane.xlu0 %1082  ;;  %v1080_v43 = vpop.xlane.xlu1 %1079 }
 0x9eb   : > { %v1088_v44 = vmax.f32 %v1083_v42, 1e-30  ;;  %v1087_v45 = vmax.f32 %v1080_v43, 1e-30 }
 0x9ed   : > { %4629 = vlog2.f32 %v1088_v44 }
 0x9ee   : > { %4631 = vlog2.f32 %v1087_v45  ;;  %v1086_v46 = vpop.xlane.xlu1 %1085 }
 0x9ef   : > { %v1089_v47 = vmax.f32 %v1086_v46, 1e-30 }
 0x9f1   : > { %4633 = vlog2.f32 %v1089_v47 }
 0x9f7   : > { %v4630_v48 = vpop.eup %4629 }
 0x9f8   : > { %v4632_v49 = vpop.eup %4631  ;;  %v1093_v50 = vmul.f32 0.6931472, %v4630_v48 }
 0x9f9   : > { %v1091_v51 = vmul.f32 0.6931472, %v4632_v49 }
 0x9fa   : > { %v1097_v52 = vmul.f32 -0.8333333, %v1093_v50 }
 0x9fb   : > { %v4634_v53 = vpop.eup %4633  ;;  %v1096_v54 = vmul.f32 -0.8333333, %v1091_v51 }
 0x9fc   : > { %v1101_v55 = vmul.f32 1.442695, %v1097_v52  ;;  %v1095_v56 = vmul.f32 0.6931472, %v4634_v53 }
 0x9fd   : > { %v1099_v60 = vmul.f32 1.442695, %v1096_v54 }
 0x9fe   : > { %4635 = vpow2.f32 %v1101_v55  ;;  %v1098_v61 = vmul.f32 -0.8333333, %v1095_v56 }
 0x9ff   : > { %4637 = vpow2.f32 %v1099_v60 }
 0xa00   : > { %v1103_v63 = vmul.f32 1.442695, %v1098_v61 }
 0xa02   : > { %4639 = vpow2.f32 %v1103_v63 }
 0xa08   : > { %v4636_v3 = vpop.eup %4635 }
 0xa09   : > { %v4638_v5 = vpop.eup %4637  ;;  %v1106_v6 = vmul.f32 0.17677669, %v4636_v3 }
 0xa0a   : > { %v1105_v7 = vmul.f32 0.17677669, %v4638_v5 }
 0xa0b   : > { %v1109_v8 = vmul.f32 %v1106_v6, %v5631_v4 }
 0xa0c   : > { %v4640_v10 = vpop.eup %4639  ;;  %v1108_v13 = vmul.f32 %v1105_v7, %v5621_v58 }
 0xa0d   : > { %v1112_v18 = vsel %vm915_vm14, %v1109_v8, 0.0  ;;  %v1107_v19 = vmul.f32 0.31498027, %v4640_v10 }
 0xa0e   : > { %v1111_v20 = vsel %vm915_vm14, %v1108_v13, 0.0 }
 0xa0f   : > { %v1110_v21 = vmul.f32 %v1107_v19, %v5637_v14  ;;  %v1113_v22 = vadd.f32 %v1112_v18, %v1111_v20 }
 0xa11   : > { %v1114_v23 = vsel %vm915_vm14, %v1110_v21, 0.0 }
 0xa12   : > { %v1115_v24 = vadd.f32 %v1114_v23, %v1113_v22 }
 0xa14   : > { %v1116_v26 = vrot.slane %v1115_v24, 4 }
 0xa16   : > { %v1117_v27 = vadd.f32 %v1116_v26, %v1115_v24 }
 0xa18   : > { %v1118_v28 = vrot.slane %v1117_v27, 2 }
 0xa1a   : > { %v1119_v29 = vadd.f32 %v1118_v28, %v1117_v27 }
 0xa1c   : > { %v1120_v30 = vrot.slane %v1119_v29, 1 }
 0xa1e   : > { %v1121_v31 = vadd.f32 %v1120_v30, %v1119_v29 }
 0xa20   : > { %v1122_v32 = vmax.f32 %v1121_v31, 1e-30 }
 0xa22   : > { %4641 = vlog2.f32 %v1122_v32 }
 0xa2c   : > { %v4642_v33 = vpop.eup %4641 }
 0xa2d   : > { %v1124_v35 = vmul.f32 0.6931472, %v4642_v33 }
 0xa2f   : > { %v1125_v36 = vmul.f32 -0.8333333, %v1124_v35 }
 0xa31   : > { %v1126_v37 = vmul.f32 1.442695, %v1125_v36 }
 0xa33   : > { %4643 = vpow2.f32 %v1126_v37 }
 0xa3d   : > { %v4644_v38 = vpop.eup %4643 }
 0xa3e   : > { %v1128_v39 = vmul.f32 %v4644_v38, %v5604_v62 }
 0xa40   : > { %v1130_v41 = vmul.f32 %v1128_v39, %v5631_v4  ;;  %v1129_v42 = vmul.f32 %v1128_v39, %v5621_v58  ;;  %v1131_v45 = vmul.f32 %v1128_v39, %v5637_v14 }
 0xa42   : > { %v1135_v43 = vsel %vm915_vm14, %v1130_v41, 0.0  ;;  %v1132_v44 = vsel %vm915_vm14, %v1129_v42, 0.0  ;;  %v1138_v46 = vsel %vm915_vm14, %v1131_v45, 0.0 }
 0xa43   : > { %1136 = vadd.xlane.f32.xlu1 %v1135_v43  ;;  %1133 = vadd.xlane.f32.xlu0 %v1132_v44 }
 0xa47   : > { %1139 = vadd.xlane.f32.xlu0 %v1138_v46 }
 0xad0   : > { %v1137_v47 = vpop.xlane.xlu1 %1136  ;;  %v1134_v48 = vpop.xlane.xlu0 %1133 }
 0xad1   : > { %v1142_v49 = vmax.f32 %v1137_v47, 1e-30  ;;  %v1141_v50 = vmax.f32 %v1134_v48, 1e-30 }
 0xad3   : > { %4645 = vlog2.f32 %v1142_v49 }
 0xad4   : > { %4647 = vlog2.f32 %v1141_v50  ;;  %v1140_v51 = vpop.xlane.xlu0 %1139 }
 0xad5   : > { %v1143_v52 = vmax.f32 %v1140_v51, 1e-30 }
 0xad7   : > { %4649 = vlog2.f32 %v1143_v52 }
 0xadd   : > { %v4646_v53 = vpop.eup %4645 }
 0xade   : > { %v4648_v54 = vpop.eup %4647  ;;  %v1147_v55 = vmul.f32 0.6931472, %v4646_v53 }
 0xadf   : > { %v1145_v56 = vmul.f32 0.6931472, %v4648_v54 }
 0xae0   : > { %v1151_v60 = vmul.f32 -0.8333333, %v1147_v55 }
 0xae1   : > { %v4650_v61 = vpop.eup %4649  ;;  %v1150_v63 = vmul.f32 -0.8333333, %v1145_v56 }
 0xae2   : > { %v1155_v3 = vmul.f32 1.442695, %v1151_v60  ;;  %v1149_v5 = vmul.f32 0.6931472, %v4650_v61 }
 0xae3   : > { %v1153_v6 = vmul.f32 1.442695, %v1150_v63 }
 0xae4   : > { %4651 = vpow2.f32 %v1155_v3  ;;  %v1152_v7 = vmul.f32 -0.8333333, %v1149_v5 }
 0xae5   : > { %4653 = vpow2.f32 %v1153_v6 }
 0xae6   : > { %v1157_v8 = vmul.f32 1.442695, %v1152_v7 }
 0xae8   : > { %4655 = vpow2.f32 %v1157_v8 }
 0xaee   : > { %v4652_v10 = vpop.eup %4651 }
 0xaef   : > { %v4654_v13 = vpop.eup %4653  ;;  %v1160_v18 = vmul.f32 0.17677669, %v4652_v10 }
 0xaf0   : > { %v1159_v19 = vmul.f32 0.17677669, %v4654_v13 }
 0xaf1   : > { %v1163_v20 = vmul.f32 %v1160_v18, %v5631_v4 }
 0xaf2   : > { %v4656_v21 = vpop.eup %4655  ;;  %v1162_v22 = vmul.f32 %v1159_v19, %v5621_v58 }
 0xaf3   : > { %v1166_v23 = vsel %vm915_vm14, %v1163_v20, 0.0  ;;  %v1161_v24 = vmul.f32 0.31498027, %v4656_v21 }
 0xaf4   : > { %v1165_v26 = vsel %vm915_vm14, %v1162_v22, 0.0 }
 0xaf5   : > { %v1164_v27 = vmul.f32 %v1161_v24, %v5637_v14  ;;  %v1167_v28 = vadd.f32 %v1166_v23, %v1165_v26 }
 0xaf7   : > { %v1168_v29 = vsel %vm915_vm14, %v1164_v27, 0.0 }
 0xaf8   : > { %v1169_v30 = vadd.f32 %v1168_v29, %v1167_v28 }
 0xafa   : > { %v1170_v31 = vrot.slane %v1169_v30, 4 }
 0xafc   : > { %v1171_v32 = vadd.f32 %v1170_v31, %v1169_v30 }
 0xafe   : > { %v1172_v33 = vrot.slane %v1171_v32, 2 }
 0xb00   : > { %v1173_v35 = vadd.f32 %v1172_v33, %v1171_v32 }
 0xb02   : > { %v1174_v36 = vrot.slane %v1173_v35, 1 }
 0xb04   : > { %v1175_v37 = vadd.f32 %v1174_v36, %v1173_v35 }
 0xb06   : > { %v1176_v38 = vmax.f32 %v1175_v37, 1e-30 }
 0xb08   : > { %4657 = vlog2.f32 %v1176_v38 }
 0xb12   : > { %v4658_v39 = vpop.eup %4657 }
 0xb13   : > { %v1178_v41 = vmul.f32 0.6931472, %v4658_v39 }
 0xb15   : > { %v1179_v42 = vmul.f32 -0.8333333, %v1178_v41 }
 0xb17   : > { %v1180_v43 = vmul.f32 1.442695, %v1179_v42 }
 0xb19   : > { %4659 = vpow2.f32 %v1180_v43 }
 0xb23   : > { %v4660_v44 = vpop.eup %4659 }
 0xb24   : > { %v1182_v45 = vmul.f32 %v4660_v44, %v5604_v62 }
 0xb26   : > { %v1184_v46 = vmul.f32 %v1182_v45, %v5631_v4  ;;  %v1183_v47 = vmul.f32 %v1182_v45, %v5621_v58  ;;  %v1185_v50 = vmul.f32 %v1182_v45, %v5637_v14 }
 0xb28   : > { %v1189_v48 = vsel %vm915_vm14, %v1184_v46, 0.0  ;;  %v1186_v49 = vsel %vm915_vm14, %v1183_v47, 0.0  ;;  %v1192_v51 = vsel %vm915_vm14, %v1185_v50, 0.0 }
 0xb29   : > { %1190 = vadd.xlane.f32.xlu0 %v1189_v48  ;;  %1187 = vadd.xlane.f32.xlu1 %v1186_v49 }
 0xb2d   : > { %1193 = vadd.xlane.f32.xlu1 %v1192_v51 }
 0xbb6   : > { %v1191_v52 = vpop.xlane.xlu0 %1190  ;;  %v1188_v53 = vpop.xlane.xlu1 %1187 }
 0xbb7   : > { %v1196_v54 = vmax.f32 %v1191_v52, 1e-30  ;;  %v1195_v55 = vmax.f32 %v1188_v53, 1e-30 }
 0xbb9   : > { %4661 = vlog2.f32 %v1196_v54 }
 0xbba   : > { %4663 = vlog2.f32 %v1195_v55  ;;  %v1194_v56 = vpop.xlane.xlu1 %1193 }
 0xbbb   : > { %v1197_v60 = vmax.f32 %v1194_v56, 1e-30 }
 0xbbd   : > { %4665 = vlog2.f32 %v1197_v60 }
 0xbc3   : > { %v4662_v61 = vpop.eup %4661 }
 0xbc4   : > { %v4664_v63 = vpop.eup %4663  ;;  %v1201_v3 = vmul.f32 0.6931472, %v4662_v61 }
 0xbc5   : > { %v1199_v5 = vmul.f32 0.6931472, %v4664_v63 }
 0xbc6   : > { %v1205_v6 = vmul.f32 -0.8333333, %v1201_v3 }
 0xbc7   : > { %v4666_v7 = vpop.eup %4665  ;;  %v1204_v8 = vmul.f32 -0.8333333, %v1199_v5 }
 0xbc8   : > { %v1209_v10 = vmul.f32 1.442695, %v1205_v6  ;;  %v1203_v13 = vmul.f32 0.6931472, %v4666_v7 }
 0xbc9   : > { %v1207_v18 = vmul.f32 1.442695, %v1204_v8 }
 0xbca   : > { %4667 = vpow2.f32 %v1209_v10  ;;  %v1206_v19 = vmul.f32 -0.8333333, %v1203_v13 }
 0xbcb   : > { %4669 = vpow2.f32 %v1207_v18 }
 0xbcc   : > { %v1211_v20 = vmul.f32 1.442695, %v1206_v19 }
 0xbce   : > { %4671 = vpow2.f32 %v1211_v20 }
 0xbd4   : > { %v4668_v21 = vpop.eup %4667 }
 0xbd5   : > { %v4670_v22 = vpop.eup %4669  ;;  %v1214_v23 = vmul.f32 0.17677669, %v4668_v21 }
 0xbd6   : > { %v1213_v24 = vmul.f32 0.17677669, %v4670_v22 }
 0xbd7   : > { %v1217_v26 = vmul.f32 %v1214_v23, %v5631_v4 }
 0xbd8   : > { %v4672_v27 = vpop.eup %4671  ;;  %v1216_v28 = vmul.f32 %v1213_v24, %v5621_v58 }
 0xbd9   : > { %v1220_v29 = vsel %vm915_vm14, %v1217_v26, 0.0  ;;  %v1215_v30 = vmul.f32 0.31498027, %v4672_v27 }
 0xbda   : > { %v1219_v31 = vsel %vm915_vm14, %v1216_v28, 0.0 }
 0xbdb   : > { %v1218_v32 = vmul.f32 %v1215_v30, %v5637_v14  ;;  %v1221_v33 = vadd.f32 %v1220_v29, %v1219_v31 }
 0xbdd   : > { %v1222_v35 = vsel %vm915_vm14, %v1218_v32, 0.0 }
 0xbde   : > { %v1223_v36 = vadd.f32 %v1222_v35, %v1221_v33 }
 0xbe0   : > { %v1224_v37 = vrot.slane %v1223_v36, 4 }
 0xbe2   : > { %v1225_v38 = vadd.f32 %v1224_v37, %v1223_v36 }
 0xbe4   : > { %v1226_v39 = vrot.slane %v1225_v38, 2 }
 0xbe6   : > { %v1227_v41 = vadd.f32 %v1226_v39, %v1225_v38 }
 0xbe8   : > { %v1228_v42 = vrot.slane %v1227_v41, 1 }
 0xbea   : > { %v1229_v43 = vadd.f32 %v1228_v42, %v1227_v41 }
 0xbec   : > { %v1230_v44 = vmax.f32 %v1229_v43, 1e-30 }
 0xbee   : > { %4673 = vlog2.f32 %v1230_v44 }
 0xbf8   : > { %v4674_v45 = vpop.eup %4673 }
 0xbf9   : > { %v1232_v46 = vmul.f32 0.6931472, %v4674_v45 }
 0xbfb   : > { %v1233_v47 = vmul.f32 -0.8333333, %v1232_v46 }
 0xbfd   : > { %v1234_v48 = vmul.f32 1.442695, %v1233_v47 }
 0xbff   : > { %4675 = vpow2.f32 %v1234_v48 }
 0xc09   : > { %v4676_v49 = vpop.eup %4675 }
 0xc0a   : > { %v1236_v50 = vmul.f32 %v4676_v49, %v5604_v62 }
 0xc0c   : > { %v1238_v51 = vmul.f32 %v1236_v50, %v5631_v4  ;;  %v1237_v52 = vmul.f32 %v1236_v50, %v5621_v58  ;;  %v1239_v55 = vmul.f32 %v1236_v50, %v5637_v14 }
 0xc0e   : > { %v1243_v53 = vsel %vm915_vm14, %v1238_v51, 0.0  ;;  %v1240_v54 = vsel %vm915_vm14, %v1237_v52, 0.0  ;;  %v1246_v56 = vsel %vm915_vm14, %v1239_v55, 0.0 }
 0xc0f   : > { %1244 = vadd.xlane.f32.xlu1 %v1243_v53  ;;  %1241 = vadd.xlane.f32.xlu0 %v1240_v54 }
 0xc13   : > { %1247 = vadd.xlane.f32.xlu0 %v1246_v56 }
 0xc9c   : > { %v1245_v60 = vpop.xlane.xlu1 %1244  ;;  %v1242_v61 = vpop.xlane.xlu0 %1241 }
 0xc9d   : > { %v1250_v63 = vmax.f32 %v1245_v60, 1e-30  ;;  %v1249_v3 = vmax.f32 %v1242_v61, 1e-30 }
 0xc9f   : > { %4677 = vlog2.f32 %v1250_v63 }
 0xca0   : > { %4679 = vlog2.f32 %v1249_v3  ;;  %v1248_v5 = vpop.xlane.xlu0 %1247 }
 0xca1   : > { %v1251_v6 = vmax.f32 %v1248_v5, 1e-30 }
 0xca3   : > { %4681 = vlog2.f32 %v1251_v6 }
 0xca9   : > { %v4678_v7 = vpop.eup %4677 }
 0xcaa   : > { %v4680_v8 = vpop.eup %4679  ;;  %v1255_v10 = vmul.f32 0.6931472, %v4678_v7 }
 0xcab   : > { %v1253_v13 = vmul.f32 0.6931472, %v4680_v8 }
 0xcac   : > { %v1259_v18 = vmul.f32 -0.8333333, %v1255_v10 }
 0xcad   : > { %v4682_v19 = vpop.eup %4681  ;;  %v1258_v20 = vmul.f32 -0.8333333, %v1253_v13 }
 0xcae   : > { %v1263_v21 = vmul.f32 1.442695, %v1259_v18  ;;  %v1257_v22 = vmul.f32 0.6931472, %v4682_v19 }
 0xcaf   : > { %v1261_v23 = vmul.f32 1.442695, %v1258_v20 }
 0xcb0   : > { %4683 = vpow2.f32 %v1263_v21  ;;  %v1260_v24 = vmul.f32 -0.8333333, %v1257_v22 }
 0xcb1   : > { %4685 = vpow2.f32 %v1261_v23 }
 0xcb2   : > { %v1265_v26 = vmul.f32 1.442695, %v1260_v24 }
 0xcb4   : > { %4687 = vpow2.f32 %v1265_v26 }
 0xcba   : > { %v4684_v27 = vpop.eup %4683 }
 0xcbb   : > { %v4686_v28 = vpop.eup %4685  ;;  %v1268_v29 = vmul.f32 0.17677669, %v4684_v27 }
 0xcbc   : > { %v1267_v30 = vmul.f32 0.17677669, %v4686_v28 }
 0xcbd   : > { %v1271_v31 = vmul.f32 %v1268_v29, %v5631_v4 }
 0xcbe   : > { %v4688_v32 = vpop.eup %4687  ;;  %v1270_v33 = vmul.f32 %v1267_v30, %v5621_v58 }
 0xcbf   : > { %v1274_v35 = vsel %vm915_vm14, %v1271_v31, 0.0  ;;  %v1269_v36 = vmul.f32 0.31498027, %v4688_v32 }
 0xcc0   : > { %v1273_v37 = vsel %vm915_vm14, %v1270_v33, 0.0 }
 0xcc1   : > { %v1272_v38 = vmul.f32 %v1269_v36, %v5637_v14  ;;  %v1275_v39 = vadd.f32 %v1274_v35, %v1273_v37 }
 0xcc3   : > { %v1276_v41 = vsel %vm915_vm14, %v1272_v38, 0.0 }
 0xcc4   : > { %v1277_v42 = vadd.f32 %v1276_v41, %v1275_v39 }
 0xcc6   : > { %v1278_v43 = vrot.slane %v1277_v42, 4 }
 0xcc8   : > { %v1279_v44 = vadd.f32 %v1278_v43, %v1277_v42 }
 0xcca   : > { %v1280_v45 = vrot.slane %v1279_v44, 2 }
 0xccc   : > { %v1281_v46 = vadd.f32 %v1280_v45, %v1279_v44 }
 0xcce   : > { %v1282_v47 = vrot.slane %v1281_v46, 1 }
 0xcd0   : > { %v1283_v48 = vadd.f32 %v1282_v47, %v1281_v46 }
 0xcd2   : > { %v1284_v49 = vmax.f32 %v1283_v48, 1e-30 }
 0xcd4   : > { %4689 = vlog2.f32 %v1284_v49 }
 0xcde   : > { %v4690_v50 = vpop.eup %4689 }
 0xcdf   : > { %v1286_v51 = vmul.f32 0.6931472, %v4690_v50 }
 0xce1   : > { %v1287_v52 = vmul.f32 -0.8333333, %v1286_v51 }
 0xce3   : > { %v1288_v53 = vmul.f32 1.442695, %v1287_v52 }
 0xce5   : > { %4691 = vpow2.f32 %v1288_v53 }
 0xcef   : > { %v4692_v54 = vpop.eup %4691 }
 0xcf0   : > { %v1290_v55 = vmul.f32 %v4692_v54, %v5604_v62 }
 0xcf2   : > { %v1292_v56 = vmul.f32 %v1290_v55, %v5631_v4  ;;  %v1291_v60 = vmul.f32 %v1290_v55, %v5621_v58  ;;  %v1293_v3 = vmul.f32 %v1290_v55, %v5637_v14 }
 0xcf4   : > { %v1297_v61 = vsel %vm915_vm14, %v1292_v56, 0.0  ;;  %v1294_v63 = vsel %vm915_vm14, %v1291_v60, 0.0  ;;  %v1300_v5 = vsel %vm915_vm14, %v1293_v3, 0.0 }
 0xcf5   : > { %1298 = vadd.xlane.f32.xlu0 %v1297_v61  ;;  %1295 = vadd.xlane.f32.xlu1 %v1294_v63 }
 0xcf9   : > { %1301 = vadd.xlane.f32.xlu1 %v1300_v5 }
 0xd82   : > { %v1299_v6 = vpop.xlane.xlu0 %1298  ;;  %v1296_v7 = vpop.xlane.xlu1 %1295 }
 0xd83   : > { %v1304_v8 = vmax.f32 %v1299_v6, 1e-30  ;;  %v1303_v10 = vmax.f32 %v1296_v7, 1e-30 }
 0xd85   : > { %4693 = vlog2.f32 %v1304_v8 }
 0xd86   : > { %4695 = vlog2.f32 %v1303_v10  ;;  %v1302_v13 = vpop.xlane.xlu1 %1301 }
 0xd87   : > { %v1305_v18 = vmax.f32 %v1302_v13, 1e-30 }
 0xd89   : > { %4697 = vlog2.f32 %v1305_v18 }
 0xd8f   : > { %v4694_v19 = vpop.eup %4693 }
 0xd90   : > { %v4696_v20 = vpop.eup %4695  ;;  %v1309_v21 = vmul.f32 0.6931472, %v4694_v19 }
 0xd91   : > { %v1307_v22 = vmul.f32 0.6931472, %v4696_v20 }
 0xd92   : > { %v1313_v23 = vmul.f32 -0.8333333, %v1309_v21 }
 0xd93   : > { %v4698_v24 = vpop.eup %4697  ;;  %v1312_v26 = vmul.f32 -0.8333333, %v1307_v22 }
 0xd94   : > { %v1317_v27 = vmul.f32 1.442695, %v1313_v23  ;;  %v1311_v28 = vmul.f32 0.6931472, %v4698_v24 }
 0xd95   : > { %v1315_v29 = vmul.f32 1.442695, %v1312_v26 }
 0xd96   : > { %4699 = vpow2.f32 %v1317_v27  ;;  %v1314_v30 = vmul.f32 -0.8333333, %v1311_v28 }
 0xd97   : > { %4701 = vpow2.f32 %v1315_v29 }
 0xd98   : > { %v1319_v31 = vmul.f32 1.442695, %v1314_v30 }
 0xd9a   : > { %4703 = vpow2.f32 %v1319_v31 }
 0xda0   : > { %v4700_v32 = vpop.eup %4699 }
 0xda1   : > { %v4702_v33 = vpop.eup %4701  ;;  %v1322_v35 = vmul.f32 0.17677669, %v4700_v32 }
 0xda2   : > { %v1321_v36 = vmul.f32 0.17677669, %v4702_v33 }
 0xda3   : > { %v1325_v37 = vmul.f32 %v1322_v35, %v5631_v4 }
 0xda4   : > { %v4704_v38 = vpop.eup %4703  ;;  %v1324_v39 = vmul.f32 %v1321_v36, %v5621_v58 }
 0xda5   : > { %v1328_v41 = vsel %vm915_vm14, %v1325_v37, 0.0  ;;  %v1323_v42 = vmul.f32 0.31498027, %v4704_v38 }
 0xda6   : > { %v1327_v43 = vsel %vm915_vm14, %v1324_v39, 0.0 }
 0xda7   : > { %v1326_v44 = vmul.f32 %v1323_v42, %v5637_v14  ;;  %v1329_v45 = vadd.f32 %v1328_v41, %v1327_v43 }
 0xda9   : > { %v1330_v46 = vsel %vm915_vm14, %v1326_v44, 0.0 }
 0xdaa   : > { %v1331_v47 = vadd.f32 %v1330_v46, %v1329_v45 }
 0xdac   : > { %v1332_v48 = vrot.slane %v1331_v47, 4 }
 0xdae   : > { %v1333_v49 = vadd.f32 %v1332_v48, %v1331_v47 }
 0xdb0   : > { %v1334_v50 = vrot.slane %v1333_v49, 2 }
 0xdb2   : > { %v1335_v51 = vadd.f32 %v1334_v50, %v1333_v49 }
 0xdb4   : > { %v1336_v52 = vrot.slane %v1335_v51, 1 }
 0xdb6   : > { %v1337_v53 = vadd.f32 %v1336_v52, %v1335_v51 }
 0xdb8   : > { %v1338_v54 = vmax.f32 %v1337_v53, 1e-30 }
 0xdba   : > { %4705 = vlog2.f32 %v1338_v54 }
 0xdc4   : > { %v4706_v55 = vpop.eup %4705 }
 0xdc5   : > { %v1340_v56 = vmul.f32 0.6931472, %v4706_v55 }
 0xdc7   : > { %v1341_v60 = vmul.f32 -0.8333333, %v1340_v56 }
 0xdc9   : > { %v1342_v61 = vmul.f32 1.442695, %v1341_v60 }
 0xdcb   : > { %4707 = vpow2.f32 %v1342_v61 }
 0xdd5   : > { %v4708_v63 = vpop.eup %4707 }
 0xdd6   : > { %v1344_v3 = vmul.f32 %v4708_v63, %v5604_v62 }
 0xdd8   : > { %v1346_v5 = vmul.f32 %v1344_v3, %v5631_v4  ;;  %v1345_v6 = vmul.f32 %v1344_v3, %v5621_v58  ;;  %v1347_v10 = vmul.f32 %v1344_v3, %v5637_v14 }
 0xdda   : > { %v1351_v7 = vsel %vm915_vm14, %v1346_v5, 0.0  ;;  %v1348_v8 = vsel %vm915_vm14, %v1345_v6, 0.0  ;;  %v1354_v13 = vsel %vm915_vm14, %v1347_v10, 0.0 }
 0xddb   : > { %1352 = vadd.xlane.f32.xlu1 %v1351_v7  ;;  %1349 = vadd.xlane.f32.xlu0 %v1348_v8 }
 0xddf   : > { %1355 = vadd.xlane.f32.xlu0 %v1354_v13 }
 0xe68   : > { %v1353_v18 = vpop.xlane.xlu1 %1352  ;;  %v1350_v19 = vpop.xlane.xlu0 %1349 }
 0xe69   : > { %v1358_v20 = vmax.f32 %v1353_v18, 1e-30  ;;  %v1357_v21 = vmax.f32 %v1350_v19, 1e-30 }
 0xe6b   : > { %4709 = vlog2.f32 %v1358_v20 }
 0xe6c   : > { %4711 = vlog2.f32 %v1357_v21  ;;  %v1356_v22 = vpop.xlane.xlu0 %1355 }
 0xe6d   : > { %v1359_v23 = vmax.f32 %v1356_v22, 1e-30 }
 0xe6f   : > { %4713 = vlog2.f32 %v1359_v23 }
 0xe75   : > { %v4710_v24 = vpop.eup %4709 }
 0xe76   : > { %v4712_v26 = vpop.eup %4711  ;;  %v1363_v27 = vmul.f32 0.6931472, %v4710_v24 }
 0xe77   : > { %v1361_v28 = vmul.f32 0.6931472, %v4712_v26 }
 0xe78   : > { %v1367_v29 = vmul.f32 -0.8333333, %v1363_v27 }
 0xe79   : > { %v4714_v30 = vpop.eup %4713  ;;  %v1366_v31 = vmul.f32 -0.8333333, %v1361_v28 }
 0xe7a   : > { %v1371_v32 = vmul.f32 1.442695, %v1367_v29  ;;  %v1365_v33 = vmul.f32 0.6931472, %v4714_v30 }
 0xe7b   : > { %v1369_v35 = vmul.f32 1.442695, %v1366_v31 }
 0xe7c   : > { %4715 = vpow2.f32 %v1371_v32  ;;  %v1368_v36 = vmul.f32 -0.8333333, %v1365_v33 }
 0xe7d   : > { %4717 = vpow2.f32 %v1369_v35 }
 0xe7e   : > { %v1373_v37 = vmul.f32 1.442695, %v1368_v36 }
 0xe80   : > { %4719 = vpow2.f32 %v1373_v37 }
 0xe86   : > { %v4716_v38 = vpop.eup %4715 }
 0xe87   : > { %v4718_v39 = vpop.eup %4717  ;;  %v1376_v41 = vmul.f32 0.17677669, %v4716_v38 }
 0xe88   : > { %v1375_v42 = vmul.f32 0.17677669, %v4718_v39 }
 0xe89   : > { %v1379_v43 = vmul.f32 %v1376_v41, %v5631_v4 }
 0xe8a   : > { %v4720_v44 = vpop.eup %4719  ;;  %v1378_v45 = vmul.f32 %v1375_v42, %v5621_v58 }
 0xe8b   : > { %v1382_v46 = vsel %vm915_vm14, %v1379_v43, 0.0  ;;  %v1377_v47 = vmul.f32 0.31498027, %v4720_v44 }
 0xe8c   : > { %v1381_v48 = vsel %vm915_vm14, %v1378_v45, 0.0 }
 0xe8d   : > { %v1380_v49 = vmul.f32 %v1377_v47, %v5637_v14  ;;  %v1383_v50 = vadd.f32 %v1382_v46, %v1381_v48 }
 0xe8f   : > { %v1384_v51 = vsel %vm915_vm14, %v1380_v49, 0.0 }
 0xe90   : > { %v1385_v52 = vadd.f32 %v1384_v51, %v1383_v50 }
 0xe92   : > { %v1386_v53 = vrot.slane %v1385_v52, 4 }
 0xe94   : > { %v1387_v54 = vadd.f32 %v1386_v53, %v1385_v52 }
 0xe96   : > { %v1388_v55 = vrot.slane %v1387_v54, 2 }
 0xe98   : > { %v1389_v56 = vadd.f32 %v1388_v55, %v1387_v54 }
 0xe9a   : > { %v1390_v60 = vrot.slane %v1389_v56, 1 }
 0xe9c   : > { %v1391_v61 = vadd.f32 %v1390_v60, %v1389_v56 }
 0xe9e   : > { %v1392_v63 = vmax.f32 %v1391_v61, 1e-30 }
 0xea0   : > { %4721 = vlog2.f32 %v1392_v63 }
 0xeaa   : > { %v4722_v3 = vpop.eup %4721 }
 0xeab   : > { %v1394_v5 = vmul.f32 0.6931472, %v4722_v3 }
 0xead   : > { %v1395_v6 = vmul.f32 -0.8333333, %v1394_v5 }
 0xeaf   : > { %v1396_v7 = vmul.f32 1.442695, %v1395_v6 }
 0xeb1   : > { %4723 = vpow2.f32 %v1396_v7 }
 0xebb   : > { %v4724_v8 = vpop.eup %4723 }
 0xebc   : > { %v1398_v10 = vmul.f32 %v4724_v8, %v5604_v62 }
 0xebe   : > { %v1400_v13 = vmul.f32 %v1398_v10, %v5631_v4  ;;  %v1399_v18 = vmul.f32 %v1398_v10, %v5621_v58  ;;  %v1401_v21 = vmul.f32 %v1398_v10, %v5637_v14 }
 0xec0   : > { %v1405_v19 = vsel %vm915_vm14, %v1400_v13, 0.0  ;;  %v1402_v20 = vsel %vm915_vm14, %v1399_v18, 0.0  ;;  %v1408_v22 = vsel %vm915_vm14, %v1401_v21, 0.0 }
 0xec1   : > { %1406 = vadd.xlane.f32.xlu0 %v1405_v19  ;;  %1403 = vadd.xlane.f32.xlu1 %v1402_v20 }
 0xec5   : > { %1409 = vadd.xlane.f32.xlu1 %v1408_v22 }
 0xf4e   : > { %v1407_v23 = vpop.xlane.xlu0 %1406  ;;  %v1404_v24 = vpop.xlane.xlu1 %1403 }
 0xf4f   : > { %v1412_v26 = vmax.f32 %v1407_v23, 1e-30  ;;  %v1411_v27 = vmax.f32 %v1404_v24, 1e-30 }
 0xf51   : > { %4725 = vlog2.f32 %v1412_v26 }
 0xf52   : > { %4727 = vlog2.f32 %v1411_v27  ;;  %v1410_v28 = vpop.xlane.xlu1 %1409 }
 0xf53   : > { %v1413_v29 = vmax.f32 %v1410_v28, 1e-30 }
 0xf55   : > { %4729 = vlog2.f32 %v1413_v29 }
 0xf5b   : > { %v4726_v30 = vpop.eup %4725 }
 0xf5c   : > { %v4728_v31 = vpop.eup %4727  ;;  %v1417_v32 = vmul.f32 0.6931472, %v4726_v30 }
 0xf5d   : > { %v1415_v33 = vmul.f32 0.6931472, %v4728_v31 }
 0xf5e   : > { %v1421_v35 = vmul.f32 -0.8333333, %v1417_v32 }
 0xf5f   : > { %v4730_v36 = vpop.eup %4729  ;;  %v1420_v37 = vmul.f32 -0.8333333, %v1415_v33 }
 0xf60   : > { %v1425_v38 = vmul.f32 1.442695, %v1421_v35  ;;  %v1419_v39 = vmul.f32 0.6931472, %v4730_v36 }
 0xf61   : > { %v1423_v41 = vmul.f32 1.442695, %v1420_v37 }
 0xf62   : > { %4731 = vpow2.f32 %v1425_v38  ;;  %v1422_v42 = vmul.f32 -0.8333333, %v1419_v39 }
 0xf63   : > { %4733 = vpow2.f32 %v1423_v41 }
 0xf64   : > { %v1427_v43 = vmul.f32 1.442695, %v1422_v42 }
 0xf66   : > { %4735 = vpow2.f32 %v1427_v43 }
 0xf6c   : > { %v4732_v44 = vpop.eup %4731 }
 0xf6d   : > { %v4734_v45 = vpop.eup %4733  ;;  %v1430_v46 = vmul.f32 0.17677669, %v4732_v44 }
 0xf6e   : > { %v1429_v47 = vmul.f32 0.17677669, %v4734_v45 }
 0xf6f   : > { %v1433_v48 = vmul.f32 %v1430_v46, %v5631_v4 }
 0xf70   : > { %v4736_v49 = vpop.eup %4735  ;;  %v1432_v50 = vmul.f32 %v1429_v47, %v5621_v58 }
 0xf71   : > { %v1436_v51 = vsel %vm915_vm14, %v1433_v48, 0.0  ;;  %v1431_v52 = vmul.f32 0.31498027, %v4736_v49 }
 0xf72   : > { %v1435_v53 = vsel %vm915_vm14, %v1432_v50, 0.0 }
 0xf73   : > { %v1434_v54 = vmul.f32 %v1431_v52, %v5637_v14  ;;  %v1437_v55 = vadd.f32 %v1436_v51, %v1435_v53 }
 0xf75   : > { %v1438_v56 = vsel %vm915_vm14, %v1434_v54, 0.0 }
 0xf76   : > { %v1439_v60 = vadd.f32 %v1438_v56, %v1437_v55 }
 0xf78   : > { %v1440_v61 = vrot.slane %v1439_v60, 4 }
 0xf7a   : > { %v1441_v63 = vadd.f32 %v1440_v61, %v1439_v60 }
 0xf7c   : > { %v1442_v3 = vrot.slane %v1441_v63, 2 }
 0xf7e   : > { %v1443_v5 = vadd.f32 %v1442_v3, %v1441_v63 }
 0xf80   : > { %v1444_v6 = vrot.slane %v1443_v5, 1 }
 0xf82   : > { %v1445_v7 = vadd.f32 %v1444_v6, %v1443_v5 }
 0xf84   : > { %v1446_v8 = vmax.f32 %v1445_v7, 1e-30 }
 0xf86   : > { %4737 = vlog2.f32 %v1446_v8 }
 0xf90   : > { %v4738_v10 = vpop.eup %4737 }
 0xf91   : > { %v1448_v13 = vmul.f32 0.6931472, %v4738_v10 }
 0xf93   : > { %v1449_v18 = vmul.f32 -0.8333333, %v1448_v13 }
 0xf95   : > { %v1450_v19 = vmul.f32 1.442695, %v1449_v18 }
 0xf97   : > { %4739 = vpow2.f32 %v1450_v19 }
 0xfa1   : > { %v4740_v20 = vpop.eup %4739 }
 0xfa2   : > { %v1452_v21 = vmul.f32 %v4740_v20, %v5604_v62 }
 0xfa4   : > { %v1454_v22 = vmul.f32 %v1452_v21, %v5631_v4  ;;  %v1453_v23 = vmul.f32 %v1452_v21, %v5621_v58  ;;  %v1455_v27 = vmul.f32 %v1452_v21, %v5637_v14 }
 0xfa6   : > { %v1459_v24 = vsel %vm915_vm14, %v1454_v22, 0.0  ;;  %v1456_v26 = vsel %vm915_vm14, %v1453_v23, 0.0  ;;  %v1462_v28 = vsel %vm915_vm14, %v1455_v27, 0.0 }
 0xfa7   : > { %1460 = vadd.xlane.f32.xlu1 %v1459_v24  ;;  %1457 = vadd.xlane.f32.xlu0 %v1456_v26 }
 0xfab   : > { %1463 = vadd.xlane.f32.xlu0 %v1462_v28 }
0x1034   : > { %v1461_v29 = vpop.xlane.xlu1 %1460  ;;  %v1458_v30 = vpop.xlane.xlu0 %1457 }
0x1035   : > { %v1466_v31 = vmax.f32 %v1461_v29, 1e-30  ;;  %v1465_v32 = vmax.f32 %v1458_v30, 1e-30 }
0x1037   : > { %4741 = vlog2.f32 %v1466_v31 }
0x1038   : > { %4743 = vlog2.f32 %v1465_v32  ;;  %v1464_v33 = vpop.xlane.xlu0 %1463 }
0x1039   : > { %v1467_v35 = vmax.f32 %v1464_v33, 1e-30 }
0x103b   : > { %4745 = vlog2.f32 %v1467_v35 }
0x1041   : > { %v4742_v36 = vpop.eup %4741 }
0x1042   : > { %v4744_v37 = vpop.eup %4743  ;;  %v1471_v38 = vmul.f32 0.6931472, %v4742_v36 }
0x1043   : > { %v1469_v39 = vmul.f32 0.6931472, %v4744_v37 }
0x1044   : > { %v1475_v41 = vmul.f32 -0.8333333, %v1471_v38 }
0x1045   : > { %v4746_v42 = vpop.eup %4745  ;;  %v1474_v43 = vmul.f32 -0.8333333, %v1469_v39 }
0x1046   : > { %v1479_v44 = vmul.f32 1.442695, %v1475_v41  ;;  %v1473_v45 = vmul.f32 0.6931472, %v4746_v42 }
0x1047   : > { %v1477_v46 = vmul.f32 1.442695, %v1474_v43 }
0x1048   : > { %4747 = vpow2.f32 %v1479_v44  ;;  %v1476_v47 = vmul.f32 -0.8333333, %v1473_v45 }
0x1049   : > { %4749 = vpow2.f32 %v1477_v46 }
0x104a   : > { %v1481_v48 = vmul.f32 1.442695, %v1476_v47 }
0x104c   : > { %4751 = vpow2.f32 %v1481_v48 }
0x1052   : > { %v4748_v49 = vpop.eup %4747 }
0x1053   : > { %v4750_v50 = vpop.eup %4749  ;;  %v1484_v51 = vmul.f32 0.17677669, %v4748_v49 }
0x1054   : > { %v1483_v52 = vmul.f32 0.17677669, %v4750_v50 }
0x1055   : > { %v1487_v53 = vmul.f32 %v1484_v51, %v5631_v4 }
0x1056   : > { %v4752_v54 = vpop.eup %4751  ;;  %v1486_v55 = vmul.f32 %v1483_v52, %v5621_v58 }
0x1057   : > { %v1490_v56 = vsel %vm915_vm14, %v1487_v53, 0.0  ;;  %v1485_v60 = vmul.f32 0.31498027, %v4752_v54 }
0x1058   : > { %v1489_v61 = vsel %vm915_vm14, %v1486_v55, 0.0 }
0x1059   : > { %v1488_v63 = vmul.f32 %v1485_v60, %v5637_v14  ;;  %v1491_v3 = vadd.f32 %v1490_v56, %v1489_v61 }
0x105b   : > { %v1492_v5 = vsel %vm915_vm14, %v1488_v63, 0.0 }
0x105c   : > { %v1493_v6 = vadd.f32 %v1492_v5, %v1491_v3 }
0x105e   : > { %v1494_v7 = vrot.slane %v1493_v6, 4 }
0x1060   : > { %v1495_v8 = vadd.f32 %v1494_v7, %v1493_v6 }
0x1062   : > { %v1496_v10 = vrot.slane %v1495_v8, 2 }
0x1064   : > { %v1497_v13 = vadd.f32 %v1496_v10, %v1495_v8 }
0x1066   : > { %v1498_v18 = vrot.slane %v1497_v13, 1 }
0x1068   : > { %v1499_v19 = vadd.f32 %v1498_v18, %v1497_v13 }
0x106a   : > { %v1500_v20 = vmax.f32 %v1499_v19, 1e-30 }
0x106c   : > { %4753 = vlog2.f32 %v1500_v20 }
0x1076   : > { %v4754_v21 = vpop.eup %4753 }
0x1077   : > { %v1502_v22 = vmul.f32 0.6931472, %v4754_v21 }
0x1079   : > { %v1503_v23 = vmul.f32 -0.8333333, %v1502_v22 }
0x107b   : > { %v1504_v24 = vmul.f32 1.442695, %v1503_v23 }
0x107d   : > { %4755 = vpow2.f32 %v1504_v24 }
0x1087   : > { %v4756_v26 = vpop.eup %4755 }
0x1088   : > { %v1506_v27 = vmul.f32 %v4756_v26, %v5604_v62 }
0x108a   : > { %v1508_v28 = vmul.f32 %v1506_v27, %v5631_v4  ;;  %v1507_v29 = vmul.f32 %v1506_v27, %v5621_v58  ;;  %v1509_v32 = vmul.f32 %v1506_v27, %v5637_v14 }
0x108c   : > { %v1513_v30 = vsel %vm915_vm14, %v1508_v28, 0.0  ;;  %v1510_v31 = vsel %vm915_vm14, %v1507_v29, 0.0  ;;  %v1516_v33 = vsel %vm915_vm14, %v1509_v32, 0.0 }
0x108d   : > { %1514 = vadd.xlane.f32.xlu0 %v1513_v30  ;;  %1511 = vadd.xlane.f32.xlu1 %v1510_v31 }
0x1091   : > { %1517 = vadd.xlane.f32.xlu1 %v1516_v33 }
0x111a   : > { %v1515_v35 = vpop.xlane.xlu0 %1514  ;;  %v1512_v36 = vpop.xlane.xlu1 %1511 }
0x111b   : > { %v1520_v37 = vmax.f32 %v1515_v35, 1e-30  ;;  %v1519_v38 = vmax.f32 %v1512_v36, 1e-30 }
0x111d   : > { %4757 = vlog2.f32 %v1520_v37 }
0x111e   : > { %4759 = vlog2.f32 %v1519_v38  ;;  %v1518_v39 = vpop.xlane.xlu1 %1517 }
0x111f   : > { %v1521_v41 = vmax.f32 %v1518_v39, 1e-30 }
0x1121   : > { %4761 = vlog2.f32 %v1521_v41 }
0x1127   : > { %v4758_v42 = vpop.eup %4757 }
0x1128   : > { %v4760_v43 = vpop.eup %4759  ;;  %v1525_v44 = vmul.f32 0.6931472, %v4758_v42 }
0x1129   : > { %v1523_v45 = vmul.f32 0.6931472, %v4760_v43 }
0x112a   : > { %v1529_v46 = vmul.f32 -0.8333333, %v1525_v44 }
0x112b   : > { %v4762_v47 = vpop.eup %4761  ;;  %v1528_v48 = vmul.f32 -0.8333333, %v1523_v45 }
0x112c   : > { %v1533_v49 = vmul.f32 1.442695, %v1529_v46  ;;  %v1527_v50 = vmul.f32 0.6931472, %v4762_v47 }
0x112d   : > { %v1531_v51 = vmul.f32 1.442695, %v1528_v48 }
0x112e   : > { %4763 = vpow2.f32 %v1533_v49  ;;  %v1530_v52 = vmul.f32 -0.8333333, %v1527_v50 }
0x112f   : > { %4765 = vpow2.f32 %v1531_v51 }
0x1130   : > { %v1535_v53 = vmul.f32 1.442695, %v1530_v52 }
0x1132   : > { %4767 = vpow2.f32 %v1535_v53 }
0x1138   : > { %v4764_v54 = vpop.eup %4763 }
0x1139   : > { %v4766_v55 = vpop.eup %4765  ;;  %v1538_v56 = vmul.f32 0.17677669, %v4764_v54 }
0x113a   : > { %v1537_v60 = vmul.f32 0.17677669, %v4766_v55 }
0x113b   : > { %v1541_v61 = vmul.f32 %v1538_v56, %v5631_v4 }
0x113c   : > { %v4768_v63 = vpop.eup %4767  ;;  %v1540_v3 = vmul.f32 %v1537_v60, %v5621_v58 }
0x113d   : > { %v1544_v5 = vsel %vm915_vm14, %v1541_v61, 0.0  ;;  %v1539_v6 = vmul.f32 0.31498027, %v4768_v63 }
0x113e   : > { %v1543_v7 = vsel %vm915_vm14, %v1540_v3, 0.0 }
0x113f   : > { %v1542_v8 = vmul.f32 %v1539_v6, %v5637_v14  ;;  %v1545_v10 = vadd.f32 %v1544_v5, %v1543_v7 }
0x1141   : > { %v1546_v13 = vsel %vm915_vm14, %v1542_v8, 0.0 }
0x1142   : > { %v1547_v18 = vadd.f32 %v1546_v13, %v1545_v10 }
0x1144   : > { %v1548_v19 = vrot.slane %v1547_v18, 4 }
0x1146   : > { %v1549_v20 = vadd.f32 %v1548_v19, %v1547_v18 }
0x1148   : > { %v1550_v21 = vrot.slane %v1549_v20, 2 }
0x114a   : > { %v1551_v22 = vadd.f32 %v1550_v21, %v1549_v20 }
0x114c   : > { %v1552_v23 = vrot.slane %v1551_v22, 1 }
0x114e   : > { %v1553_v24 = vadd.f32 %v1552_v23, %v1551_v22 }
0x1150   : > { %v1554_v26 = vmax.f32 %v1553_v24, 1e-30 }
0x1152   : > { %4769 = vlog2.f32 %v1554_v26 }
0x115c   : > { %v4770_v27 = vpop.eup %4769 }
0x115d   : > { %v1556_v28 = vmul.f32 0.6931472, %v4770_v27 }
0x115f   : > { %v1557_v29 = vmul.f32 -0.8333333, %v1556_v28 }
0x1161   : > { %v1558_v30 = vmul.f32 1.442695, %v1557_v29 }
0x1163   : > { %4771 = vpow2.f32 %v1558_v30 }
0x116d   : > { %v4772_v31 = vpop.eup %4771 }
0x116e   : > { %v1560_v32 = vmul.f32 %v4772_v31, %v5604_v62 }
0x1170   : > { %v1562_v33 = vmul.f32 %v1560_v32, %v5631_v4  ;;  %v1561_v35 = vmul.f32 %v1560_v32, %v5621_v58  ;;  %v1563_v38 = vmul.f32 %v1560_v32, %v5637_v14 }
0x1172   : > { %v1567_v36 = vsel %vm915_vm14, %v1562_v33, 0.0  ;;  %v1564_v37 = vsel %vm915_vm14, %v1561_v35, 0.0  ;;  %v1570_v39 = vsel %vm915_vm14, %v1563_v38, 0.0 }
0x1173   : > { %1568 = vadd.xlane.f32.xlu1 %v1567_v36  ;;  %1565 = vadd.xlane.f32.xlu0 %v1564_v37 }
0x1177   : > { %1571 = vadd.xlane.f32.xlu0 %v1570_v39 }
0x1200   : > { %v1569_v41 = vpop.xlane.xlu1 %1568  ;;  %v1566_v42 = vpop.xlane.xlu0 %1565 }
0x1201   : > { %v1574_v43 = vmax.f32 %v1569_v41, 1e-30  ;;  %v1573_v44 = vmax.f32 %v1566_v42, 1e-30 }
0x1203   : > { %4773 = vlog2.f32 %v1574_v43 }
0x1204   : > { %4775 = vlog2.f32 %v1573_v44  ;;  %v1572_v45 = vpop.xlane.xlu0 %1571 }
0x1205   : > { %v1575_v46 = vmax.f32 %v1572_v45, 1e-30 }
0x1207   : > { %4777 = vlog2.f32 %v1575_v46 }
0x120d   : > { %v4774_v47 = vpop.eup %4773 }
0x120e   : > { %v4776_v48 = vpop.eup %4775  ;;  %v1579_v49 = vmul.f32 0.6931472, %v4774_v47 }
0x120f   : > { %v1577_v50 = vmul.f32 0.6931472, %v4776_v48 }
0x1210   : > { %v1583_v51 = vmul.f32 -0.8333333, %v1579_v49 }
0x1211   : > { %v4778_v52 = vpop.eup %4777  ;;  %v1582_v53 = vmul.f32 -0.8333333, %v1577_v50 }
0x1212   : > { %v1587_v54 = vmul.f32 1.442695, %v1583_v51  ;;  %v1581_v55 = vmul.f32 0.6931472, %v4778_v52 }
0x1213   : > { %v1585_v56 = vmul.f32 1.442695, %v1582_v53 }
0x1214   : > { %4779 = vpow2.f32 %v1587_v54  ;;  %v1584_v60 = vmul.f32 -0.8333333, %v1581_v55 }
0x1215   : > { %4781 = vpow2.f32 %v1585_v56 }
0x1216   : > { %v1589_v61 = vmul.f32 1.442695, %v1584_v60 }
0x1218   : > { %4783 = vpow2.f32 %v1589_v61 }
0x121e   : > { %v4780_v63 = vpop.eup %4779 }
0x121f   : > { %v4782_v3 = vpop.eup %4781  ;;  %v1592_v5 = vmul.f32 0.17677669, %v4780_v63 }
0x1220   : > { %v1591_v6 = vmul.f32 0.17677669, %v4782_v3 }
0x1221   : > { %v1595_v7 = vmul.f32 %v1592_v5, %v5631_v4 }
0x1222   : > { %v4784_v8 = vpop.eup %4783  ;;  %v1594_v10 = vmul.f32 %v1591_v6, %v5621_v58 }
0x1223   : > { %v1598_v13 = vsel %vm915_vm14, %v1595_v7, 0.0  ;;  %v1593_v18 = vmul.f32 0.31498027, %v4784_v8 }
0x1224   : > { %v1597_v19 = vsel %vm915_vm14, %v1594_v10, 0.0 }
0x1225   : > { %v1596_v20 = vmul.f32 %v1593_v18, %v5637_v14  ;;  %v1599_v21 = vadd.f32 %v1598_v13, %v1597_v19 }
0x1227   : > { %v1600_v22 = vsel %vm915_vm14, %v1596_v20, 0.0 }
0x1228   : > { %v1601_v23 = vadd.f32 %v1600_v22, %v1599_v21 }
0x122a   : > { %v1602_v24 = vrot.slane %v1601_v23, 4 }
0x122c   : > { %v1603_v26 = vadd.f32 %v1602_v24, %v1601_v23 }
0x122e   : > { %v1604_v27 = vrot.slane %v1603_v26, 2 }
0x1230   : > { %v1605_v28 = vadd.f32 %v1604_v27, %v1603_v26 }
0x1232   : > { %v1606_v29 = vrot.slane %v1605_v28, 1 }
0x1234   : > { %v1607_v30 = vadd.f32 %v1606_v29, %v1605_v28 }
0x1236   : > { %v1608_v31 = vmax.f32 %v1607_v30, 1e-30 }
0x1238   : > { %4785 = vlog2.f32 %v1608_v31 }
0x1242   : > { %v4786_v32 = vpop.eup %4785 }
0x1243   : > { %v1610_v33 = vmul.f32 0.6931472, %v4786_v32 }
0x1245   : > { %v1611_v35 = vmul.f32 -0.8333333, %v1610_v33 }
0x1247   : > { %v1612_v36 = vmul.f32 1.442695, %v1611_v35 }
0x1249   : > { %4787 = vpow2.f32 %v1612_v36 }
0x1253   : > { %v4788_v37 = vpop.eup %4787 }
0x1254   : > { %v1614_v38 = vmul.f32 %v4788_v37, %v5604_v62 }
0x1256   : > { %v1616_v39 = vmul.f32 %v1614_v38, %v5631_v4  ;;  %v1615_v41 = vmul.f32 %v1614_v38, %v5621_v58  ;;  %v1617_v44 = vmul.f32 %v1614_v38, %v5637_v14 }
0x1258   : > { %v1621_v42 = vsel %vm915_vm14, %v1616_v39, 0.0  ;;  %v1618_v43 = vsel %vm915_vm14, %v1615_v41, 0.0  ;;  %v1624_v45 = vsel %vm915_vm14, %v1617_v44, 0.0 }
0x1259   : > { %1622 = vadd.xlane.f32.xlu0 %v1621_v42  ;;  %1619 = vadd.xlane.f32.xlu1 %v1618_v43 }
0x125d   : > { %1625 = vadd.xlane.f32.xlu1 %v1624_v45 }
0x12e6   : > { %v1623_v46 = vpop.xlane.xlu0 %1622  ;;  %v1620_v47 = vpop.xlane.xlu1 %1619 }
0x12e7   : > { %v1628_v48 = vmax.f32 %v1623_v46, 1e-30  ;;  %v1627_v49 = vmax.f32 %v1620_v47, 1e-30 }
0x12e9   : > { %4789 = vlog2.f32 %v1628_v48 }
0x12ea   : > { %4791 = vlog2.f32 %v1627_v49  ;;  %v1626_v50 = vpop.xlane.xlu1 %1625 }
0x12eb   : > { %v1629_v51 = vmax.f32 %v1626_v50, 1e-30 }
0x12ed   : > { %4793 = vlog2.f32 %v1629_v51 }
0x12f3   : > { %v4790_v52 = vpop.eup %4789 }
0x12f4   : > { %v4792_v53 = vpop.eup %4791  ;;  %v1633_v54 = vmul.f32 0.6931472, %v4790_v52 }
0x12f5   : > { %v1631_v55 = vmul.f32 0.6931472, %v4792_v53 }
0x12f6   : > { %v1637_v56 = vmul.f32 -0.8333333, %v1633_v54 }
0x12f7   : > { %v4794_v60 = vpop.eup %4793  ;;  %v1636_v61 = vmul.f32 -0.8333333, %v1631_v55 }
0x12f8   : > { %v1641_v63 = vmul.f32 1.442695, %v1637_v56  ;;  %v1635_v3 = vmul.f32 0.6931472, %v4794_v60 }
0x12f9   : > { %v1639_v5 = vmul.f32 1.442695, %v1636_v61 }
0x12fa   : > { %4795 = vpow2.f32 %v1641_v63  ;;  %v1638_v6 = vmul.f32 -0.8333333, %v1635_v3 }
0x12fb   : > { %4797 = vpow2.f32 %v1639_v5 }
0x12fc   : > { %v1643_v7 = vmul.f32 1.442695, %v1638_v6 }
0x12fe   : > { %4799 = vpow2.f32 %v1643_v7 }
0x1304   : > { %v4796_v8 = vpop.eup %4795 }
0x1305   : > { %v4798_v10 = vpop.eup %4797  ;;  %v1646_v13 = vmul.f32 0.17677669, %v4796_v8 }
0x1306   : > { %v1645_v18 = vmul.f32 0.17677669, %v4798_v10 }
0x1307   : > { %v1649_v19 = vmul.f32 %v1646_v13, %v5631_v4 }
0x1308   : > { %v4800_v20 = vpop.eup %4799  ;;  %v1648_v21 = vmul.f32 %v1645_v18, %v5621_v58 }
0x1309   : > { %v1652_v22 = vsel %vm915_vm14, %v1649_v19, 0.0  ;;  %v1647_v23 = vmul.f32 0.31498027, %v4800_v20 }
0x130a   : > { %v1651_v24 = vsel %vm915_vm14, %v1648_v21, 0.0 }
0x130b   : > { %v1650_v26 = vmul.f32 %v1647_v23, %v5637_v14  ;;  %v1653_v27 = vadd.f32 %v1652_v22, %v1651_v24 }
0x130d   : > { %v1654_v28 = vsel %vm915_vm14, %v1650_v26, 0.0 }
0x130e   : > { %v1655_v29 = vadd.f32 %v1654_v28, %v1653_v27 }
0x1310   : > { %v1656_v30 = vrot.slane %v1655_v29, 4 }
0x1312   : > { %v1657_v31 = vadd.f32 %v1656_v30, %v1655_v29 }
0x1314   : > { %v1658_v32 = vrot.slane %v1657_v31, 2 }
0x1316   : > { %v1659_v33 = vadd.f32 %v1658_v32, %v1657_v31 }
0x1318   : > { %v1660_v35 = vrot.slane %v1659_v33, 1 }
0x131a   : > { %v1661_v36 = vadd.f32 %v1660_v35, %v1659_v33 }
0x131c   : > { %v1662_v37 = vmax.f32 %v1661_v36, 1e-30 }
0x131e   : > { %4801 = vlog2.f32 %v1662_v37 }
0x1328   : > { %v4802_v38 = vpop.eup %4801 }
0x1329   : > { %v1664_v39 = vmul.f32 0.6931472, %v4802_v38 }
0x132b   : > { %v1665_v41 = vmul.f32 -0.8333333, %v1664_v39 }
0x132d   : > { %v1666_v42 = vmul.f32 1.442695, %v1665_v41 }
0x132f   : > { %4803 = vpow2.f32 %v1666_v42 }
0x1339   : > { %v4804_v43 = vpop.eup %4803 }
0x133a   : > { %v1668_v44 = vmul.f32 %v4804_v43, %v5604_v62 }
0x133c   : > { %v1670_v45 = vmul.f32 %v1668_v44, %v5631_v4  ;;  %v1669_v46 = vmul.f32 %v1668_v44, %v5621_v58  ;;  %v1671_v49 = vmul.f32 %v1668_v44, %v5637_v14 }
0x133e   : > { %v1675_v47 = vsel %vm915_vm14, %v1670_v45, 0.0  ;;  %v1672_v48 = vsel %vm915_vm14, %v1669_v46, 0.0  ;;  %v1678_v50 = vsel %vm915_vm14, %v1671_v49, 0.0 }
0x133f   : > { %1676 = vadd.xlane.f32.xlu1 %v1675_v47  ;;  %1673 = vadd.xlane.f32.xlu0 %v1672_v48 }
0x1343   : > { %1679 = vadd.xlane.f32.xlu0 %v1678_v50 }
0x13cc   : > { %v1677_v51 = vpop.xlane.xlu1 %1676  ;;  %v1674_v52 = vpop.xlane.xlu0 %1673 }
0x13cd   : > { %v1682_v53 = vmax.f32 %v1677_v51, 1e-30  ;;  %v1681_v54 = vmax.f32 %v1674_v52, 1e-30 }
0x13cf   : > { %4805 = vlog2.f32 %v1682_v53 }
0x13d0   : > { %4807 = vlog2.f32 %v1681_v54  ;;  %v1680_v55 = vpop.xlane.xlu0 %1679 }
0x13d1   : > { %v1683_v56 = vmax.f32 %v1680_v55, 1e-30 }
0x13d3   : > { %4809 = vlog2.f32 %v1683_v56 }
0x13d9   : > { %v4806_v60 = vpop.eup %4805 }
0x13da   : > { %v4808_v61 = vpop.eup %4807  ;;  %v1687_v63 = vmul.f32 0.6931472, %v4806_v60 }
0x13db   : > { %v1685_v3 = vmul.f32 0.6931472, %v4808_v61 }
0x13dc   : > { %v1691_v5 = vmul.f32 -0.8333333, %v1687_v63 }
0x13dd   : > { %v4810_v6 = vpop.eup %4809  ;;  %v1690_v7 = vmul.f32 -0.8333333, %v1685_v3 }
0x13de   : > { %v1695_v8 = vmul.f32 1.442695, %v1691_v5  ;;  %v1689_v10 = vmul.f32 0.6931472, %v4810_v6 }
0x13df   : > { %v1693_v13 = vmul.f32 1.442695, %v1690_v7 }
0x13e0   : > { %4811 = vpow2.f32 %v1695_v8  ;;  %v1692_v18 = vmul.f32 -0.8333333, %v1689_v10 }
0x13e1   : > { %4813 = vpow2.f32 %v1693_v13 }
0x13e2   : > { %v1697_v19 = vmul.f32 1.442695, %v1692_v18 }
0x13e4   : > { %4815 = vpow2.f32 %v1697_v19 }
0x13ea   : > { %v4812_v20 = vpop.eup %4811 }
0x13eb   : > { %v4814_v21 = vpop.eup %4813  ;;  %v1700_v22 = vmul.f32 0.17677669, %v4812_v20 }
0x13ec   : > { %v1699_v23 = vmul.f32 0.17677669, %v4814_v21 }
0x13ed   : > { %v1703_v24 = vmul.f32 %v1700_v22, %v5631_v4 }
0x13ee   : > { %v4816_v26 = vpop.eup %4815  ;;  %v1702_v27 = vmul.f32 %v1699_v23, %v5621_v58 }
0x13ef   : > { %v1706_v28 = vsel %vm915_vm14, %v1703_v24, 0.0  ;;  %v1701_v29 = vmul.f32 0.31498027, %v4816_v26 }
0x13f0   : > { %v1705_v30 = vsel %vm915_vm14, %v1702_v27, 0.0 }
0x13f1   : > { %v1704_v31 = vmul.f32 %v1701_v29, %v5637_v14  ;;  %v1707_v32 = vadd.f32 %v1706_v28, %v1705_v30 }
0x13f3   : > { %v1708_v33 = vsel %vm915_vm14, %v1704_v31, 0.0 }
0x13f4   : > { %v1709_v35 = vadd.f32 %v1708_v33, %v1707_v32 }
0x13f6   : > { %v1710_v36 = vrot.slane %v1709_v35, 4 }
0x13f8   : > { %v1711_v37 = vadd.f32 %v1710_v36, %v1709_v35 }
0x13fa   : > { %v1712_v38 = vrot.slane %v1711_v37, 2 }
0x13fc   : > { %v1713_v39 = vadd.f32 %v1712_v38, %v1711_v37 }
0x13fe   : > { %v1714_v41 = vrot.slane %v1713_v39, 1 }
0x1400   : > { %v1715_v42 = vadd.f32 %v1714_v41, %v1713_v39 }
0x1402   : > { %v1716_v43 = vmax.f32 %v1715_v42, 1e-30 }
0x1404   : > { %4817 = vlog2.f32 %v1716_v43 }
0x140e   : > { %v4818_v44 = vpop.eup %4817 }
0x140f   : > { %v1718_v45 = vmul.f32 0.6931472, %v4818_v44 }
0x1411   : > { %v1719_v46 = vmul.f32 -0.8333333, %v1718_v45 }
0x1413   : > { %v1720_v47 = vmul.f32 1.442695, %v1719_v46 }
0x1415   : > { %4819 = vpow2.f32 %v1720_v47 }
0x141f   : > { %v4820_v48 = vpop.eup %4819 }
0x1420   : > { %v1722_v49 = vmul.f32 %v4820_v48, %v5604_v62 }
0x1422   : > { %v1724_v50 = vmul.f32 %v1722_v49, %v5631_v4  ;;  %v1723_v51 = vmul.f32 %v1722_v49, %v5621_v58  ;;  %v1725_v54 = vmul.f32 %v1722_v49, %v5637_v14 }
0x1424   : > { %v1729_v52 = vsel %vm915_vm14, %v1724_v50, 0.0  ;;  %v1726_v53 = vsel %vm915_vm14, %v1723_v51, 0.0  ;;  %v1732_v55 = vsel %vm915_vm14, %v1725_v54, 0.0 }
0x1425   : > { %1730 = vadd.xlane.f32.xlu0 %v1729_v52  ;;  %1727 = vadd.xlane.f32.xlu1 %v1726_v53 }
0x1429   : > { %1733 = vadd.xlane.f32.xlu1 %v1732_v55 }
0x14b2   : > { %v1731_v56 = vpop.xlane.xlu0 %1730  ;;  %v1728_v60 = vpop.xlane.xlu1 %1727 }
0x14b3   : > { %v1736_v61 = vmax.f32 %v1731_v56, 1e-30  ;;  %v1735_v63 = vmax.f32 %v1728_v60, 1e-30 }
0x14b5   : > { %4821 = vlog2.f32 %v1736_v61 }
0x14b6   : > { %4823 = vlog2.f32 %v1735_v63  ;;  %v1734_v3 = vpop.xlane.xlu1 %1733 }
0x14b7   : > { %v1737_v5 = vmax.f32 %v1734_v3, 1e-30 }
0x14b9   : > { %4825 = vlog2.f32 %v1737_v5 }
0x14bf   : > { %v4822_v6 = vpop.eup %4821 }
0x14c0   : > { %v4824_v7 = vpop.eup %4823  ;;  %v1741_v8 = vmul.f32 0.6931472, %v4822_v6 }
0x14c1   : > { %v1739_v10 = vmul.f32 0.6931472, %v4824_v7 }
0x14c2   : > { %v1745_v13 = vmul.f32 -0.8333333, %v1741_v8 }
0x14c3   : > { %v4826_v18 = vpop.eup %4825  ;;  %v1744_v19 = vmul.f32 -0.8333333, %v1739_v10 }
0x14c4   : > { %v1749_v20 = vmul.f32 1.442695, %v1745_v13  ;;  %v1743_v21 = vmul.f32 0.6931472, %v4826_v18 }
0x14c5   : > { %v1747_v22 = vmul.f32 1.442695, %v1744_v19 }
0x14c6   : > { %4827 = vpow2.f32 %v1749_v20  ;;  %v1746_v23 = vmul.f32 -0.8333333, %v1743_v21 }
0x14c7   : > { %4829 = vpow2.f32 %v1747_v22 }
0x14c8   : > { %v1751_v24 = vmul.f32 1.442695, %v1746_v23 }
0x14ca   : > { %4831 = vpow2.f32 %v1751_v24 }
0x14d0   : > { %v4828_v26 = vpop.eup %4827 }
0x14d1   : > { %v4830_v27 = vpop.eup %4829  ;;  %v1754_v28 = vmul.f32 0.17677669, %v4828_v26 }
0x14d2   : > { %v1753_v29 = vmul.f32 0.17677669, %v4830_v27 }
0x14d3   : > { %v1757_v30 = vmul.f32 %v1754_v28, %v5631_v4 }
0x14d4   : > { %v4832_v31 = vpop.eup %4831  ;;  %v1756_v32 = vmul.f32 %v1753_v29, %v5621_v58 }
0x14d5   : > { %v1760_v33 = vsel %vm915_vm14, %v1757_v30, 0.0  ;;  %v1755_v35 = vmul.f32 0.31498027, %v4832_v31 }
0x14d6   : > { %v1759_v36 = vsel %vm915_vm14, %v1756_v32, 0.0 }
0x14d7   : > { %v1758_v37 = vmul.f32 %v1755_v35, %v5637_v14  ;;  %v1761_v38 = vadd.f32 %v1760_v33, %v1759_v36 }
0x14d9   : > { %v1762_v39 = vsel %vm915_vm14, %v1758_v37, 0.0 }
0x14da   : > { %v1763_v41 = vadd.f32 %v1762_v39, %v1761_v38 }
0x14dc   : > { %v1764_v42 = vrot.slane %v1763_v41, 4 }
0x14de   : > { %v1765_v43 = vadd.f32 %v1764_v42, %v1763_v41 }
0x14e0   : > { %v1766_v44 = vrot.slane %v1765_v43, 2 }
0x14e2   : > { %v1767_v45 = vadd.f32 %v1766_v44, %v1765_v43 }
0x14e4   : > { %v1768_v46 = vrot.slane %v1767_v45, 1 }
0x14e6   : > { %v1769_v47 = vadd.f32 %v1768_v46, %v1767_v45 }
0x14e8   : > { %v1770_v48 = vmax.f32 %v1769_v47, 1e-30 }
0x14ea   : > { %4833 = vlog2.f32 %v1770_v48 }
0x14f4   : > { %v4834_v49 = vpop.eup %4833 }
0x14f5   : > { %v1772_v50 = vmul.f32 0.6931472, %v4834_v49 }
0x14f7   : > { %v1773_v51 = vmul.f32 -0.8333333, %v1772_v50 }
0x14f9   : > { %v1774_v52 = vmul.f32 1.442695, %v1773_v51 }
0x14fb   : > { %4835 = vpow2.f32 %v1774_v52 }
0x1505   : > { %v4836_v53 = vpop.eup %4835 }
0x1506   : > { %v1776_v54 = vmul.f32 %v4836_v53, %v5604_v62 }
0x1508   : > { %v1778_v55 = vmul.f32 %v1776_v54, %v5631_v4  ;;  %v1777_v56 = vmul.f32 %v1776_v54, %v5621_v58  ;;  %v1779_v63 = vmul.f32 %v1776_v54, %v5637_v14 }
0x150a   : > { %v1783_v60 = vsel %vm915_vm14, %v1778_v55, 0.0  ;;  %v1780_v61 = vsel %vm915_vm14, %v1777_v56, 0.0  ;;  %v1786_v3 = vsel %vm915_vm14, %v1779_v63, 0.0 }
0x150b   : > { %1784 = vadd.xlane.f32.xlu1 %v1783_v60  ;;  %1781 = vadd.xlane.f32.xlu0 %v1780_v61 }
0x150f   : > { %1787 = vadd.xlane.f32.xlu0 %v1786_v3 }
0x1598   : > { %v1785_v5 = vpop.xlane.xlu1 %1784  ;;  %v1782_v6 = vpop.xlane.xlu0 %1781 }
0x1599   : > { %v1790_v7 = vmax.f32 %v1785_v5, 1e-30  ;;  %v1789_v8 = vmax.f32 %v1782_v6, 1e-30 }
0x159b   : > { %4837 = vlog2.f32 %v1790_v7 }
0x159c   : > { %4839 = vlog2.f32 %v1789_v8  ;;  %v1788_v10 = vpop.xlane.xlu0 %1787 }
0x159d   : > { %v1791_v13 = vmax.f32 %v1788_v10, 1e-30 }
0x159f   : > { %4841 = vlog2.f32 %v1791_v13 }
0x15a5   : > { %v4838_v18 = vpop.eup %4837 }
0x15a6   : > { %v4840_v19 = vpop.eup %4839  ;;  %v1795_v20 = vmul.f32 0.6931472, %v4838_v18 }
0x15a7   : > { %v1793_v21 = vmul.f32 0.6931472, %v4840_v19 }
0x15a8   : > { %v1799_v22 = vmul.f32 -0.8333333, %v1795_v20 }
0x15a9   : > { %v4842_v23 = vpop.eup %4841  ;;  %v1798_v24 = vmul.f32 -0.8333333, %v1793_v21 }
0x15aa   : > { %v1803_v26 = vmul.f32 1.442695, %v1799_v22  ;;  %v1797_v27 = vmul.f32 0.6931472, %v4842_v23 }
0x15ab   : > { %v1801_v28 = vmul.f32 1.442695, %v1798_v24 }
0x15ac   : > { %4843 = vpow2.f32 %v1803_v26  ;;  %v1800_v29 = vmul.f32 -0.8333333, %v1797_v27 }
0x15ad   : > { %4845 = vpow2.f32 %v1801_v28 }
0x15ae   : > { %v1805_v30 = vmul.f32 1.442695, %v1800_v29 }
0x15b0   : > { %4847 = vpow2.f32 %v1805_v30 }
0x15b6   : > { %v4844_v31 = vpop.eup %4843 }
0x15b7   : > { %v4846_v32 = vpop.eup %4845  ;;  %v1808_v33 = vmul.f32 0.17677669, %v4844_v31 }
0x15b8   : > { %v1807_v35 = vmul.f32 0.17677669, %v4846_v32 }
0x15b9   : > { %v1811_v36 = vmul.f32 %v1808_v33, %v5631_v4 }
0x15ba   : > { %v4848_v37 = vpop.eup %4847  ;;  %v1810_v38 = vmul.f32 %v1807_v35, %v5621_v58 }
0x15bb   : > { %v1814_v39 = vsel %vm915_vm14, %v1811_v36, 0.0  ;;  %v1809_v41 = vmul.f32 0.31498027, %v4848_v37 }
0x15bc   : > { %v1813_v42 = vsel %vm915_vm14, %v1810_v38, 0.0 }
0x15bd   : > { %v1812_v43 = vmul.f32 %v1809_v41, %v5637_v14  ;;  %v1815_v44 = vadd.f32 %v1814_v39, %v1813_v42 }
0x15bf   : > { %v1816_v45 = vsel %vm915_vm14, %v1812_v43, 0.0 }
0x15c0   : > { %v1817_v46 = vadd.f32 %v1816_v45, %v1815_v44 }
0x15c2   : > { %v1818_v47 = vrot.slane %v1817_v46, 4 }
0x15c4   : > { %v1819_v48 = vadd.f32 %v1818_v47, %v1817_v46 }
0x15c6   : > { %v1820_v49 = vrot.slane %v1819_v48, 2 }
0x15c8   : > { %v1821_v50 = vadd.f32 %v1820_v49, %v1819_v48 }
0x15ca   : > { %v1822_v51 = vrot.slane %v1821_v50, 1 }
0x15cc   : > { %v1823_v52 = vadd.f32 %v1822_v51, %v1821_v50 }
0x15ce   : > { %v1824_v53 = vmax.f32 %v1823_v52, 1e-30 }
0x15d0   : > { %4849 = vlog2.f32 %v1824_v53 }
0x15da   : > { %v4850_v54 = vpop.eup %4849 }
0x15db   : > { %v1826_v55 = vmul.f32 0.6931472, %v4850_v54 }
0x15dd   : > { %v1827_v56 = vmul.f32 -0.8333333, %v1826_v55 }
0x15df   : > { %v1828_v60 = vmul.f32 1.442695, %v1827_v56 }
0x15e1   : > { %4851 = vpow2.f32 %v1828_v60 }
0x15eb   : > { %v4852_v61 = vpop.eup %4851 }
0x15ec   : > { %v1830_v63 = vmul.f32 %v4852_v61, %v5604_v62 }
0x15ee   : > { %v1832_v3 = vmul.f32 %v1830_v63, %v5631_v4  ;;  %v1831_v5 = vmul.f32 %v1830_v63, %v5621_v58  ;;  %v1833_v8 = vmul.f32 %v1830_v63, %v5637_v14 }
0x15f0   : > { %v1837_v6 = vsel %vm915_vm14, %v1832_v3, 0.0  ;;  %v1834_v7 = vsel %vm915_vm14, %v1831_v5, 0.0  ;;  %v1840_v10 = vsel %vm915_vm14, %v1833_v8, 0.0 }
0x15f1   : > { %1838 = vadd.xlane.f32.xlu0 %v1837_v6  ;;  %1835 = vadd.xlane.f32.xlu1 %v1834_v7 }
0x15f5   : > { %1841 = vadd.xlane.f32.xlu1 %v1840_v10 }
0x167e   : > { %v1839_v13 = vpop.xlane.xlu0 %1838  ;;  %v1836_v18 = vpop.xlane.xlu1 %1835 }
0x167f   : > { %v1844_v19 = vmax.f32 %v1839_v13, 1e-30  ;;  %v1843_v20 = vmax.f32 %v1836_v18, 1e-30 }
0x1681   : > { %4853 = vlog2.f32 %v1844_v19 }
0x1682   : > { %4855 = vlog2.f32 %v1843_v20  ;;  %v1842_v21 = vpop.xlane.xlu1 %1841 }
0x1683   : > { %v1845_v22 = vmax.f32 %v1842_v21, 1e-30 }
0x1685   : > { %4857 = vlog2.f32 %v1845_v22 }
0x168b   : > { %v4854_v23 = vpop.eup %4853 }
0x168c   : > { %v4856_v24 = vpop.eup %4855  ;;  %v1849_v26 = vmul.f32 0.6931472, %v4854_v23 }
0x168d   : > { %v1847_v27 = vmul.f32 0.6931472, %v4856_v24 }
0x168e   : > { %v1853_v28 = vmul.f32 -0.8333333, %v1849_v26 }
0x168f   : > { %v4858_v29 = vpop.eup %4857  ;;  %v1852_v30 = vmul.f32 -0.8333333, %v1847_v27 }
0x1690   : > { %v1857_v31 = vmul.f32 1.442695, %v1853_v28  ;;  %v1851_v32 = vmul.f32 0.6931472, %v4858_v29 }
0x1691   : > { %v1855_v33 = vmul.f32 1.442695, %v1852_v30 }
0x1692   : > { %4859 = vpow2.f32 %v1857_v31  ;;  %v1854_v35 = vmul.f32 -0.8333333, %v1851_v32 }
0x1693   : > { %4861 = vpow2.f32 %v1855_v33 }
0x1694   : > { %v1859_v36 = vmul.f32 1.442695, %v1854_v35 }
0x1696   : > { %4863 = vpow2.f32 %v1859_v36 }
0x169c   : > { %v4860_v37 = vpop.eup %4859 }
0x169d   : > { %v4862_v38 = vpop.eup %4861  ;;  %v1862_v39 = vmul.f32 0.17677669, %v4860_v37 }
0x169e   : > { %v1861_v41 = vmul.f32 0.17677669, %v4862_v38 }
0x169f   : > { %v1865_v42 = vmul.f32 %v1862_v39, %v5631_v4 }
0x16a0   : > { %v4864_v43 = vpop.eup %4863  ;;  %v1864_v44 = vmul.f32 %v1861_v41, %v5621_v58 }
0x16a1   : > { %v1868_v45 = vsel %vm915_vm14, %v1865_v42, 0.0  ;;  %v1863_v46 = vmul.f32 0.31498027, %v4864_v43 }
0x16a2   : > { %v1867_v47 = vsel %vm915_vm14, %v1864_v44, 0.0 }
0x16a3   : > { %v1866_v48 = vmul.f32 %v1863_v46, %v5637_v14  ;;  %v1869_v49 = vadd.f32 %v1868_v45, %v1867_v47 }
0x16a5   : > { %v1870_v50 = vsel %vm915_vm14, %v1866_v48, 0.0 }
0x16a6   : > { %v1871_v51 = vadd.f32 %v1870_v50, %v1869_v49 }
0x16a8   : > { %v1872_v52 = vrot.slane %v1871_v51, 4 }
0x16aa   : > { %v1873_v53 = vadd.f32 %v1872_v52, %v1871_v51 }
0x16ac   : > { %v1874_v54 = vrot.slane %v1873_v53, 2 }
0x16ae   : > { %v1875_v55 = vadd.f32 %v1874_v54, %v1873_v53 }
0x16b0   : > { %v1876_v56 = vrot.slane %v1875_v55, 1 }
0x16b2   : > { %v1877_v60 = vadd.f32 %v1876_v56, %v1875_v55 }
0x16b4   : > { %v1878_v61 = vmax.f32 %v1877_v60, 1e-30 }
0x16b6   : > { %4865 = vlog2.f32 %v1878_v61 }
0x16c0   : > { %v4866_v63 = vpop.eup %4865 }
0x16c1   : > { %v1880_v3 = vmul.f32 0.6931472, %v4866_v63 }
0x16c3   : > { %v1881_v5 = vmul.f32 -0.8333333, %v1880_v3 }
0x16c5   : > { %v1882_v6 = vmul.f32 1.442695, %v1881_v5 }
0x16c7   : > { %4867 = vpow2.f32 %v1882_v6 }
0x16d1   : > { %v4868_v7 = vpop.eup %4867 }
0x16d2   : > { %v1884_v8 = vmul.f32 %v4868_v7, %v5604_v62 }
0x16d4   : > { %v1886_v10 = vmul.f32 %v1884_v8, %v5631_v4  ;;  %v1885_v13 = vmul.f32 %v1884_v8, %v5621_v58  ;;  %v1887_v20 = vmul.f32 %v1884_v8, %v5637_v14 }
0x16d6   : > { %v1891_v18 = vsel %vm915_vm14, %v1886_v10, 0.0  ;;  %v1888_v19 = vsel %vm915_vm14, %v1885_v13, 0.0  ;;  %v1894_v21 = vsel %vm915_vm14, %v1887_v20, 0.0 }
0x16d7   : > { %1892 = vadd.xlane.f32.xlu1 %v1891_v18  ;;  %1889 = vadd.xlane.f32.xlu0 %v1888_v19 }
0x16db   : > { %1895 = vadd.xlane.f32.xlu0 %v1894_v21 }
0x1764   : > { %v1893_v22 = vpop.xlane.xlu1 %1892  ;;  %v1890_v23 = vpop.xlane.xlu0 %1889 }
0x1765   : > { %v1898_v24 = vmax.f32 %v1893_v22, 1e-30  ;;  %v1897_v26 = vmax.f32 %v1890_v23, 1e-30 }
0x1767   : > { %4869 = vlog2.f32 %v1898_v24 }
0x1768   : > { %4871 = vlog2.f32 %v1897_v26  ;;  %v1896_v27 = vpop.xlane.xlu0 %1895 }
0x1769   : > { %v1899_v28 = vmax.f32 %v1896_v27, 1e-30 }
0x176b   : > { %4873 = vlog2.f32 %v1899_v28  ;;  %v2043_v28 = vand.u32 2147483647, %v5207_v2 }
0x1771   : > { %v4870_v29 = vpop.eup %4869 }
0x1772   : > { %v4872_v30 = vpop.eup %4871  ;;  %v1903_v31 = vmul.f32 0.6931472, %v4870_v29  ;;  %v2044_v29 = vsel %vm915_vm14, %v2043_v28, -inf }
0x1773   : > { %v1901_v32 = vmul.f32 0.6931472, %v4872_v30 }
0x1774   : > { %v1907_v33 = vmul.f32 -0.8333333, %v1903_v31 }
0x1775   : > { %v4874_v35 = vpop.eup %4873  ;;  %v1906_v36 = vmul.f32 -0.8333333, %v1901_v32 }
0x1776   : > { %v1911_v37 = vmul.f32 1.442695, %v1907_v33  ;;  %v1905_v38 = vmul.f32 0.6931472, %v4874_v35 }
0x1777   : > { %v1909_v39 = vmul.f32 1.442695, %v1906_v36 }
0x1778   : > { %4875 = vpow2.f32 %v1911_v37  ;;  %v1908_v41 = vmul.f32 -0.8333333, %v1905_v38 }
0x1779   : > { %4877 = vpow2.f32 %v1909_v39 }
0x177a   : > { %v1913_v42 = vmul.f32 1.442695, %v1908_v41 }
0x177c   : > { %4879 = vpow2.f32 %v1913_v42 }
0x1782   : > { %v4876_v43 = vpop.eup %4875 }
0x1783   : > { %v4878_v44 = vpop.eup %4877  ;;  %v1916_v45 = vmul.f32 0.17677669, %v4876_v43 }
0x1784   : > { %v1915_v46 = vmul.f32 0.17677669, %v4878_v44 }
0x1785   : > { %v1919_v47 = vmul.f32 %v1916_v45, %v5631_v4  ;;  %v2005_v45 = vand.u32 2147483647, %v5219_v17 }
0x1786   : > { %v4880_v48 = vpop.eup %4879  ;;  %v1918_v49 = vmul.f32 %v1915_v46, %v5621_v58 }
0x1787   : > { %v1922_v50 = vsel %vm915_vm14, %v1919_v47, 0.0  ;;  %v1917_v51 = vmul.f32 0.31498027, %v4880_v48  ;;  %v2006_v48 = vand.u32 2147483647, %v5215_v16 }
0x1788   : > { %v1921_v52 = vsel %vm915_vm14, %v1918_v49, 0.0 }
0x1789   : > { %v1920_v53 = vmul.f32 %v1917_v51, %v5637_v14  ;;  %v1923_v54 = vadd.f32 %v1922_v50, %v1921_v52  ;;  %v2007_v52 = vand.u32 2147483647, %v5211_v15 }
0x178b   : > { %v1924_v55 = vsel %vm915_vm14, %v1920_v53, 0.0  ;;  %v2008_v53 = vmax.f32.f32 %v2005_v45, %v2006_v48 }
0x178c   : > { %v1925_v56 = vadd.f32 %v1924_v55, %v1923_v54 }
0x178d   : > { %v2009_v54 = vmax.f32.f32 %v2008_v53, %v2007_v52 }
0x178e   : > { %v1926_v60 = vrot.slane %v1925_v56, 4 }
0x1790   : > { %v1927_v61 = vadd.f32 %v1926_v60, %v1925_v56  ;;  %v2010_v56 = vrot.slane %v2009_v54, 4 }
0x1792   : > { %v1928_v63 = vrot.slane %v1927_v61, 2 }
0x1794   : > { %v1929_v3 = vadd.f32 %v1928_v63, %v1927_v61 }
0x1796   : > { %v1930_v5 = vrot.slane %v1929_v3, 1 }
0x1798   : > { %v1931_v6 = vadd.f32 %v1930_v5, %v1929_v3 }
0x179a   : > { %v1932_v7 = vmax.f32 %v1931_v6, 1e-30 }
0x179c   : > { %4881 = vlog2.f32 %v1932_v7 }
0x17a6   : > { %v4882_v8 = vpop.eup %4881 }
0x17a7   : > { %v1934_v10 = vmul.f32 0.6931472, %v4882_v8 }
0x17a9   : > { %v1935_v13 = vmul.f32 -0.8333333, %v1934_v10 }
0x17ab   : > { %v1936_v18 = vmul.f32 1.442695, %v1935_v13  ;;  %v2011_v13 = vmax.f32 %v2009_v54, %v2010_v56 }
0x17ad   : > { %4883 = vpow2.f32 %v1936_v18 }
0x17b7   : > { %v4884_v19 = vpop.eup %4883 }
0x17b8   : > { %v1938_v20 = vmul.f32 %v4884_v19, %v5604_v62 }
0x17ba   : > { %v1940_v21 = vmul.f32 %v1938_v20, %v5631_v4  ;;  %v1939_v22 = vmul.f32 %v1938_v20, %v5621_v58  ;;  %v1941_v26 = vmul.f32 %v1938_v20, %v5637_v14 }
0x17bc   : > { %v1945_v23 = vsel %vm915_vm14, %v1940_v21, 0.0  ;;  %v1942_v24 = vsel %vm915_vm14, %v1939_v22, 0.0  ;;  %v1948_v27 = vsel %vm915_vm14, %v1941_v26, 0.0 }
0x17bd   : > { %1946 = vadd.xlane.f32.xlu0 %v1945_v23  ;;  %1943 = vadd.xlane.f32.xlu1 %v1942_v24 }
0x17c1   : > { %1949 = vadd.xlane.f32.xlu1 %v1948_v27 }
0x17c5   : > { %2045 = vmax.xlane.f32.xlu1 %v2044_v29  ;;  %v2012_v29 = vrot.slane %v2011_v13, 2 }
0x184a   : > { %v1947_v30 = vpop.xlane.xlu0 %1946  ;;  %v1944_v31 = vpop.xlane.xlu1 %1943 }
0x184b   : > { %v1952_v32 = vmax.f32 %v1947_v30, 1e-30  ;;  %v1951_v33 = vmax.f32 %v1944_v31, 1e-30 }
0x184d   : > { %4885 = vlog2.f32 %v1952_v32 }
0x184e   : > { %4887 = vlog2.f32 %v1951_v33  ;;  %v1950_v35 = vpop.xlane.xlu1 %1949 }
0x184f   : > { %v1953_v36 = vmax.f32 %v1950_v35, 1e-30 }
0x1851   : > { %4889 = vlog2.f32 %v1953_v36 }
0x1857   : > { %v4886_v37 = vpop.eup %4885 }
0x1858   : > { %v4888_v38 = vpop.eup %4887  ;;  %v1957_v39 = vmul.f32 0.6931472, %v4886_v37 }
0x1859   : > { %v1955_v41 = vmul.f32 0.6931472, %v4888_v38  ;;  %v2013_v38 = vmax.f32 %v2011_v13, %v2012_v29 }
0x185a   : > { %v1961_v42 = vmul.f32 -0.8333333, %v1957_v39 }
0x185b   : > { %v4890_v43 = vpop.eup %4889  ;;  %v1960_v44 = vmul.f32 -0.8333333, %v1955_v41  ;;  %v2014_v45 = vrot.slane %v2013_v38, 1 }
0x185c   : > { %v1965_v46 = vmul.f32 1.442695, %v1961_v42  ;;  %v1959_v47 = vmul.f32 0.6931472, %v4890_v43 }
0x185d   : > { %v1963_v49 = vmul.f32 1.442695, %v1960_v44 }
0x185e   : > { %4891 = vpow2.f32 %v1965_v46  ;;  %v1962_v50 = vmul.f32 -0.8333333, %v1959_v47 }
0x185f   : > { %4893 = vpow2.f32 %v1963_v49 }
0x1860   : > { %v1967_v51 = vmul.f32 1.442695, %v1962_v50 }
0x1862   : > { %4895 = vpow2.f32 %v1967_v51  ;;  %v2015_v51 = vmax.f32 %v2013_v38, %v2014_v45 }
0x1868   : > { %v4892_v55 = vpop.eup %4891 }
0x1869   : > { %v4894_v60 = vpop.eup %4893  ;;  %v5926_v61 = vmul.f32 0.17677669, %v4892_v55  }
0x186a   : > { %v5928_v63 = vmul.f32 0.17677669, %v4894_v60  }
0x186b   : > { %v1973_v3 = vmul.f32 %v5926_v61, %v5631_v4  ;;  %v1994_v5 = vand.u32 2147483647, %v5926_v61  ;;  %v2020_v6 = vsub.f32 %v5926_v61, %v5215_v16 }
0x186c   : > { %v4896_v7 = vpop.eup %4895  ;;  %v1972_v8 = vmul.f32 %v5928_v63, %v5621_v58  ;;  %v1993_v10 = vand.u32 2147483647, %v5928_v63  ;;  %v2019_v18 = vsub.f32 %v5928_v63, %v5219_v17 }
0x186d   : > { %v1976_v19 = vsel %vm915_vm14, %v1973_v3, 0.0  ;;  %v5941_v20 = vmul.f32 0.31498027, %v4896_v7   ;;  %v2023_v21 = vand.u32 2147483647, %v2020_v6 }
0x186e   : > { %v1975_v22 = vsel %vm915_vm14, %v1972_v8, 0.0  ;;  %v2022_v23 = vand.u32 2147483647, %v2019_v18  ;;  %v1996_v26 = vmax.f32.f32 %v1993_v10, %v1994_v5 }
0x186f   : > { %v1974_v16 = vmul.f32 %v5941_v20, %v5637_v14  ;;  %v1995_v24 = vand.u32 2147483647, %v5941_v20  ;;  %v2021_v27 = vsub.f32 %v5941_v20, %v5211_v15  ;;  %v1977_v28 = vadd.f32 %v1976_v19, %v1975_v22 }
0x1870   : > { %v2025_v32 = vmax.f32.f32 %v2022_v23, %v2023_v21 }
0x1871   : > { %v1978_v17 = vsel %vm915_vm14, %v1974_v16, 0.0  ;;  %v1997_v30 = vmax.f32.f32 %v1996_v26, %v1995_v24  ;;  %v2024_v31 = vand.u32 2147483647, %v2021_v27  ;;  %v2046_v24 = vpop.xlane.xlu1 %2045 }
0x1872   : > { %v1979_v33 = vadd.f32 %v1978_v17, %v1977_v28  ;;  %v6284_v17 = vmov %v5928_v63 }
0x1873   : > { %v1998_v35 = vrot.slane %v1997_v30, 4  ;;  %v2026_v36 = vmax.f32.f32 %v2025_v32, %v2024_v31 }
0x1874   : > { %v1980_v37 = vrot.slane %v1979_v33, 4 }
0x1875   : > { %v1999_v39 = vmax.f32 %v1997_v30, %v1998_v35  ;;  %v2027_v41 = vrot.slane %v2026_v36, 4 }
0x1876   : > { %v1981_v42 = vadd.f32 %v1980_v37, %v1979_v33 }
0x1877   : > { %v2000_v43 = vrot.slane %v1999_v39, 2  ;;  %v2028_v44 = vmax.f32 %v2026_v36, %v2027_v41 }
0x1878   : > { %v1982_v46 = vrot.slane %v1981_v42, 2 }
0x1879   : > { %v2001_v15 = vmax.f32 %v1999_v39, %v2000_v43  ;;  %v2029_v47 = vrot.slane %v2028_v44, 2 }
0x187a   : > { %v1983_v48 = vadd.f32 %v1982_v46, %v1981_v42 }
0x187b   : > { %v2002_v49 = vrot.slane %v2001_v15, 1  ;;  %v2030_v50 = vmax.f32 %v2028_v44, %v2029_v47 }
0x187c   : > { %v1984_v52 = vrot.slane %v1983_v48, 1 }
0x187d   : > { %v2003_v53 = vmax.f32 %v2001_v15, %v2002_v49  ;;  %v2031_v54 = vrot.slane %v2030_v50, 1  ;;  %v6282_v15 = vmov %v5941_v20 }
0x187e   : > { %v1985_v55 = vadd.f32 %v1984_v52, %v1983_v48 }
0x187f   : > { %4485 = vpush %v2003_v53  ;;  %v2032_v56 = vmax.f32 %v2030_v50, %v2031_v54 }
0x1880   : > { %4487 = vpush %v2015_v51  ;;  %v1986_v60 = vmax.f32 %v1985_v55, 1e-30 }
0x1881   : > { %4489 = vpush %v2032_v56 }
0x1882   : > { %4897 = vlog2.f32 %v1986_v60 }
0x188c   : > { %v4898_v3 = vpop.eup %4897 }
0x188d   : > { %v1988_v5 = vmul.f32 0.6931472, %v4898_v3 }
0x188f   : > { %v1989_v6 = vmul.f32 -0.8333333, %v1988_v5 }
0x1891   : > { %v1990_v7 = vmul.f32 1.442695, %v1989_v6 }
0x1893   : > { %4899 = vpow2.f32 %v1990_v7 }
0x189d   : > { %v4900_v8 = vpop.eup %4899 }
0x189e   : > { %v5951_v10 = vmul.f32 %v4900_v8, %v5604_v62  }
0x18a0   : > { %v2038_v13 = vand.u32 2147483647, %v5951_v10  ;;  %v2050_v18 = vsub.f32 %v5951_v10, %v5207_v2 }
0x18a2   : > { %v2039_v19 = vsel %vm915_vm14, %v2038_v13, -inf  ;;  %v2051_v21 = vand.u32 2147483647, %v2050_v18 }
0x18a3   : > { %2040 = vmax.xlane.f32.xlu0 %v2039_v19 }
0x18a4   : > { %v2052_v22 = vsel %vm915_vm14, %v2051_v21, -inf }
0x18a7   : > { %2053 = vmax.xlane.f32.xlu0 %v2052_v22 }
0x18b0   : > { %s4486_s27 = spop %4485 }
0x18b1   : > { %s4488_s19 = spop %4487 }
0x18b2   : > { %s2017_s22 = smax.f32 %s4488_s19, %s4486_s27  ;;  %s4490_s10 = spop %4489 }
0x18b3   : > { %s2018_s21 = smax.f32 %s5246_s9, %s2017_s22 }
0x18b4   : > { %v2034_v23 = vstv %s2018_s21 }
0x18b5   : > { %4901 = vrcp.f32 %v2034_v23 }
0x18bf   : > { %v4902_v16 = vpop.eup %4901 }
0x18c0   : > { %4491 = vpush %v4902_v16  ;;  %v6283_v16 = vmov %v5926_v61 }
0x18f1   : > { %s4492_s4 = spop %4491 }
0x18f2   : > { %s2037_s7 = smul.f32 %s4492_s4, %s4490_s10 }
0x1930   : > { %v2041_v26 = vpop.xlane.xlu0 %2040 }
0x1931   : > { %4493 = vpush %v2041_v26 }
0x1932   : > { %4495 = vpush %v2046_v24 }
0x1934   : > { %v2054_v2 = vpop.xlane.xlu0 %2053 }
0x1935   : > { %4497 = vpush %v2054_v2  ;;  %v6281_v2 = vmov %v5951_v10 }
0x1962   : > { %s4494_s8 = spop %4493 }
0x1963   : > { %s4496_s5 = spop %4495 }
0x1964   : > { %s2048_s25 = smax.f32 %s4496_s5, %s4494_s8 }
0x1965   : > { %s2049_s2 = smax.f32 %s5246_s9, %s2048_s25 }
0x1966   : > { %v2056_v27 = vstv %s2049_s2  ;;  %s4498_s23 = spop %4497 }
0x1967   : > { %4903 = vrcp.f32 %v2056_v27 }
0x1971   : > { %v4904_v28 = vpop.eup %4903 }
0x1972   : > { %4499 = vpush %v4904_v28 }
0x19a3   : > { %s4500_s29 = spop %4499 }
0x19a4   : > { %s2059_s24 = smul.f32 %s4500_s29, %s4498_s23 }
0x19a6   : > { %s2060_s28 = smax.f32 %s2059_s24, %s2037_s7 }
0x19a7   : > { %p907_p9 = scmp.ge.f32.partialorder %s2060_s28, 1e-06 }
0x19a9   : > { %p908_p10 = pnand %p907_p9, %p906_p8 }
0x19aa   :  { %4250 = vmatprep.subr.mxu0 (%p908_p10), %v5237_v1  ;;  %4245 = vmatprep.subr.mxu1 (%p908_p10), %v5237_v1  ;;  %s5247_s3 = smov (%p908_p10), 120   ;;  %v5248_v29 = vmov (%p908_p10), 0   ;;  %v2062_v58 = vmul.f32 (%p908_p10), %v5617_v57, %v5928_v63  ;;  %v2373_v50 = vld [vmem:[#allocation14] sm:$0xff] (%p908_p10)  ;;  %v2374_v51 = vld [vmem:[#allocation14 + $0x8] sm:$0xff] (%p908_p10)  ;;  %v2375_v52 = vld [vmem:[#allocation14 + $0x10] sm:$0xff] (%p908_p10)  ;;  %s5249_s1 = smov (%p908_p10), 112  }
0x19ab   :  { %911 = sbr.rel (!%p908_p10) target bundleno = 1702 (0x6a6), region = 131  ;;  %2170 = vrot.lane.b32.xlu0 (%p908_p10), %v5951_v10, %s5247_s3  ;;  %4905 = vset.pattern.permute.xlu1 (%p908_p10), %v5248_v29  ;;  %v5997_v53 = vpack.c.bf16 (%p908_p10), %v2374_v51, %v2373_v50  ;;  %v2376_v54 = vld [vmem:[#allocation14 + $0x18] sm:$0xff] (%p908_p10)  ;;  %vm6019_vm15 = vmpackc.low (%p908_p10), %vm869_vm12, %vm869_vm12  ;;  %vm2549_vm1 = vcmask (%p908_p10), 97280   ;;  %vm2553_vm2 = vcmask (%p908_p10), 93184   ;;  %vm5250_vm3 = vmmov (%p908_p10), 1   ;;  %s5251_s20 = smov (%p908_p10), 124  }
0x19ac   :  { %4251 = vmatpush3.msk.msra.mxu0 (%p908_p10), %vm879_vm13, %v5578_v34  ;;  %4252 = vmatprep.mubr.msk.f32.mxu0 (%p908_p10), %vm5236_vm0, %v5237_v1  ;;  %v2063_v4 = vmul.f32 (%p908_p10), %v2062_v58, %v5951_v10  ;;  %v5999_v55 = vpack.c.bf16 (%p908_p10), %v2376_v54, %v2375_v52  ;;  %v6005_v13 = vld [vmem:[#allocation11] ss:$0 sm:$0xff] (%p908_p10)  ;;  %v6007_v22 = vld [vmem:[#allocation13] ss:$0 sm:$0xff] (%p908_p10)  ;;  %vm6034_vm5 = vmpackc.low (%p908_p10), %vm879_vm13, %vm5250_vm3  ;;  %vm2666_vm7 = vcmask (%p908_p10), 125952  }
0x19ad   :  { %4246 = vmatpush3.msra.mxu1 (%p908_p10), %v5573_v25  ;;  %4247 = vmatprep.mubr.msk.f32.mxu1 (%p908_p10), %vm5236_vm0, %v5237_v1 }
0x19ae   :  { %4418 = vmatprep.subr.bf16.mxu1 (%p908_p10), %v5997_v53 }
0x1a1d   :  { %v2171_v62 = vpop.permute.xlu0 %2170 }
0x1a1e   :  { %2173 = vxpose.xlu0.b32.start.end [1/1] (short) (narrow) %v2171_v62, 8 }
0x1a22   :  { %2064 = vxpose.xlu0.b32.start.end [1/1] (short) (narrow) %v2063_v4, 8 }
0x1a9e   :  { %v2189_v14 = vpop.trf.xlu0 }
0x1a9f   :  { %2207 = vperm.xlu1 %4905, %v2189_v14  }
0x1aa2   :  { %v2080_v34 = vpop.trf.xlu0 }
0x1aa3   :  { %4248 = vmatmul.mubr.msk.f32.vlgmr.msra.gmra.mrb[6].mxu1 %vm862_vm11, %v2080_v34 }
0x1aa4   :  { %4420 = vmatpush3.bf16.msra.mxu1 %v5997_v53 }
0x1aa5   :  { %4422 = vmatprep.subr.bf16.mxu1 %v5999_v55 }
0x1aa8   :  { %4424 = vmatpush3.bf16.msra.mxu1 %v5999_v55 }
0x1ac8   :  { %2211 = vxpose.xlu1.b32.start.end [1/1] (short) (narrow) %v5941_v20, 8 }
0x1b1e   :  { %v2208_v17 = vpop.permute.xlu1 %2207 }
0x1b1f   :  { %v2210_v30 = vmul.f32 %v5617_v57, %v2208_v17 }
0x1b48   :  { %v2227_v25 = vpop.trf.xlu1 }
0x1b49   :  { %v2246_v31 = vrot.slane %v2227_v25, %v5611_v12 }
0x1b4b   :  { %v2247_v32 = vmul.f32 %v2246_v31, %v2210_v30 }
0x1b4d   :  { %4253 = vmatmul.mubr.msk.f32.vlgmr.msra.gmra.mrb[4].mxu0 %vm608_vm10, %v2247_v32 }
0x1b76   :  { %v2165_v63 = vpop.f32.mrb[6].mxu1 }
0x1b77   :  { %v4249_v33 = vpop.f32.mrb[7].mxu1 }
0x1c20   :  { %v2320_v35 = vpop.f32.mrb[4].mxu0 }
0x1c21   :  { %v2325_v36 = vrot.slane %v2320_v35, 4  ;;  %v4254_v37 = vpop.f32.mrb[5].mxu0 }
0x1c23   :  { %v2327_v38 = vsel %vm879_vm13, %v2165_v63, %v2325_v36  ;;  %v2333_v39 = vsel %vm479_vm8, %v2325_v36, 0.0 }
0x1c24   :  { %2334 = vadd.xlane.f32.xlu1 %v2333_v39  ;;  %v2330_v41 = vsel %vm474_vm4, %v2327_v38, 0.0 }
0x1c25   :  { %2331 = vadd.xlane.f32.xlu0 %v2330_v41 }
0x1cb1   :  { %v2335_v42 = vpop.xlane.xlu1 %2334 }
0x1cb2   :  { %v2338_v57 = vmul.f32 0.03125, %v2335_v42  ;;  %v2332_v43 = vpop.xlane.xlu0 %2331 }
0x1cb3   :  { %v2337_v44 = vmul.f32 0.03125, %v2332_v43 }
0x1cb4   :  { %v2340_v45 = vsub.f32 %v2325_v36, %v2338_v57 }
0x1cb5   :  { %v2339_v46 = vsub.f32 %v2327_v38, %v2337_v44 }
0x1cb6   :  { %v2342_v15 = vmul.f32 %v2340_v45, %v2340_v45 }
0x1cb7   :  { %v2341_v47 = vmul.f32 %v2339_v46, %v2339_v46 }
0x1cb8   :  { %v2346_v48 = vsel %vm479_vm8, %v2342_v15, 0.0 }
0x1cb9   :  { %2347 = vadd.xlane.f32.xlu1 %v2346_v48  ;;  %v2343_v49 = vsel %vm474_vm4, %v2341_v47, 0.0 }
0x1cba   :  { %2344 = vadd.xlane.f32.xlu0 %v2343_v49 }
0x1d46   :  { %v2348_v56 = vpop.xlane.xlu1 %2347 }
0x1d47   :  { %v2350_v60 = vmul.f32 0.03125, %v2348_v56  ;;  %v2345_v3 = vpop.xlane.xlu0 %2344 }
0x1d48   :  { %v2349_v5 = vmul.f32 0.03125, %v2345_v3 }
0x1d49   :  { %v2352_v6 = vadd.f32 1e-05, %v2350_v60 }
0x1d4a   :  { %v2351_v7 = vadd.f32 1e-05, %v2349_v5 }
0x1d4b   :  { %4927 = vrsqrt.f32 %v2352_v6 }
0x1d4c   :  { %4929 = vrsqrt.f32 %v2351_v7 }
0x1d55   :  { %v4928_v8 = vpop.eup %4927 }
0x1d56   :  { %v4930_v18 = vpop.eup %4929  ;;  %v2356_v19 = vmul.f32 %v4928_v8, %v2340_v45 }
0x1d57   :  { %v2355_v21 = vmul.f32 %v4930_v18, %v2339_v46 }
0x1d58   :  { %v2364_v23 = vmul.f32 %v6005_v13, %v2356_v19 }
0x1d59   :  { %v2363_v16 = vmul.f32 %v6005_v13, %v2355_v21 }
0x1d5a   :  { %v2372_v26 = vadd.f32 %v6007_v22, %v2364_v23 }
0x1d5b   :  { %v2371_v24 = vadd.f32 %v6007_v22, %v2363_v16 }
0x1d5d   :  { %4263 = vmatprep.mubr.msk.f32.mxu1 %vm474_vm4, %v2371_v24  ;;  %v3193_v24 = vrot.slane %v5941_v20, 4 }
0x1d5e   :  { %4264 = vmatmul.mubr.msk.f32.vlgmr.msra.gmra.mrb[8].mxu1 %vm474_vm4, %v2372_v26 }
0x1e31   :  { %v4265_v2 = vpop.f32.mrb[8].mxu1 }
0x1e32   :  { %v2449_v27 = vpop.f32.mrb[9].mxu1 }
0x1e33   :  { %v4906_v28 = vpack.i.bf16 %v4265_v2, %v2449_v27  ;;  %4270 = vmatprep.mubr.msk.f32.mxu0 %vm869_vm12, %v2449_v27 }
0x1e35   :  { %4907 = vrot.lane.b32.xlu0 %v4906_v28, %s5249_s1 }
0x1ea7   :  { %v4908_v62 = vpop.permute.xlu0 %4907 }
0x1ea8   :  { %v4910_v58 = vunpack.i.h.bf16 %v4908_v62  ;;  %v4909_v4 = vunpack.i.l.bf16 %v4908_v62  ;;  %v2708_v62 = vld [vmem:[%s6264_s13 + $0x8] sm:$0xff] }
0x1eaa   :  { %v4425_v34 = vpack.c.bf16 %v4910_v58, %v4909_v4 }
0x1eac   :  { %4427 = vmatprep.subr.msk.bf16.mxu0 %vm6019_vm15, %v4425_v34 }
0x1ead   :  { %4430 = vmatpush3.bf16.xpose.msk.msra.mxu0 %vm6019_vm15, %v4425_v34 }
0x1eb4   :  { %4271 = vmatmul.mubr.msk.f32.vlgmr.msra.gmra.mrb[6].mxu0 %vm869_vm12, %v4265_v2 }
0x1f87   :  { %v4272_v17 = vpop.f32.mrb[6].mxu0 }
0x1f88   :  { %v2538_v25 = vpop.f32.mrb[7].mxu0  ;;  %v2548_v31 = vmul.f32 0.25, %v4272_v17 }
0x1f89   :  { %v2547_v30 = vmul.f32 0.25, %v2538_v25 }
0x1f8a   :  { %v2554_v63 = vsel %vm2553_vm2, %v2548_v31, -inf }
0x1f8b   :  { %v2550_v32 = vsel %vm2549_vm1, %v2547_v30, -inf }
0x1f8c   :  { %2551 = vmax.xlane.f32.xlu1 %v2550_v32  ;;  %v6070_v32 = vld [vmem:[%s6262_s11] ss:$0 sm:$0xff] }
0x1f90   :  { %2555 = vmax.xlane.f32.xlu1 %v2554_v63 }
0x2019   :  { %v2552_v33 = vpop.xlane.xlu1 %2551 }
0x201a   :  { %v2557_v35 = vsub.f32 %v2547_v30, %v2552_v33 }
0x201c   :  { %v2559_v38 = vmul.f32 1.442695, %v2557_v35  ;;  %v3041_v35 = vmul.f32 %v5624_v59, %v5926_v61 }
0x201d   :  { %v2556_v36 = vpop.xlane.xlu1 %2555 }
0x201e   :  { %v2558_v37 = vsub.f32 %v2548_v31, %v2556_v36 }
0x2020   :  { %v2561_v39 = vmul.f32 1.442695, %v2558_v37 }
0x2022   :  { %4931 = vpow2.f32 %v2561_v39 }
0x2023   :  { %4933 = vpow2.f32 %v2559_v38 }
0x202c   :  { %v4932_v41 = vpop.eup %4931 }
0x202d   :  { %v2566_v42 = vsel %vm2553_vm2, %v4932_v41, 0.0  ;;  %v4934_v57 = vpop.eup %4933 }
0x202e   :  { %2567 = vadd.xlane.f32.xlu1 %v2566_v42  ;;  %v2563_v43 = vsel %vm2549_vm1, %v4934_v57, 0.0 }
0x2032   :  { %2564 = vadd.xlane.f32.xlu1 %v2563_v43 }
0x2043   :  { %4912 = vrot.lane.b32.xlu1 %v4906_v28, %s5238_s6  ;;  %v2707_v28 = vld [vmem:[%s6264_s13] sm:$0xff] }
0x2044   :  { %v6061_v20 = vpack.c.bf16 %v2708_v62, %v2707_v28 }
0x2046   :  { %4438 = vmatprep.subr.bf16.mxu0 %v6061_v20 }
0x2047   :  { %4440 = vmatpush3.bf16.msra.mxu0 %v6061_v20 }
0x2048   :  { %4301 = vmatprep.subr.mxu0 %v5237_v1 }
0x20bb   :  { %v2568_v44 = vpop.xlane.xlu1 %2567 }
0x20bc   :  { %4935 = vrcp.f32 %v2568_v44 }
0x20bf   :  { %v2565_v45 = vpop.xlane.xlu1 %2564 }
0x20c0   :  { %4937 = vrcp.f32 %v2565_v45 }
0x20c3   :  { %v4913_v46 = vpop.permute.xlu1 %4912 }
0x20c4   :  { %v4915_v15 = vunpack.i.h.bf16 %v4913_v46  ;;  %v4914_v47 = vunpack.i.l.bf16 %v4913_v46 }
0x20c6   :  { %v4431_v49 = vpack.c.bf16 %v4915_v15, %v4914_v47  ;;  %v4936_v50 = vpop.eup %4935  ;;  %v6100_v15 = vld [vmem:[%s6265_s14] ss:$0 sm:$0xff] }
0x20c7   :  { %v2572_v54 = vmul.f32 %v4936_v50, %v4932_v41 }
0x20c8   :  { %4433 = vmatprep.subr.msk.bf16.mxu1 %vm6034_vm5, %v4431_v49 }
0x20c9   :  { %4436 = vmatpush3.bf16.msk.msra.mxu1 %vm6034_vm5, %v4431_v49 }
0x20ca   :  { %v4938_v51 = vpop.eup %4937  ;;  %4441 = vmatprep.subr.bf16.mxu1 %v5235_v0 }
0x20cb   :  { %v2570_v52 = vmul.f32 %v4938_v51, %v4934_v57 }
0x20cd   :  { %4277 = vmatprep.mubr.msk.f32.mxu1 %vm2549_vm1, %v2570_v52 }
0x20ce   :  { %4278 = vmatmul.mubr.msk.f32.vlgmr.msra.gmra.mrb[10].mxu1 %vm2549_vm1, %v2572_v54 }
0x20cf   :  { %4291 = vmatprep.mubr.msk.f32.mxu1 %vm5236_vm0, %v5237_v1 }
0x21a1   :  { %v4279_v56 = vpop.f32.mrb[10].mxu1 }
0x21a2   :  { %v2652_v60 = vpop.f32.mrb[11].mxu1  ;;  %v2667_v3 = vsel %vm2666_vm7, %v4279_v56, 0.0 }
0x21a3   :  { %2668 = vadd.xlane.f32.xlu1 %v2667_v3  ;;  %v2663_v5 = vsel %vm869_vm12, %v2652_v60, 0.0 }
0x21a4   :  { %2664 = vadd.xlane.f32.xlu0 %v2663_v5 }
0x21ba   :  { %3151 = vrot.lane.b32.xlu0 %v5951_v10, %s5249_s1 }
0x2230   :  { %v2669_v6 = vpop.xlane.xlu1 %2668 }
0x2231   :  { %v2672_v7 = vmul.f32 0.0625, %v2669_v6  ;;  %v2665_v8 = vpop.xlane.xlu0 %2664 }
0x2232   :  { %v2671_v18 = vmul.f32 0.0625, %v2665_v8 }
0x2233   :  { %v2674_v19 = vsub.f32 %v4279_v56, %v2672_v7 }
0x2234   :  { %v2673_v21 = vsub.f32 %v2652_v60, %v2671_v18 }
0x2235   :  { %v3152_v23 = vpop.permute.xlu0 %3151  ;;  %v2676_v2 = vmul.f32 %v2674_v19, %v2674_v19 }
0x2236   :  { %3154 = vxpose.xlu0.b32.start.end [1/1] (short) (narrow) %v3152_v23, 8  ;;  %v2675_v16 = vmul.f32 %v2673_v21, %v2673_v21 }
0x2237   :  { %v2680_v27 = vsel %vm2666_vm7, %v2676_v2, 0.0 }
0x2238   :  { %v2677_v26 = vsel %vm869_vm12, %v2675_v16, 0.0 }
0x2239   :  { %2678 = vadd.xlane.f32.xlu1 %v2677_v26 }
0x223a   :  { %3195 = vxpose.xlu0.b32.start.end [1/1] (short) (narrow) %v3193_v24, 8 }
0x223d   :  { %2681 = vadd.xlane.f32.xlu1 %v2680_v27 }
0x224e   :  { %3042 = vrot.lane.b32.xlu1 %v5951_v10, %s5251_s20 }
0x2263   :  { %4926 = vset.pattern.permute.xlu0 %v5248_v29  ;;  %v6075_v29 = vld [vmem:[%s6263_s12] ss:$0 sm:$0xff] }
0x22b6   :  { %v3170_v58 = vpop.trf.xlu0 }
0x22b7   :  { %3188 = vperm.xlu1 %4905, %v3170_v58  }
0x22ba   :  { %v3211_v61 = vpop.trf.xlu0 }
0x22bb   :  { %v3230_v44 = vrot.slane %v3211_v61, %v5611_v12 }
0x22c6   :  { %v2679_v10 = vpop.xlane.xlu1 %2678 }
0x22c7   :  { %v2683_v4 = vmul.f32 0.0625, %v2679_v10 }
0x22c9   :  { %v2685_v34 = vadd.f32 1e-05, %v2683_v4 }
0x22ca   :  { %v2682_v17 = vpop.xlane.xlu1 %2681 }
0x22cb   :  { %4939 = vrsqrt.f32 %v2685_v34  ;;  %v2684_v25 = vmul.f32 0.0625, %v2682_v17 }
0x22cd   :  { %v2686_v30 = vadd.f32 1e-05, %v2684_v25 }
0x22ce   :  { %v3043_v37 = vpop.permute.xlu1 %3042 }
0x22cf   :  { %4941 = vrsqrt.f32 %v2686_v30  ;;  %v3045_v41 = vmul.f32 %v3043_v37, %v3041_v35 }
0x22d5   :  { %v4940_v31 = vpop.eup %4939 }
0x22d6   :  { %v2689_v63 = vmul.f32 %v4940_v31, %v2673_v21 }
0x22d8   :  { %v2697_v33 = vmul.f32 %v6070_v32, %v2689_v63 }
0x22d9   :  { %v4942_v36 = vpop.eup %4941 }
0x22da   :  { %v2705_v38 = vadd.f32 %v6075_v29, %v2697_v33  ;;  %v2690_v39 = vmul.f32 %v4942_v36, %v2674_v19 }
0x22dc   :  { %4284 = vmatprep.mubr.msk.f32.mxu0 %vm869_vm12, %v2705_v38  ;;  %v2698_v42 = vmul.f32 %v6070_v32, %v2690_v39 }
0x22de   :  { %v2706_v57 = vadd.f32 %v6075_v29, %v2698_v42  ;;  %v2894_v42 = vld [vmem:[%s6268_s17 + $0x18] sm:$0xff] }
0x22e0   :  { %4285 = vmatmul.mubr.msk.f32.vlgmr.msra.gmra.mrb[8].mxu0 %vm869_vm12, %v2706_v57  ;;  %3046 = vxpose.xlu1.b32.start.end [1/1] (short) (narrow) %v3045_v41, 8  ;;  %v2893_v41 = vld [vmem:[%s6268_s17 + $0x10] sm:$0xff] }
0x22e1   :  { %4302 = vmatpush3.msra.mxu0 %v5569_v11  ;;  %4303 = vmatprep.mubr.msk.f32.mxu0 %vm5236_vm0, %v5237_v1  ;;  %v6117_v57 = vpack.c.bf16 %v2894_v42, %v2893_v41 }
0x22e2   :  { %4306 = vmatprep.subr.mxu0 %v5237_v1 }
0x22e3   :  { %4443 = vmatpush3.bf16.msra.mxu1 %v6117_v57 }
0x22e4   :  { %4444 = vmatprep.subr.bf16.mxu1 %v5235_v0 }
0x2336   :  { %v3189_v43 = vpop.permute.xlu1 %3188 }
0x2337   :  { %v3191_v45 = vmul.f32 %v5624_v59, %v3189_v43 }
0x2339   :  { %v3231_v11 = vmul.f32 %v3230_v44, %v3191_v45 }
0x2360   :  { %v3062_v46 = vpop.trf.xlu1 }
0x2361   :  { %4304 = vmatmul.mubr.msk.f32.vlgmr.msra.gmra.mrb[10].mxu0 %vm862_vm11, %v3062_v46 }
0x2362   :  { %4307 = vmatpush3.msk.msra.mxu0 %vm879_vm13, %v5583_v40  ;;  %4308 = vmatprep.mubr.msk.f32.mxu0 %vm5236_vm0, %v5237_v1 }
0x2365   :  { %4309 = vmatmul.mubr.msk.f32.vlgmr.msra.gmra.mrb[12].mxu0 %vm608_vm10, %v3231_v11 }
0x23b3   :  { %v4286_v12 = vpop.f32.mrb[8].mxu0 }
0x23b4   :  { %v2794_v59 = vadd.f32 %v4286_v12, %v6100_v15  ;;  %v2788_v47 = vpop.f32.mrb[9].mxu0 }
0x23b5   :  { %v2789_v49 = vadd.f32 %v6100_v15, %v2788_v47 }
0x23b6   :  { %v2800_v50 = vmul.f32 0.044715, %v2794_v59  ;;  %v2798_v18 = vmul.f32 0.5, %v2794_v59 }
0x23b7   :  { %v2799_v51 = vmul.f32 0.044715, %v2789_v49  ;;  %v2797_v21 = vmul.f32 0.5, %v2789_v49 }
0x23b8   :  { %v2802_v40 = vmul.f32 %v2800_v50, %v2794_v59 }
0x23b9   :  { %v2801_v52 = vmul.f32 %v2799_v51, %v2789_v49 }
0x23ba   :  { %v2804_v54 = vmul.f32 %v2802_v40, %v2794_v59 }
0x23bb   :  { %v2803_v56 = vmul.f32 %v2801_v52, %v2789_v49 }
0x23bc   :  { %v2806_v60 = vadd.f32 %v2804_v54, %v2794_v59 }
0x23bd   :  { %v2805_v3 = vadd.f32 %v2803_v56, %v2789_v49 }
0x23be   :  { %v2808_v5 = vmul.f32 0.7978846, %v2806_v60 }
0x23bf   :  { %v2807_v6 = vmul.f32 0.7978846, %v2805_v3  ;;  %v6134_v3 = vld [vmem:[%s6266_s15] ss:$0 sm:$0xff] }
0x23c0   :  { %4943 = vtanh.f32 %v2808_v5 }
0x23c1   :  { %4945 = vtanh.f32 %v2807_v6  ;;  %v6139_v6 = vld [vmem:[%s6267_s16] ss:$0 sm:$0xff] }
0x23ca   :  { %v4944_v7 = vpop.eup %4943 }
0x23cb   :  { %v4946_v8 = vpop.eup %4945  ;;  %v2812_v19 = vadd.f32 1.0, %v4944_v7 }
0x23cc   :  { %v2811_v23 = vadd.f32 1.0, %v4946_v8 }
0x23cd   :  { %v2814_v16 = vmul.f32 %v2812_v19, %v2798_v18 }
0x23ce   :  { %v2813_v24 = vmul.f32 %v2811_v23, %v2797_v21 }
0x23cf   :  { %v2820_v26 = vsel %vm2666_vm7, %v2814_v16, 0.0 }
0x23d0   :  { %2821 = vadd.xlane.f32.xlu1 %v2820_v26  ;;  %v2817_v2 = vsel %vm869_vm12, %v2813_v24, 0.0 }
0x23d1   :  { %2818 = vadd.xlane.f32.xlu0 %v2817_v2 }
0x2434   :  { %v3147_v27 = vpop.f32.mrb[10].mxu0 }
0x2435   :  { %v4305_v28 = vpop.f32.mrb[11].mxu0 }
0x2438   :  { %v3304_v62 = vpop.f32.mrb[12].mxu0 }
0x2439   :  { %v3309_v58 = vrot.slane %v3304_v62, 4  ;;  %v4310_v10 = vpop.f32.mrb[13].mxu0 }
0x243b   :  { %v3311_v4 = vsel %vm879_vm13, %v3147_v27, %v3309_v58  ;;  %v3315_v17 = vsel %vm479_vm8, %v3309_v58, 0.0 }
0x243c   :  { %v3312_v34 = vsel %vm474_vm4, %v3311_v4, 0.0 }
0x243d   :  { %3313 = vadd.xlane.f32.xlu0 %v3312_v34 }
0x2441   :  { %3316 = vadd.xlane.f32.xlu0 %v3315_v17 }
0x245d   :  { %v2822_v25 = vpop.xlane.xlu1 %2821 }
0x245e   :  { %v2824_v30 = vmul.f32 0.0625, %v2822_v25  ;;  %v2819_v31 = vpop.xlane.xlu0 %2818 }
0x245f   :  { %v2823_v63 = vmul.f32 0.0625, %v2819_v31  ;;  %v2891_v31 = vld [vmem:[%s6268_s17] sm:$0xff] }
0x2460   :  { %v2826_v33 = vsub.f32 %v2814_v16, %v2824_v30 }
0x2461   :  { %v2825_v35 = vsub.f32 %v2813_v24, %v2823_v63  ;;  %v2892_v63 = vld [vmem:[%s6268_s17 + $0x8] sm:$0xff]  ;;  %s5252_s17 = smov [#allocation16]  }
0x2462   :  { %v2828_v38 = vmul.f32 %v2826_v33, %v2826_v33 }
0x2463   :  { %v2827_v36 = vmul.f32 %v2825_v35, %v2825_v35 }
0x2464   :  { %v2832_v39 = vsel %vm2666_vm7, %v2828_v38, 0.0 }
0x2465   :  { %v2829_v37 = vsel %vm869_vm12, %v2827_v36, 0.0  ;;  %v6159_v36 = vpack.c.bf16 %v2892_v63, %v2891_v31 }
0x2466   :  { %2830 = vadd.xlane.f32.xlu0 %v2829_v37 }
0x246a   :  { %2833 = vadd.xlane.f32.xlu0 %v2832_v39 }
0x24ca   :  { %v3314_v61 = vpop.xlane.xlu0 %3313 }
0x24cb   :  { %v3318_v43 = vmul.f32 0.03125, %v3314_v61 }
0x24cd   :  { %v6121_v44 = vsub.f32 %v3311_v4, %v3318_v43 }
0x24ce   :  { %v3317_v45 = vpop.xlane.xlu0 %3316 }
0x24cf   :  { %v3319_v46 = vmul.f32 0.03125, %v3317_v45  ;;  %v3322_v11 = vmul.f32 %v6121_v44, %v6121_v44 }
0x24d1   :  { %v6125_v12 = vsub.f32 %v3309_v58, %v3319_v46  ;;  %v3324_v59 = vsel %vm474_vm4, %v3322_v11, 0.0 }
0x24d2   :  { %3325 = vadd.xlane.f32.xlu0 %v3324_v59 }
0x24d3   :  { %v3323_v47 = vmul.f32 %v6125_v12, %v6125_v12 }
0x24d5   :  { %v3327_v49 = vsel %vm479_vm8, %v3323_v47, 0.0  ;;  %vm2859_vm8 = vcmp.lt.s32.totalorder %v5608_v9, 4 }
0x24d6   :  { %3328 = vadd.xlane.f32.xlu0 %v3327_v49 }
0x24f3   :  { %v2831_v50 = vpop.xlane.xlu0 %2830 }
0x24f4   :  { %v2835_v51 = vmul.f32 0.0625, %v2831_v50 }
0x24f6   :  { %v2837_v40 = vadd.f32 1e-05, %v2835_v51 }
0x24f7   :  { %v2834_v52 = vpop.xlane.xlu0 %2833 }
0x24f8   :  { %4947 = vrsqrt.f32 %v2837_v40  ;;  %v2836_v54 = vmul.f32 0.0625, %v2834_v52 }
0x24fa   :  { %v2838_v56 = vadd.f32 1e-05, %v2836_v54 }
0x24fc   :  { %4949 = vrsqrt.f32 %v2838_v56 }
0x2502   :  { %v4948_v60 = vpop.eup %4947 }
0x2503   :  { %v2841_v5 = vmul.f32 %v4948_v60, %v2825_v35 }
0x2505   :  { %v2849_v7 = vmul.f32 %v6134_v3, %v2841_v5 }
0x2506   :  { %v4950_v8 = vpop.eup %4949 }
0x2507   :  { %v2857_v18 = vadd.f32 %v6139_v6, %v2849_v7  ;;  %v2842_v19 = vmul.f32 %v4950_v8, %v2826_v33 }
0x2509   :  { %v2850_v21 = vmul.f32 %v6134_v3, %v2842_v19  ;;  %v2865_v23 = vsel %vm2859_vm8, %v2857_v18, 0.0  ;;  %v2878_v16 = vsel %vm2859_vm8, 0.0, %v2857_v18 }
0x250a   :  { %v2867_v24 = vsel %vm869_vm12, %v2865_v23, 0.0  ;;  %v2880_v27 = vsel %vm869_vm12, %v2878_v16, 0.0 }
0x250b   :  { %v2858_v26 = vadd.f32 %v6139_v6, %v2850_v21  ;;  %v2870_v2 = vrot.slane %v2867_v24, 4 }
0x250d   :  { %v2881_v28 = vsel %vm2666_vm7, %v2858_v26, 0.0  ;;  %v2871_v10 = vadd.f32 %v2870_v2, %v2867_v24 }
0x250e   :  { %v2882_v62 = vadd.f32 %v2881_v28, %v2880_v27 }
0x250f   :  { %v2872_v17 = vrot.slane %v2871_v10, 2 }
0x2510   :  { %v2883_v58 = vrot.slane %v2882_v62, 4 }
0x2511   :  { %v2873_v33 = vadd.f32 %v2872_v17, %v2871_v10 }
0x2512   :  { %v2884_v4 = vadd.f32 %v2883_v58, %v2882_v62 }
0x2513   :  { %v2874_v38 = vrot.slane %v2873_v33, 1 }
0x2514   :  { %v2885_v34 = vrot.slane %v2884_v4, 2 }
0x2515   :  { %v2875_v39 = vadd.f32 %v2874_v38, %v2873_v33 }
0x2516   :  { %v2886_v25 = vadd.f32 %v2885_v34, %v2884_v4 }
0x2517   :  { %v2877_v41 = vmul.f32 0.25, %v2875_v39 }
0x2518   :  { %v2887_v30 = vrot.slane %v2886_v25, 1 }
0x251a   :  { %v2888_v35 = vadd.f32 %v2887_v30, %v2886_v25 }
0x251c   :  { %v2890_v37 = vmul.f32 0.125, %v2888_v35 }
0x251e   :  { %4292 = vmatmul.mubr.msk.f32.vlgmr.msra.gmra.mrb[12].mxu1 %vm869_vm12, %v2890_v37 }
0x251f   :  { %4446 = vmatpush3.bf16.msra.mxu1 %v6159_v36  ;;  %4298 = vmatprep.mubr.msk.f32.mxu1 %vm5236_vm0, %v5237_v1 }
0x2520   :  { %4448 = vmatprep.subr.bf16.mxu1 %v5997_v53 }
0x2526   :  { %4299 = vmatmul.mubr.msk.f32.vlgmr.msra.gmra.mrb[12].mxu1 %vm869_vm12, %v2877_v41 }
0x2527   :  { %4450 = vmatpush3.bf16.msra.mxu1 %v5997_v53 }
0x2528   :  { %4452 = vmatprep.subr.bf16.mxu1 %v5999_v55 }
0x252b   :  { %4454 = vmatpush3.bf16.msra.mxu1 %v5999_v55 }
0x255f   :  { %v3326_v42 = vpop.xlane.xlu0 %3325 }
0x2560   :  { %v3330_v61 = vmul.f32 0.03125, %v3326_v42 }
0x2562   :  { %v3332_v43 = vadd.f32 1e-05, %v3330_v61 }
0x2563   :  { %v3329_v45 = vpop.xlane.xlu0 %3328 }
0x2564   :  { %4951 = vrsqrt.f32 %v3332_v43  ;;  %v3331_v46 = vmul.f32 0.03125, %v3329_v45 }
0x2566   :  { %v3333_v11 = vadd.f32 1e-05, %v3331_v46 }
0x2568   :  { %4953 = vrsqrt.f32 %v3333_v11 }
0x256e   :  { %v4952_v59 = vpop.eup %4951 }
0x256f   :  { %v3336_v47 = vmul.f32 %v4952_v59, %v6121_v44 }
0x2571   :  { %v3338_v49 = vmul.f32 %v6005_v13, %v3336_v47 }
0x2572   :  { %v4954_v50 = vpop.eup %4953 }
0x2573   :  { %v3340_v53 = vadd.f32 %v6007_v22, %v3338_v49  ;;  %v3337_v51 = vmul.f32 %v4954_v50, %v6125_v12 }
0x2575   :  { %4319 = vmatprep.mubr.msk.f32.mxu1 %vm474_vm4, %v3340_v53  ;;  %v3339_v55 = vmul.f32 %v6005_v13, %v3337_v51 }
0x2577   :  { %v3341_v40 = vadd.f32 %v6007_v22, %v3339_v55 }
0x2579   :  { %4320 = vmatmul.mubr.msk.f32.vlgmr.msra.gmra.mrb[14].mxu1 %vm474_vm4, %v3341_v40  ;;  %vm3957_vm4 = vcmask 25600  }
0x25f9   :  { %v6178_v52 = vpop.f32.mrb[12].mxu1 }
0x25fa   :  { %v4300_v54 = vpop.f32.mrb[13].mxu1 }
0x264c   :  { %v4321_v56 = vpop.f32.mrb[14].mxu1 }
0x264d   :  { %v3414_v44 = vpop.f32.mrb[15].mxu1 }
0x264e   :  { %v4916_v60 = vpack.i.bf16 %v4321_v56, %v3414_v44  ;;  %4326 = vmatprep.mubr.msk.f32.mxu0 %vm869_vm12, %v3414_v44 }
0x2650   :  { %4917 = vrot.lane.b32.xlu0 %v4916_v60, %s5249_s1 }
0x26c2   :  { %v4918_v5 = vpop.permute.xlu0 %4917 }
0x26c3   :  { %v4920_v12 = vunpack.i.h.bf16 %v4918_v5  ;;  %v4919_v7 = vunpack.i.l.bf16 %v4918_v5 }
0x26c5   :  { %v4455_v8 = vpack.c.bf16 %v4920_v12, %v4919_v7 }
0x26c7   :  { %4457 = vmatprep.subr.msk.bf16.mxu0 %vm6019_vm15, %v4455_v8 }
0x26c8   :  { %4460 = vmatpush3.bf16.xpose.msk.msra.mxu0 %vm6019_vm15, %v4455_v8 }
0x26c9   :  { %4468 = vmatprep.subr.bf16.mxu0 %v6061_v20 }
0x26cf   :  { %4327 = vmatmul.mubr.msk.f32.vlgmr.msra.gmra.mrb[14].mxu0 %vm869_vm12, %v4321_v56 }
0x26d0   :  { %4470 = vmatpush3.bf16.msra.mxu0 %v6061_v20 }
0x27a2   :  { %v4328_v13 = vpop.f32.mrb[14].mxu0 }
0x27a3   :  { %v3503_v22 = vpop.f32.mrb[15].mxu0  ;;  %v3513_v19 = vmul.f32 0.25, %v4328_v13 }
0x27a4   :  { %v3512_v18 = vmul.f32 0.25, %v3503_v22 }
0x27a5   :  { %v3517_v23 = vsel %vm2553_vm2, %v3513_v19, -inf }
0x27a6   :  { %v3514_v21 = vsel %vm2549_vm1, %v3512_v18, -inf }
0x27a7   :  { %3515 = vmax.xlane.f32.xlu1 %v3514_v21 }
0x27ab   :  { %3518 = vmax.xlane.f32.xlu1 %v3517_v23 }
0x2834   :  { %v3516_v16 = vpop.xlane.xlu1 %3515 }
0x2835   :  { %v3520_v24 = vsub.f32 %v3512_v18, %v3516_v16 }
0x2837   :  { %v3522_v2 = vmul.f32 1.442695, %v3520_v24 }
0x2838   :  { %v3519_v14 = vpop.xlane.xlu1 %3518 }
0x2839   :  { %v3521_v26 = vsub.f32 %v3513_v19, %v3519_v14 }
0x283b   :  { %v3524_v27 = vmul.f32 1.442695, %v3521_v26 }
0x283d   :  { %4955 = vpow2.f32 %v3524_v27 }
0x283e   :  { %4957 = vpow2.f32 %v3522_v2 }
0x2847   :  { %v4956_v28 = vpop.eup %4955 }
0x2848   :  { %v3529_v20 = vsel %vm2553_vm2, %v4956_v28, 0.0  ;;  %v4958_v62 = vpop.eup %4957 }
0x2849   :  { %3530 = vadd.xlane.f32.xlu1 %v3529_v20  ;;  %v3526_v58 = vsel %vm2549_vm1, %v4958_v62, 0.0 }
0x284d   :  { %3527 = vadd.xlane.f32.xlu1 %v3526_v58 }
0x285e   :  { %4922 = vrot.lane.b32.xlu1 %v4916_v60, %s5238_s6  ;;  %s3965_s6 = sshll.u32 %s5252_s17, 4  ;;  %s3966_s6 = int_to_ptr.vmem [resolvable:$true] %s3965_s6 }
0x285f   :  { %s5151_s29 = scalar_lea.vmem %s3966_s6, 32  ;;  %p5156_p12 = scmp.lt.s32.totalorder %s3966_s6, %s3966_s6 }
0x2860   :  { %p5152_p11 = scmp.ne.s32.totalorder %s3966_s6, %s5151_s29  ;;  %p5157_p13 = scmp.lt.s32.totalorder %s5151_s29, %s5151_s29 }
0x2862   :  { %p5158_p0 = por %p5157_p13, %p5156_p12 }
0x2864   :  { %p5159_p1 = pnand %p5158_p0, %p5152_p11 }
0x28d6   :  { %v3531_v10 = vpop.xlane.xlu1 %3530 }
0x28d7   :  { %4959 = vrcp.f32 %v3531_v10 }
0x28da   :  { %v3528_v4 = vpop.xlane.xlu1 %3527 }
0x28db   :  { %4961 = vrcp.f32 %v3528_v4 }
0x28de   :  { %v4923_v34 = vpop.permute.xlu1 %4922 }
0x28df   :  { %v4925_v17 = vunpack.i.h.bf16 %v4923_v34  ;;  %v4924_v25 = vunpack.i.l.bf16 %v4923_v34 }
0x28e1   :  { %v4461_v30 = vpack.c.bf16 %v4925_v17, %v4924_v25  ;;  %v4960_v31 = vpop.eup %4959 }
0x28e2   :  { %v3535_v35 = vmul.f32 %v4960_v31, %v4956_v28 }
0x28e3   :  { %4463 = vmatprep.subr.msk.bf16.mxu1 %vm6034_vm5, %v4461_v30 }
0x28e4   :  { %4466 = vmatpush3.bf16.msk.msra.mxu1 %vm6034_vm5, %v4461_v30 }
0x28e5   :  { %v4962_v63 = vpop.eup %4961  ;;  %4471 = vmatprep.subr.bf16.mxu1 %v5235_v0 }
0x28e6   :  { %v3533_v33 = vmul.f32 %v4962_v63, %v4958_v62 }
0x28e8   :  { %4333 = vmatprep.mubr.msk.f32.mxu1 %vm2549_vm1, %v3533_v33 }
0x28e9   :  { %4334 = vmatmul.mubr.msk.f32.vlgmr.msra.gmra.mrb[16].mxu1 %vm2549_vm1, %v3535_v35 }
0x28ea   :  { %4473 = vmatpush3.bf16.msra.mxu1 %v6117_v57  ;;  %4347 = vmatprep.mubr.msk.f32.mxu1 %vm5236_vm0, %v5237_v1 }
0x28eb   :  { %4474 = vmatprep.subr.bf16.mxu1 %v5235_v0 }
0x29bc   :  { %v4335_v37 = vpop.f32.mrb[16].mxu1 }
0x29bd   :  { %v3615_v38 = vpop.f32.mrb[17].mxu1  ;;  %v3627_v48 = vsel %vm2666_vm7, %v4335_v37, 0.0 }
0x29be   :  { %3628 = vadd.xlane.f32.xlu1 %v3627_v48  ;;  %v3624_v39 = vsel %vm869_vm12, %v3615_v38, 0.0 }
0x29bf   :  { %3625 = vadd.xlane.f32.xlu0 %v3624_v39 }
0x2a4b   :  { %v3629_v41 = vpop.xlane.xlu1 %3628 }
0x2a4c   :  { %v3631_v42 = vmul.f32 0.0625, %v3629_v41  ;;  %v3626_v61 = vpop.xlane.xlu0 %3625 }
0x2a4d   :  { %v3630_v43 = vmul.f32 0.0625, %v3626_v61 }
0x2a4e   :  { %v3633_v45 = vsub.f32 %v4335_v37, %v3631_v42 }
0x2a4f   :  { %v3632_v46 = vsub.f32 %v3615_v38, %v3630_v43 }
0x2a50   :  { %v3635_v59 = vmul.f32 %v3633_v45, %v3633_v45 }
0x2a51   :  { %v3634_v57 = vmul.f32 %v3632_v46, %v3632_v46 }
0x2a52   :  { %v3639_v0 = vsel %vm2666_vm7, %v3635_v59, 0.0 }
0x2a53   :  { %v3636_v11 = vsel %vm869_vm12, %v3634_v57, 0.0 }
0x2a54   :  { %3637 = vadd.xlane.f32.xlu0 %v3636_v11 }
0x2a58   :  { %3640 = vadd.xlane.f32.xlu0 %v3639_v0 }
0x2ae1   :  { %v3638_v47 = vpop.xlane.xlu0 %3637 }
0x2ae2   :  { %v3642_v49 = vmul.f32 0.0625, %v3638_v47 }
0x2ae4   :  { %v3644_v50 = vadd.f32 1e-05, %v3642_v49 }
0x2ae5   :  { %v3641_v53 = vpop.xlane.xlu0 %3640 }
0x2ae6   :  { %4963 = vrsqrt.f32 %v3644_v50  ;;  %v3643_v51 = vmul.f32 0.0625, %v3641_v53 }
0x2ae8   :  { %v3645_v55 = vadd.f32 1e-05, %v3643_v51 }
0x2aea   :  { %4965 = vrsqrt.f32 %v3645_v55 }
0x2af0   :  { %v4964_v40 = vpop.eup %4963 }
0x2af1   :  { %v3648_v54 = vmul.f32 %v4964_v40, %v3632_v46 }
0x2af3   :  { %v3650_v56 = vmul.f32 %v6070_v32, %v3648_v54 }
0x2af4   :  { %v4966_v44 = vpop.eup %4965 }
0x2af5   :  { %v3652_v60 = vadd.f32 %v6075_v29, %v3650_v56  ;;  %v3649_v5 = vmul.f32 %v4966_v44, %v3633_v45 }
0x2af7   :  { %4340 = vmatprep.mubr.msk.f32.mxu0 %vm869_vm12, %v3652_v60  ;;  %v3651_v12 = vmul.f32 %v6070_v32, %v3649_v5 }
0x2af9   :  { %v3653_v7 = vadd.f32 %v6075_v29, %v3651_v12 }
0x2afb   :  { %4341 = vmatmul.mubr.msk.f32.vlgmr.msra.gmra.mrb[16].mxu0 %vm869_vm12, %v3653_v7 }
0x2bce   :  { %v4342_v8 = vpop.f32.mrb[16].mxu0 }
0x2bcf   :  { %v3732_v13 = vadd.f32 %v4342_v8, %v6100_v15  ;;  %v3726_v22 = vpop.f32.mrb[17].mxu0 }
0x2bd0   :  { %v3727_v18 = vadd.f32 %v6100_v15, %v3726_v22 }
0x2bd1   :  { %v3738_v19 = vmul.f32 0.044715, %v3732_v13  ;;  %v3736_v4 = vmul.f32 0.5, %v3732_v13 }
0x2bd2   :  { %v3737_v21 = vmul.f32 0.044715, %v3727_v18  ;;  %v3735_v20 = vmul.f32 0.5, %v3727_v18 }
0x2bd3   :  { %v3740_v23 = vmul.f32 %v3738_v19, %v3732_v13 }
0x2bd4   :  { %v3739_v16 = vmul.f32 %v3737_v21, %v3727_v18 }
0x2bd5   :  { %v3742_v24 = vmul.f32 %v3740_v23, %v3732_v13 }
0x2bd6   :  { %v3741_v14 = vmul.f32 %v3739_v16, %v3727_v18 }
0x2bd7   :  { %v3744_v26 = vadd.f32 %v3742_v24, %v3732_v13 }
0x2bd8   :  { %v3743_v2 = vadd.f32 %v3741_v14, %v3727_v18 }
0x2bd9   :  { %v3746_v27 = vmul.f32 0.7978846, %v3744_v26 }
0x2bda   :  { %v3745_v32 = vmul.f32 0.7978846, %v3743_v2 }
0x2bdb   :  { %4967 = vtanh.f32 %v3746_v27 }
0x2bdc   :  { %4969 = vtanh.f32 %v3745_v32 }
0x2be5   :  { %v4968_v29 = vpop.eup %4967 }
0x2be6   :  { %v4970_v28 = vpop.eup %4969  ;;  %v3750_v58 = vadd.f32 1.0, %v4968_v29 }
0x2be7   :  { %v3749_v62 = vadd.f32 1.0, %v4970_v28 }
0x2be8   :  { %v3752_v34 = vmul.f32 %v3750_v58, %v3736_v4 }
0x2be9   :  { %v3751_v10 = vmul.f32 %v3749_v62, %v3735_v20 }
0x2bea   :  { %v3756_v17 = vsel %vm2666_vm7, %v3752_v34, 0.0 }
0x2beb   :  { %v3753_v15 = vsel %vm869_vm12, %v3751_v10, 0.0 }
0x2bec   :  { %3754 = vadd.xlane.f32.xlu0 %v3753_v15 }
0x2bf0   :  { %3757 = vadd.xlane.f32.xlu0 %v3756_v17 }
0x2c79   :  { %v3755_v25 = vpop.xlane.xlu0 %3754 }
0x2c7a   :  { %v3759_v30 = vmul.f32 0.0625, %v3755_v25 }
0x2c7c   :  { %v3761_v31 = vsub.f32 %v3751_v10, %v3759_v30 }
0x2c7d   :  { %v3758_v63 = vpop.xlane.xlu0 %3757 }
0x2c7e   :  { %v3760_v33 = vmul.f32 0.0625, %v3758_v63  ;;  %v3763_v35 = vmul.f32 %v3761_v31, %v3761_v31 }
0x2c80   :  { %v3762_v37 = vsub.f32 %v3752_v34, %v3760_v33  ;;  %v3765_v38 = vsel %vm869_vm12, %v3763_v35, 0.0 }
0x2c81   :  { %3766 = vadd.xlane.f32.xlu0 %v3765_v38 }
0x2c82   :  { %v3764_v48 = vmul.f32 %v3762_v37, %v3762_v37 }
0x2c84   :  { %v3768_v39 = vsel %vm2666_vm7, %v3764_v48, 0.0 }
0x2c85   :  { %3769 = vadd.xlane.f32.xlu1 %v3768_v39 }
0x2d0e   :  { %v3767_v41 = vpop.xlane.xlu0 %3766 }
0x2d0f   :  { %v3771_v42 = vmul.f32 0.0625, %v3767_v41 }
0x2d11   :  { %v3773_v61 = vadd.f32 1e-05, %v3771_v42 }
0x2d12   :  { %v3770_v43 = vpop.xlane.xlu1 %3769 }
0x2d13   :  { %4971 = vrsqrt.f32 %v3773_v61  ;;  %v3772_v45 = vmul.f32 0.0625, %v3770_v43 }
0x2d15   :  { %v3774_v46 = vadd.f32 1e-05, %v3772_v45 }
0x2d17   :  { %4973 = vrsqrt.f32 %v3774_v46 }
0x2d1d   :  { %v4972_v57 = vpop.eup %4971 }
0x2d1e   :  { %v3777_v11 = vmul.f32 %v4972_v57, %v3761_v31 }
0x2d20   :  { %v3779_v59 = vmul.f32 %v6134_v3, %v3777_v11 }
0x2d21   :  { %v4974_v0 = vpop.eup %4973 }
0x2d22   :  { %v3781_v47 = vadd.f32 %v6139_v6, %v3779_v59  ;;  %v3778_v49 = vmul.f32 %v4974_v0, %v3762_v37 }
0x2d24   :  { %v3780_v50 = vmul.f32 %v6134_v3, %v3778_v49  ;;  %v3783_v53 = vsel %vm2859_vm8, %v3781_v47, 0.0  ;;  %v3795_v51 = vsel %vm2859_vm8, 0.0, %v3781_v47 }
0x2d25   :  { %v3785_v55 = vsel %vm869_vm12, %v3783_v53, 0.0  ;;  %v3797_v56 = vsel %vm869_vm12, %v3795_v51, 0.0 }
0x2d26   :  { %v3782_v40 = vadd.f32 %v6139_v6, %v3780_v50  ;;  %v3788_v54 = vrot.slane %v3785_v55, 4 }
0x2d28   :  { %v3798_v44 = vsel %vm2666_vm7, %v3782_v40, 0.0  ;;  %v3789_v12 = vadd.f32 %v3788_v54, %v3785_v55 }
0x2d29   :  { %v3799_v60 = vadd.f32 %v3798_v44, %v3797_v56 }
0x2d2a   :  { %v3790_v8 = vrot.slane %v3789_v12, 2 }
0x2d2b   :  { %v3800_v5 = vrot.slane %v3799_v60, 4 }
0x2d2c   :  { %v3791_v18 = vadd.f32 %v3790_v8, %v3789_v12 }
0x2d2d   :  { %v3801_v7 = vadd.f32 %v3800_v5, %v3799_v60 }
0x2d2e   :  { %v3792_v21 = vrot.slane %v3791_v18, 1 }
0x2d2f   :  { %v3802_v3 = vrot.slane %v3801_v7, 2 }
0x2d30   :  { %v3793_v6 = vadd.f32 %v3792_v21, %v3791_v18 }
0x2d31   :  { %v3803_v13 = vadd.f32 %v3802_v3, %v3801_v7 }
0x2d32   :  { %v3794_v23 = vmul.f32 0.25, %v3793_v6 }
0x2d33   :  { %v3804_v22 = vrot.slane %v3803_v13, 1 }
0x2d35   :  { %v3805_v9 = vadd.f32 %v3804_v22, %v3803_v13 }
0x2d37   :  { %v3806_v19 = vmul.f32 0.125, %v3805_v9 }
0x2d39   :  { %4348 = vmatmul.mubr.msk.f32.vlgmr.msra.gmra.mrb[18].mxu1 %vm869_vm12, %v3806_v19 }
0x2d3a   :  { %4476 = vmatpush3.bf16.msra.mxu1 %v6159_v36  ;;  %4354 = vmatprep.mubr.msk.f32.mxu1 %vm5236_vm0, %v5237_v1 }
0x2d41   :  { %4355 = vmatmul.mubr.msk.f32.vlgmr.msra.gmra.mrb[18].mxu1 %vm869_vm12, %v3794_v23 }
0x2e14   :  { %v3949_v16 = vpop.f32.mrb[18].mxu1 }
0x2e15   :  { %v3954_v24 = vrot.slane %v3949_v16, 7  ;;  %v4356_v14 = vpop.f32.mrb[19].mxu1 }
0x2e17   :  { %v3956_v26 = vsel %vm468_vm6, %v6178_v52, %v3954_v24 }
0x2e18   :  { %3958 = vst.msk [vmem:[#allocation16] sm:$0x3] %vm3957_vm4, %v3956_v26 }
0x2e19   :  { %5162 = shalt.err (!%p5159_p1)
}
0x2e1a   :  { %s5163_s3 = scalar_lea.hbm %s6269_s18, 32 }
0x2e1b   :  { %p5164_p2 = scmp.ne.s32.totalorder %s6269_s18, %s5163_s3  ;;  %p5167_p3 = scmp.lt.u32.totalorder %s5163_s3, %s6269_s18 }
0x2e1d   :  { %p5169_p4 = pnand %p5167_p3, %p5164_p2 }
0x2e1f   :  { %5172 = shalt.err (!%p5169_p4)
}
0x2e20   :  { %3968 = dma.vmem_to_hbm [thread:$0]  %s3966_s6, 32, %s6269_s18, [#allocation4]  }
0x2e21   :  { %5203 = dma.done.wait [#allocation4], 32  }
0x2e22   :  { %5204 = vsyncadd [#allocation4], 4294967264 }
0x2e23   :  { %3972 = vsyncpa [#allocation3], 1 }
0x2e24   :  { %3973 = vsyncpa [#allocation6], 1 }
0x2e25   :  { %3974 = vsyncpa [#allocation9], 1 }
0x2e26   :  { %3975 = vsyncpa [#allocation12], 1 }
0x2e27   :  { %3976 = vsyncpa [#allocation15], 1 }
0x2e28   :  { %3977 = vsyncpa [#allocation4], 1 }

</bundles_post_ra>
